<compile_context>
chip_gen: v7x
topology: tpu7x:2x2x1
jax: 0.10.0
libtpu: 0.0.40
codegen_flags: <defaults>
</compile_context>

<pallas_src>
from functools import partial

import jax
import jax.numpy as jnp
from jax import lax
from jax.experimental import pallas as pl
from jax.experimental.pallas import tpu as pltpu

EPS = 1e-5
_VMEM_LIMIT = 48 * 1024 * 1024  # < 64 MiB physical VMEM on v7x; safe on v5e/v6e.


def _cparams(sem):
    return pltpu.CompilerParams(dimension_semantics=sem,
                                vmem_limit_bytes=_VMEM_LIMIT)


def _pick_tile(total, target, mult=1):
    """Largest divisor of `total` that is <= target and a multiple of `mult`.
    Falls back to the smallest such divisor, then to `total` (full extent)."""
    target = max(int(target), 1)
    divs = [d for d in range(1, total + 1) if total % d == 0 and d % mult == 0]
    ok = [d for d in divs if d <= target]
    if ok:
        return max(ok)
    return min(divs) if divs else total


# ----------------------------------------------------------------------------
# Fused conv kernels:
#   [BN(scale,shift) + ReLU] -> zero-pad halo in VMEM -> im2col into a VMEM
#   scratch -> ONE MXU matmul (bf16 x bf16 -> f32 acc) -> bf16 raw output
#   + per-tile shifted BN partial stats (sum, centered sum-of-squares).
# ----------------------------------------------------------------------------
def _spatial_conv_kernel(*refs, apply_act):
    """1x3x3 conv on a block of (n, d) frames.

    apply_act=True : refs = (x, scale, shift, w, o, stats, xp, patch)
    apply_act=False: refs = (x,               w, o, stats, xp, patch)
      x     : (TB, H, W, Cin)       raw previous conv output (bf16) or the
                                    block input (f32) when apply_act=False
      scale/shift : (1, 1, 1, Cin)  f32 folded BN affine of the *previous* BN
      w     : (9*Cin, Cout) bf16    rows ordered (kh, kw, cin)
      o     : (TB*H*W, Cout) bf16   raw conv output
      stats : (1, 2, Cout) f32      [sum ; centered sum-of-squares]
      xp    : (TB, H+2, W+2, Cin)   bf16 VMEM scratch (halo-padded activation)
      patch : (TB*H*W, 9*Cin)       bf16 VMEM scratch (im2col patch)
    """
    if apply_act:
        x_ref, scale_ref, shift_ref, w_ref, o_ref, stats_ref, xp_ref, patch_ref = refs
    else:
        x_ref, w_ref, o_ref, stats_ref, xp_ref, patch_ref = refs
        scale_ref = shift_ref = None

    TB, Hp, Wp, Cin = xp_ref.shape
    H, W = Hp - 2, Wp - 2
    M = TB * H * W

    if apply_act:
        y = x_ref[...].astype(jnp.float32) * scale_ref[...] + shift_ref[...]
        y = jnp.maximum(y, 0.0).astype(jnp.bfloat16)
    else:
        y = x_ref[...].astype(jnp.bfloat16)

    # Zero-pad the halo inside VMEM (H, W are full extents so the halo is
    # entirely inside the block: no cross-block data needed).
    zrow = jnp.zeros((TB, 1, Wp, Cin), jnp.bfloat16)
    zcol = jnp.zeros((TB, H, 1, Cin), jnp.bfloat16)
    xp_ref[:, 0:1, :, :] = zrow
    xp_ref[:, H + 1:H + 2, :, :] = zrow
    xp_ref[:, 1:H + 1, 0:1, :] = zcol
    xp_ref[:, 1:H + 1, W + 1:W + 2, :] = zcol
    xp_ref[:, 1:H + 1, 1:W + 1, :] = y

    # Build the (M, 9*Cin) im2col patch by per-tap stores into a persistent
    # VMEM scratch (no tap list + concatenate copies).
    xp = xp_ref[...]
    for kh in range(3):                              # static unroll: 9 taps
        for kw in range(3):
            tap = kh * 3 + kw
            patch_ref[:, tap * Cin:(tap + 1) * Cin] = (
                xp[:, kh:kh + H, kw:kw + W, :].reshape(M, Cin))

    acc = jnp.dot(patch_ref[...], w_ref[...], preferred_element_type=jnp.float32)
    o_ref[...] = acc.astype(o_ref.dtype)

    # Shifted per-tile stats for a numerically stable parallel variance.
    mu = jnp.mean(acc, axis=0, keepdims=True)
    ssum = jnp.sum(acc, axis=0, keepdims=True)
    m2 = jnp.sum(jnp.square(acc - mu), axis=0, keepdims=True)
    stats_ref[...] = jnp.concatenate([ssum, m2], axis=0).reshape(1, 2, acc.shape[1])


def _temporal_conv_kernel(x_ref, scale_ref, shift_ref, w_ref, o_ref, stats_ref,
                          patch_ref):
    """3x1x1 conv on one (n, hw-chunk) block, fused with BN+ReLU of its input.

    x_ref  : (1, D, THW, Cin) bf16  raw previous conv output (unnormalized)
    scale/shift : (1, 1, 1, Cin) f32
    w_ref  : (3*Cin, Cout) bf16     rows ordered (kt, cin)
    o_ref  : (1, D, THW, Cout) bf16 raw conv output
    stats  : (1, 1, 2, Cout) f32    [sum ; centered sum-of-squares]
    patch  : (D*THW, 3*Cin) bf16    VMEM scratch (im2col patch)
    """
    _, D, THW, Cin = x_ref.shape
    M = D * THW

    y = x_ref[...].astype(jnp.float32) * scale_ref[...] + shift_ref[...]
    y = jnp.maximum(y, 0.0).astype(jnp.bfloat16).reshape(M, Cin)

    # Tap kt holds the input at temporal offset d + (kt - 1); D is a full
    # extent so the temporal zero-pad is entirely inside the block.
    V = (D - 1) * THW
    zt = jnp.zeros((THW, Cin), jnp.bfloat16)
    patch_ref[0:THW, 0:Cin] = zt
    patch_ref[THW:M, 0:Cin] = y[0:V]
    patch_ref[:, Cin:2 * Cin] = y
    patch_ref[0:V, 2 * Cin:3 * Cin] = y[THW:M]
    patch_ref[V:M, 2 * Cin:3 * Cin] = zt

    acc = jnp.dot(patch_ref[...], w_ref[...], preferred_element_type=jnp.float32)
    Cout = acc.shape[1]
    o_ref[...] = acc.reshape(1, D, THW, Cout).astype(o_ref.dtype)

    mu = jnp.mean(acc, axis=0, keepdims=True)
    ssum = jnp.sum(acc, axis=0, keepdims=True)
    m2 = jnp.sum(jnp.square(acc - mu), axis=0, keepdims=True)
    stats_ref[...] = jnp.concatenate([ssum, m2], axis=0).reshape(1, 1, 2, Cout)


def _bn_add_relu_kernel(x_ref, res_ref, scale_ref, shift_ref, o_ref):
    # Lane-dense (rows, HW*C) view: unmasked full-width loads/stores.
    y = x_ref[...].astype(jnp.float32) * scale_ref[...] + shift_ref[...] + res_ref[...]
    o_ref[...] = jnp.maximum(y, 0.0)


# ----------------------------------------------------------------------------
# pallas_call wrappers
# ----------------------------------------------------------------------------
def _spatial_conv(x, w, *, tb, scale=None, shift=None):
    ND, H, W, Cin = x.shape
    Cout = w.shape[1]
    G = ND // tb
    mblk = tb * H * W
    apply_act = scale is not None

    in_specs = [pl.BlockSpec((tb, H, W, Cin), lambda i: (i, 0, 0, 0))]
    args = [x]
    if apply_act:
        in_specs += [pl.BlockSpec((1, 1, 1, Cin), lambda i: (0, 0, 0, 0)),
                     pl.BlockSpec((1, 1, 1, Cin), lambda i: (0, 0, 0, 0))]
        args += [scale.reshape(1, 1, 1, Cin), shift.reshape(1, 1, 1, Cin)]
    in_specs += [pl.BlockSpec((9 * Cin, Cout), lambda i: (0, 0))]
    args += [w]

    return pl.pallas_call(
        partial(_spatial_conv_kernel, apply_act=apply_act),
        out_shape=(jax.ShapeDtypeStruct((ND * H * W, Cout), jnp.bfloat16),
                   jax.ShapeDtypeStruct((G, 2, Cout), jnp.float32)),
        grid=(G,),
        in_specs=in_specs,
        out_specs=(pl.BlockSpec((mblk, Cout), lambda i: (i, 0)),
                   pl.BlockSpec((1, 2, Cout), lambda i: (i, 0, 0))),
        scratch_shapes=[pltpu.VMEM((tb, H + 2, W + 2, Cin), jnp.bfloat16),
                        pltpu.VMEM((mblk, 9 * Cin), jnp.bfloat16)],
        compiler_params=_cparams(("parallel",)),
    )(*args)


def _temporal_conv(x, w, scale, shift, *, thw):
    N, D, HW, Cin = x.shape
    Cout = w.shape[1]
    Gh = HW // thw
    return pl.pallas_call(
        _temporal_conv_kernel,
        out_shape=(jax.ShapeDtypeStruct((N, D, HW, Cout), jnp.bfloat16),
                   jax.ShapeDtypeStruct((N, Gh, 2, Cout), jnp.float32)),
        grid=(N, Gh),
        in_specs=[pl.BlockSpec((1, D, thw, Cin), lambda n, j: (n, 0, j, 0)),
                  pl.BlockSpec((1, 1, 1, Cin), lambda n, j: (0, 0, 0, 0)),
                  pl.BlockSpec((1, 1, 1, Cin), lambda n, j: (0, 0, 0, 0)),
                  pl.BlockSpec((3 * Cin, Cout), lambda n, j: (0, 0))],
        out_specs=(pl.BlockSpec((1, D, thw, Cout), lambda n, j: (n, 0, j, 0)),
                   pl.BlockSpec((1, 1, 2, Cout), lambda n, j: (n, j, 0, 0))),
        scratch_shapes=[pltpu.VMEM((D * thw, 3 * Cin), jnp.bfloat16)],
        compiler_params=_cparams(("parallel", "parallel")),
    )(x, scale.reshape(1, 1, 1, Cin), shift.reshape(1, 1, 1, Cin), w)


def _bn_add_relu(raw2d, res2d, scale_b, shift_b, *, tb):
    ND, HWC = raw2d.shape
    G = ND // tb
    return pl.pallas_call(
        _bn_add_relu_kernel,
        out_shape=jax.ShapeDtypeStruct((ND, HWC), jnp.float32),
        grid=(G,),
        in_specs=[pl.BlockSpec((tb, HWC), lambda i: (i, 0)),
                  pl.BlockSpec((tb, HWC), lambda i: (i, 0)),
                  pl.BlockSpec((1, HWC), lambda i: (0, 0)),
                  pl.BlockSpec((1, HWC), lambda i: (0, 0))],
        out_specs=pl.BlockSpec((tb, HWC), lambda i: (i, 0)),
        compiler_params=_cparams(("parallel",)),
    )(raw2d, res2d, scale_b, shift_b)


def _bn_affine(stats, count_per_tile, gamma, beta):
    """Combine per-tile (sum, centered-M2) into BN scale/shift (training stats).

    Parallel/Chan variance combination on shifted per-tile moments avoids the
    catastrophic cancellation of a global E[x^2] - E[x]^2; var clamped >= 0.
    """
    s = stats.reshape(-1, 2, stats.shape[-1]).astype(jnp.float32)
    n = jnp.float32(count_per_tile)
    total = jnp.float32(s.shape[0]) * n
    ssum = s[:, 0, :]
    m2 = s[:, 1, :]
    mean = jnp.sum(ssum, axis=0) / total
    mu_i = ssum / n
    var = (jnp.sum(m2, axis=0) + n * jnp.sum(jnp.square(mu_i - mean), axis=0)) / total
    var = jnp.maximum(var, 0.0)              # biased var, as PyTorch BN (training)
    scale = gamma * lax.rsqrt(var + EPS)
    shift = beta - mean * scale
    return scale, shift


# ----------------------------------------------------------------------------
# BasicBlock forward (Pallas)
# ----------------------------------------------------------------------------
@jax.jit
def basic_block_forward(x_ncdhw, params):
    # NCDHW -> NDHWC only at the block boundary (kept to preserve the PyTorch
    # interface; a full network should carry NDHWC end-to-end).
    x = jnp.transpose(x_ncdhw, (0, 2, 3, 4, 1)).astype(jnp.float32)
    N, D, H, W, C = x.shape
    ND, HW = N * D, H * W

    mid1 = params["w1s"].shape[-1]
    mid2 = params["w2s"].shape[-1]
    planes = params["w1t"].shape[-1]
    # TODO(synk): stride>1 / temporal_stride>1 / downsample path not implemented.
    assert planes == C, "residual add requires planes == in_planes (no downsample)"

    # Tiles: >= ~8 grid steps (both v7x TCs get several pipelined iterations)
    # while keeping >= ~128 output rows per MXU call.  Multiples of 16 keep the
    # bf16 blocks aligned to the native (16,128) tiling.
    tb = _pick_tile(ND, max(1, min(512 // max(HW, 1), ND // 8)))
    thw = _pick_tile(HW, min(512, max(16, (HW * N) // 8)), mult=16)
    tbf = _pick_tile(ND, max(16, 4096 // max(HW * planes, 1)), mult=16)
    # TODO(synk): add an H-row sub-tiling axis for very large H*W so the im2col
    # patch stays comfortably inside v7x's 64 MiB VMEM.

    # Fused im2col weight layout, bf16 operands for the MXU (f32 accumulation).
    w1s = params["w1s"].reshape(-1, mid1).astype(jnp.bfloat16)
    w1t = params["w1t"].reshape(-1, planes).astype(jnp.bfloat16)
    w2s = params["w2s"].reshape(-1, mid2).astype(jnp.bfloat16)
    w2t = params["w2t"].reshape(-1, planes).astype(jnp.bfloat16)

    # conv1_s (consumes the block input directly: no BN/ReLU preamble)
    raw, st = _spatial_conv(x.reshape(ND, H, W, C), w1s, tb=tb)
    sc, sh = _bn_affine(st, tb * HW, params["g1s"], params["b1s"])

    # bn1_s + relu + temporal zero-pad fused into conv1_t
    raw, st = _temporal_conv(raw.reshape(N, D, HW, mid1), w1t, sc, sh, thw=thw)
    sc, sh = _bn_affine(st, D * thw, params["g1t"], params["b1t"])

    # bn1_t + relu + spatial zero-pad fused into conv2_s
    raw, st = _spatial_conv(raw.reshape(ND, H, W, planes), w2s, tb=tb,
                            scale=sc, shift=sh)
    sc, sh = _bn_affine(st, tb * HW, params["g2s"], params["b2s"])

    # bn2_s + relu + temporal zero-pad fused into conv2_t
    raw, st = _temporal_conv(raw.reshape(N, D, HW, mid2), w2t, sc, sh, thw=thw)
    sc, sh = _bn_affine(st, D * thw, params["g2t"], params["b2t"])

    # bn2_t + residual add + relu on a lane-dense (ND, HW*planes) view.
    raw2d = raw.reshape(ND, HW * planes)
    res2d = x.reshape(ND, HW * C)
    sc_b = jnp.broadcast_to(sc[None, None, :], (1, HW, planes)).reshape(1, HW * planes)
    sh_b = jnp.broadcast_to(sh[None, None, :], (1, HW, planes)).reshape(1, HW * planes)
    out = _bn_add_relu(raw2d, res2d, sc_b, sh_b, tb=tbf)

    out = out.reshape(N, D, H, W, planes)
    return jnp.transpose(out, (0, 4, 1, 2, 3))     # back to NCDHW


# ----------------------------------------------------------------------------
# Pure-JAX reference (lax.conv, f32 HIGHEST) used only for the correctness check
# ----------------------------------------------------------------------------
def _bn_ref(y, gamma, beta, relu=True):
    mean = y.mean(axis=(0, 2, 3, 4), keepdims=True)
    var = jnp.square(y - mean).mean(axis=(0, 2, 3, 4), keepdims=True)
    out = (y - mean) * lax.rsqrt(var + EPS)
    out = out * gamma.reshape(1, -1, 1, 1, 1) + beta.reshape(1, -1, 1, 1, 1)
    return jnp.maximum(out, 0.0) if relu else out


def reference_forward(x, params):
    dn = ("NCDHW", "OIDHW", "NCDHW")
    hp = lax.Precision.HIGHEST

    def spatial_w(w):   # (3,3,Cin,Cout) -> (Cout,Cin,1,3,3)
        return jnp.transpose(w, (3, 2, 0, 1))[:, :, None]

    def temporal_w(w):  # (3,Cin,Cout) -> (Cout,Cin,3,1,1)
        return jnp.transpose(w, (2, 1, 0))[:, :, :, None, None]

    out = lax.conv_general_dilated(x, spatial_w(params["w1s"]), (1, 1, 1),
                                   ((0, 0), (1, 1), (1, 1)), dimension_numbers=dn, precision=hp)
    out = _bn_ref(out, params["g1s"], params["b1s"])
    out = lax.conv_general_dilated(out, temporal_w(params["w1t"]), (1, 1, 1),
                                   ((1, 1), (0, 0), (0, 0)), dimension_numbers=dn, precision=hp)
    out = _bn_ref(out, params["g1t"], params["b1t"])
    out = lax.conv_general_dilated(out, spatial_w(params["w2s"]), (1, 1, 1),
                                   ((0, 0), (1, 1), (1, 1)), dimension_numbers=dn, precision=hp)
    out = _bn_ref(out, params["g2s"], params["b2s"])
    out = lax.conv_general_dilated(out, temporal_w(params["w2t"]), (1, 1, 1),
                                   ((1, 1), (0, 0), (0, 0)), dimension_numbers=dn, precision=hp)
    out = _bn_ref(out, params["g2t"], params["b2t"], relu=False)
    return jnp.maximum(out + x, 0.0)


# ----------------------------------------------------------------------------
# Parameter construction (mirrors BasicBlock.__init__ shapes, BN defaults)
# ----------------------------------------------------------------------------
def make_params(key, in_planes, planes):
    mid1 = (in_planes * planes * 27) // (in_planes * 9 + 3 * planes)
    mid2 = (planes * planes * 27) // (planes * 9 + 3 * planes)
    k1, k2, k3, k4 = jax.random.split(key, 4)
    return {
        "w1s": jax.random.normal(k1, (3, 3, in_planes, mid1), jnp.float32) * 0.1,
        "w1t": jax.random.normal(k2, (3, mid1, planes), jnp.float32) * 0.1,
        "w2s": jax.random.normal(k3, (3, 3, planes, mid2), jnp.float32) * 0.1,
        "w2t": jax.random.normal(k4, (3, mid2, planes), jnp.float32) * 0.1,
        "g1s": jnp.ones((mid1,), jnp.float32), "b1s": jnp.zeros((mid1,), jnp.float32),
        "g1t": jnp.ones((planes,), jnp.float32), "b1t": jnp.zeros((planes,), jnp.float32),
        "g2s": jnp.ones((mid2,), jnp.float32), "b2s": jnp.zeros((mid2,), jnp.float32),
        "g2t": jnp.ones((planes,), jnp.float32), "b2t": jnp.zeros((planes,), jnp.float32),
    }


if __name__ == "__main__":
    key = jax.random.PRNGKey(0)
    kx, kp = jax.random.split(key)

    N, C, D, H, W = 2, 4, 8, 8, 8            # NCDHW, in_planes = planes = 4
    in_planes, planes = C, 4

    x = jax.random.normal(kx, (N, C, D, H, W), jnp.float32)
    params = make_params(kp, in_planes, planes)

    out = jax.block_until_ready(basic_block_forward(x, params))
    assert out.shape == (N, planes, D, H, W)

    ref = jax.block_until_ready(jax.jit(reference_forward)(x, params))
    # Pallas path uses bf16 MXU operands and bf16 intermediate activations
    # (f32 accumulation/stats); compare with a bf16-aware tolerance against
    # the f32-HIGHEST reference.
    max_err = float(jnp.max(jnp.abs(out - ref)))
    rel_l2 = float(jnp.linalg.norm(out - ref) / (jnp.linalg.norm(ref) + 1e-12))
    assert rel_l2 < 2e-2 and max_err < 2e-1, (rel_l2, max_err)

    print("KERNEL_OK")
</pallas_src>

<mosaic_0001>
module attributes {stable_mosaic.version = 11 : i64} {
  func.func @_spatial_conv_kernel(%arg0: i32, %arg1: memref<2x8x8x4xf32, #tpu.memory_space<vmem>>, %arg2: memref<36x9xbf16, #tpu.memory_space<vmem>>, %arg3: memref<128x9xbf16, #tpu.memory_space<vmem>>, %arg4: memref<1x2x9xf32, #tpu.memory_space<vmem>>, %arg5: memref<2x10x10x4xbf16, #tpu.memory_space<vmem>>, %arg6: memref<128x36xbf16, #tpu.memory_space<vmem>>) attributes {dimension_semantics = [#tpu.dimension_semantics<parallel>], iteration_bounds = array<i64: 8>, scalar_prefetch = 0 : i64, scratch_operands = 2 : i64, tpu.core_type = #tpu.core_type<tc>, window_params = [{transform_indices = @transform_0, window_bounds = array<i64: 2, 8, 8, 4>}, {pipeline_mode = #tpu.pipeline_mode<synchronous>, transform_indices = @transform_1, window_bounds = array<i64: 36, 9>}, {transform_indices = @transform_2, window_bounds = array<i64: 128, 9>}, {transform_indices = @transform_3, window_bounds = array<i64: 1, 2, 9>}]} {
    %c0 = arith.constant 0 : index
    %c0_0 = arith.constant 0 : index
    %c0_1 = arith.constant 0 : index
    %c0_2 = arith.constant 0 : index
    %0 = vector.load %arg1[%c0, %c0_0, %c0_1, %c0_2] : memref<2x8x8x4xf32, #tpu.memory_space<vmem>>, vector<2x8x8x4xf32>
    %1 = arith.truncf %0 : vector<2x8x8x4xf32> to vector<2x8x8x4xbf16>
    %cst = arith.constant 0.000000e+00 : bf16
    %2 = vector.broadcast %cst : bf16 to vector<2x1x10x4xbf16>
    %cst_3 = arith.constant 0.000000e+00 : bf16
    %3 = vector.broadcast %cst_3 : bf16 to vector<2x8x1x4xbf16>
    %c0_4 = arith.constant 0 : index
    %c0_5 = arith.constant 0 : index
    %c0_6 = arith.constant 0 : index
    %c0_7 = arith.constant 0 : index
    %4 = vector.load %arg5[%c0_4, %c0_5, %c0_6, %c0_7] : memref<2x10x10x4xbf16, #tpu.memory_space<vmem>>, vector<2x1x10x4xbf16>
    tpu.vector_store %arg5[%c0_4, %c0_5, %c0_6, %c0_7], %2 {strides = array<i32>} : memref<2x10x10x4xbf16, #tpu.memory_space<vmem>>, vector<2x1x10x4xbf16>,
    %c0_8 = arith.constant 0 : index
    %c9 = arith.constant 9 : index
    %c0_9 = arith.constant 0 : index
    %c0_10 = arith.constant 0 : index
    %5 = vector.load %arg5[%c0_8, %c9, %c0_9, %c0_10] : memref<2x10x10x4xbf16, #tpu.memory_space<vmem>>, vector<2x1x10x4xbf16>
    tpu.vector_store %arg5[%c0_8, %c9, %c0_9, %c0_10], %2 {strides = array<i32>} : memref<2x10x10x4xbf16, #tpu.memory_space<vmem>>, vector<2x1x10x4xbf16>,
    %c0_11 = arith.constant 0 : index
    %c1 = arith.constant 1 : index
    %c0_12 = arith.constant 0 : index
    %c0_13 = arith.constant 0 : index
    %6 = vector.load %arg5[%c0_11, %c1, %c0_12, %c0_13] : memref<2x10x10x4xbf16, #tpu.memory_space<vmem>>, vector<2x8x1x4xbf16>
    tpu.vector_store %arg5[%c0_11, %c1, %c0_12, %c0_13], %3 {strides = array<i32>} : memref<2x10x10x4xbf16, #tpu.memory_space<vmem>>, vector<2x8x1x4xbf16>,
    %c0_14 = arith.constant 0 : index
    %c1_15 = arith.constant 1 : index
    %c9_16 = arith.constant 9 : index
    %c0_17 = arith.constant 0 : index
    %7 = vector.load %arg5[%c0_14, %c1_15, %c9_16, %c0_17] : memref<2x10x10x4xbf16, #tpu.memory_space<vmem>>, vector<2x8x1x4xbf16>
    tpu.vector_store %arg5[%c0_14, %c1_15, %c9_16, %c0_17], %3 {strides = array<i32>} : memref<2x10x10x4xbf16, #tpu.memory_space<vmem>>, vector<2x8x1x4xbf16>,
    %c0_18 = arith.constant 0 : index
    %c1_19 = arith.constant 1 : index
    %c1_20 = arith.constant 1 : index
    %c0_21 = arith.constant 0 : index
    %8 = vector.load %arg5[%c0_18, %c1_19, %c1_20, %c0_21] : memref<2x10x10x4xbf16, #tpu.memory_space<vmem>>, vector<2x8x8x4xbf16>
    tpu.vector_store %arg5[%c0_18, %c1_19, %c1_20, %c0_21], %1 {strides = array<i32>} : memref<2x10x10x4xbf16, #tpu.memory_space<vmem>>, vector<2x8x8x4xbf16>,
    %c0_22 = arith.constant 0 : index
    %c0_23 = arith.constant 0 : index
    %c0_24 = arith.constant 0 : index
    %c0_25 = arith.constant 0 : index
    %9 = vector.load %arg5[%c0_22, %c0_23, %c0_24, %c0_25] : memref<2x10x10x4xbf16, #tpu.memory_space<vmem>>, vector<2x10x10x4xbf16>
    %10 = vector.extract_strided_slice %9 {offsets = [0, 0, 0, 0], sizes = [2, 8, 8, 4], strides = [1, 1, 1, 1]} : vector<2x10x10x4xbf16> to vector<2x8x8x4xbf16>
    %11 = vector.shape_cast %10 : vector<2x8x8x4xbf16> to vector<128x4xbf16>
    %c0_26 = arith.constant 0 : index
    %c0_27 = arith.constant 0 : index
    %12 = vector.load %arg6[%c0_26, %c0_27] : memref<128x36xbf16, #tpu.memory_space<vmem>>, vector<128x4xbf16>
    tpu.vector_store %arg6[%c0_26, %c0_27], %11 {strides = array<i32>} : memref<128x36xbf16, #tpu.memory_space<vmem>>, vector<128x4xbf16>,
    %13 = vector.extract_strided_slice %9 {offsets = [0, 0, 1, 0], sizes = [2, 8, 8, 4], strides = [1, 1, 1, 1]} : vector<2x10x10x4xbf16> to vector<2x8x8x4xbf16>
    %14 = vector.shape_cast %13 : vector<2x8x8x4xbf16> to vector<128x4xbf16>
    %c0_28 = arith.constant 0 : index
    %c4 = arith.constant 4 : index
    %15 = vector.load %arg6[%c0_28, %c4] : memref<128x36xbf16, #tpu.memory_space<vmem>>, vector<128x4xbf16>
    tpu.vector_store %arg6[%c0_28, %c4], %14 {strides = array<i32>} : memref<128x36xbf16, #tpu.memory_space<vmem>>, vector<128x4xbf16>,
    %16 = vector.extract_strided_slice %9 {offsets = [0, 0, 2, 0], sizes = [2, 8, 8, 4], strides = [1, 1, 1, 1]} : vector<2x10x10x4xbf16> to vector<2x8x8x4xbf16>
    %17 = vector.shape_cast %16 : vector<2x8x8x4xbf16> to vector<128x4xbf16>
    %c0_29 = arith.constant 0 : index
    %c8 = arith.constant 8 : index
    %18 = vector.load %arg6[%c0_29, %c8] : memref<128x36xbf16, #tpu.memory_space<vmem>>, vector<128x4xbf16>
    tpu.vector_store %arg6[%c0_29, %c8], %17 {strides = array<i32>} : memref<128x36xbf16, #tpu.memory_space<vmem>>, vector<128x4xbf16>,
    %19 = vector.extract_strided_slice %9 {offsets = [0, 1, 0, 0], sizes = [2, 8, 8, 4], strides = [1, 1, 1, 1]} : vector<2x10x10x4xbf16> to vector<2x8x8x4xbf16>
    %20 = vector.shape_cast %19 : vector<2x8x8x4xbf16> to vector<128x4xbf16>
    %c0_30 = arith.constant 0 : index
    %c12 = arith.constant 12 : index
    %21 = vector.load %arg6[%c0_30, %c12] : memref<128x36xbf16, #tpu.memory_space<vmem>>, vector<128x4xbf16>
    tpu.vector_store %arg6[%c0_30, %c12], %20 {strides = array<i32>} : memref<128x36xbf16, #tpu.memory_space<vmem>>, vector<128x4xbf16>,
    %22 = vector.extract_strided_slice %9 {offsets = [0, 1, 1, 0], sizes = [2, 8, 8, 4], strides = [1, 1, 1, 1]} : vector<2x10x10x4xbf16> to vector<2x8x8x4xbf16>
    %23 = vector.shape_cast %22 : vector<2x8x8x4xbf16> to vector<128x4xbf16>
    %c0_31 = arith.constant 0 : index
    %c16 = arith.constant 16 : index
    %24 = vector.load %arg6[%c0_31, %c16] : memref<128x36xbf16, #tpu.memory_space<vmem>>, vector<128x4xbf16>
    tpu.vector_store %arg6[%c0_31, %c16], %23 {strides = array<i32>} : memref<128x36xbf16, #tpu.memory_space<vmem>>, vector<128x4xbf16>,
    %25 = vector.extract_strided_slice %9 {offsets = [0, 1, 2, 0], sizes = [2, 8, 8, 4], strides = [1, 1, 1, 1]} : vector<2x10x10x4xbf16> to vector<2x8x8x4xbf16>
    %26 = vector.shape_cast %25 : vector<2x8x8x4xbf16> to vector<128x4xbf16>
    %c0_32 = arith.constant 0 : index
    %c20 = arith.constant 20 : index
    %27 = vector.load %arg6[%c0_32, %c20] : memref<128x36xbf16, #tpu.memory_space<vmem>>, vector<128x4xbf16>
    tpu.vector_store %arg6[%c0_32, %c20], %26 {strides = array<i32>} : memref<128x36xbf16, #tpu.memory_space<vmem>>, vector<128x4xbf16>,
    %28 = vector.extract_strided_slice %9 {offsets = [0, 2, 0, 0], sizes = [2, 8, 8, 4], strides = [1, 1, 1, 1]} : vector<2x10x10x4xbf16> to vector<2x8x8x4xbf16>
    %29 = vector.shape_cast %28 : vector<2x8x8x4xbf16> to vector<128x4xbf16>
    %c0_33 = arith.constant 0 : index
    %c24 = arith.constant 24 : index
    %30 = vector.load %arg6[%c0_33, %c24] : memref<128x36xbf16, #tpu.memory_space<vmem>>, vector<128x4xbf16>
    tpu.vector_store %arg6[%c0_33, %c24], %29 {strides = array<i32>} : memref<128x36xbf16, #tpu.memory_space<vmem>>, vector<128x4xbf16>,
    %31 = vector.extract_strided_slice %9 {offsets = [0, 2, 1, 0], sizes = [2, 8, 8, 4], strides = [1, 1, 1, 1]} : vector<2x10x10x4xbf16> to vector<2x8x8x4xbf16>
    %32 = vector.shape_cast %31 : vector<2x8x8x4xbf16> to vector<128x4xbf16>
    %c0_34 = arith.constant 0 : index
    %c28 = arith.constant 28 : index
    %33 = vector.load %arg6[%c0_34, %c28] : memref<128x36xbf16, #tpu.memory_space<vmem>>, vector<128x4xbf16>
    tpu.vector_store %arg6[%c0_34, %c28], %32 {strides = array<i32>} : memref<128x36xbf16, #tpu.memory_space<vmem>>, vector<128x4xbf16>,
    %34 = vector.extract_strided_slice %9 {offsets = [0, 2, 2, 0], sizes = [2, 8, 8, 4], strides = [1, 1, 1, 1]} : vector<2x10x10x4xbf16> to vector<2x8x8x4xbf16>
    %35 = vector.shape_cast %34 : vector<2x8x8x4xbf16> to vector<128x4xbf16>
    %c0_35 = arith.constant 0 : index
    %c32 = arith.constant 32 : index
    %36 = vector.load %arg6[%c0_35, %c32] : memref<128x36xbf16, #tpu.memory_space<vmem>>, vector<128x4xbf16>
    tpu.vector_store %arg6[%c0_35, %c32], %35 {strides = array<i32>} : memref<128x36xbf16, #tpu.memory_space<vmem>>, vector<128x4xbf16>,
    %c0_36 = arith.constant 0 : index
    %c0_37 = arith.constant 0 : index
    %37 = vector.load %arg6[%c0_36, %c0_37] : memref<128x36xbf16, #tpu.memory_space<vmem>>, vector<128x36xbf16>
    %c0_38 = arith.constant 0 : index
    %c0_39 = arith.constant 0 : index
    %38 = vector.load %arg2[%c0_38, %c0_39] : memref<36x9xbf16, #tpu.memory_space<vmem>>, vector<36x9xbf16>
    %cst_40 = arith.constant dense<0.000000e+00> : vector<128x9xf32>
    %39 = tpu.matmul %37, %38, %cst_40 {dimension_numbers = #tpu.dot_dimension_numbers<[1], [0], [0], [1], [0, 0, 1, 1], [], []>} : vector<128x36xbf16>, vector<36x9xbf16>, vector<128x9xf32> -> vector<128x9xf32>
    %40 = arith.truncf %39 : vector<128x9xf32> to vector<128x9xbf16>
    %c0_41 = arith.constant 0 : index
    %c0_42 = arith.constant 0 : index
    %41 = vector.load %arg3[%c0_41, %c0_42] : memref<128x9xbf16, #tpu.memory_space<vmem>>, vector<128x9xbf16>
    tpu.vector_store %arg3[%c0_41, %c0_42], %40 {strides = array<i32>} : memref<128x9xbf16, #tpu.memory_space<vmem>>, vector<128x9xbf16>,
    %cst_43 = arith.constant dense<0.000000e+00> : vector<9xf32>
    %42 = vector.multi_reduction <add>, %39, %cst_43 [0] : vector<128x9xf32> to vector<9xf32>
    %43 = vector.shape_cast %42 : vector<9xf32> to vector<1x9xf32>
    %cst_44 = arith.constant 1.280000e+02 : f32
    %44 = vector.broadcast %cst_44 : f32 to vector<1x9xf32>
    %45 = arith.divf %43, %44 : vector<1x9xf32>
    %cst_45 = arith.constant dense<0.000000e+00> : vector<9xf32>
    %46 = vector.multi_reduction <add>, %39, %cst_45 [0] : vector<128x9xf32> to vector<9xf32>
    %47 = vector.shape_cast %46 : vector<9xf32> to vector<1x9xf32>
    %48 = vector.broadcast %45 : vector<1x9xf32> to vector<128x9xf32>
    %49 = arith.subf %39, %48 : vector<128x9xf32>
    %50 = arith.mulf %49, %49 : vector<128x9xf32>
    %cst_46 = arith.constant dense<0.000000e+00> : vector<9xf32>
    %51 = vector.multi_reduction <add>, %50, %cst_46 [0] : vector<128x9xf32> to vector<9xf32>
    %52 = vector.shape_cast %51 : vector<9xf32> to vector<1x9xf32>
    %53 = tpu.concatenate %47, %52 in 0 : vector<1x9xf32>, vector<1x9xf32> -> vector<2x9xf32>
    %54 = vector.shape_cast %53 : vector<2x9xf32> to vector<1x2x9xf32>
    %c0_47 = arith.constant 0 : index
    %c0_48 = arith.constant 0 : index
    %c0_49 = arith.constant 0 : index
    %55 = vector.load %arg4[%c0_47, %c0_48, %c0_49] : memref<1x2x9xf32, #tpu.memory_space<vmem>>, vector<1x2x9xf32>
    tpu.vector_store %arg4[%c0_47, %c0_48, %c0_49], %54 {strides = array<i32>} : memref<1x2x9xf32, #tpu.memory_space<vmem>>, vector<1x2x9xf32>,
    return
  }
  func.func @transform_0(%arg0: i32) -> (i32, i32, i32, i32) {
    %c0_i32 = arith.constant 0 : i32
    %c0_i32_0 = arith.constant 0 : i32
    %c0_i32_1 = arith.constant 0 : i32
    %c0_i32_2 = arith.constant 0 : i32
    return %arg0, %c0_i32, %c0_i32_0, %c0_i32_1 : i32, i32, i32, i32
  }
  func.func @transform_1(%arg0: i32) -> (i32, i32) {
    %c0_i32 = arith.constant 0 : i32
    %c0_i32_0 = arith.constant 0 : i32
    %c0_i32_1 = arith.constant 0 : i32
    return %c0_i32, %c0_i32_0 : i32, i32
  }
  func.func @transform_2(%arg0: i32) -> (i32, i32) {
    %c0_i32 = arith.constant 0 : i32
    %c0_i32_0 = arith.constant 0 : i32
    return %arg0, %c0_i32 : i32, i32
  }
  func.func @transform_3(%arg0: i32) -> (i32, i32, i32) {
    %c0_i32 = arith.constant 0 : i32
    %c0_i32_0 = arith.constant 0 : i32
    %c0_i32_1 = arith.constant 0 : i32
    return %arg0, %c0_i32, %c0_i32_0 : i32, i32, i32
  }
}

module attributes {stable_mosaic.version = 11 : i64} {
  func.func @_temporal_conv_kernel(%arg0: i32, %arg1: i32, %arg2: memref<1x8x16x9xbf16, #tpu.memory_space<vmem>>, %arg3: memref<1x1x1x9xf32, #tpu.memory_space<vmem>>, %arg4: memref<1x1x1x9xf32, #tpu.memory_space<vmem>>, %arg5: memref<27x4xbf16, #tpu.memory_space<vmem>>, %arg6: memref<1x8x16x4xbf16, #tpu.memory_space<vmem>>, %arg7: memref<1x1x2x4xf32, #tpu.memory_space<vmem>>, %arg8: memref<128x27xbf16, #tpu.memory_space<vmem>>) attributes {dimension_semantics = [#tpu.dimension_semantics<parallel>, #tpu.dimension_semantics<parallel>], iteration_bounds = array<i64: 2, 4>, scalar_prefetch = 0 : i64, scratch_operands = 1 : i64, tpu.core_type = #tpu.core_type<tc>, window_params = [{transform_indices = @transform_0, window_bounds = array<i64: 1, 8, 16, 9>}, {pipeline_mode = #tpu.pipeline_mode<synchronous>, transform_indices = @transform_1, window_bounds = array<i64: 1, 1, 1, 9>}, {pipeline_mode = #tpu.pipeline_mode<synchronous>, transform_indices = @transform_2, window_bounds = array<i64: 1, 1, 1, 9>}, {pipeline_mode = #tpu.pipeline_mode<synchronous>, transform_indices = @transform_3, window_bounds = array<i64: 27, 4>}, {transform_indices = @transform_4, window_bounds = array<i64: 1, 8, 16, 4>}, {transform_indices = @transform_5, window_bounds = array<i64: 1, 1, 2, 4>}]} {
    %c0 = arith.constant 0 : index
    %c0_0 = arith.constant 0 : index
    %c0_1 = arith.constant 0 : index
    %c0_2 = arith.constant 0 : index
    %0 = vector.load %arg2[%c0, %c0_0, %c0_1, %c0_2] : memref<1x8x16x9xbf16, #tpu.memory_space<vmem>>, vector<1x8x16x9xbf16>
    %1 = arith.extf %0 : vector<1x8x16x9xbf16> to vector<1x8x16x9xf32>
    %c0_3 = arith.constant 0 : index
    %c0_4 = arith.constant 0 : index
    %c0_5 = arith.constant 0 : index
    %c0_6 = arith.constant 0 : index
    %2 = vector.load %arg3[%c0_3, %c0_4, %c0_5, %c0_6] : memref<1x1x1x9xf32, #tpu.memory_space<vmem>>, vector<1x1x1x9xf32>
    %3 = vector.broadcast %2 : vector<1x1x1x9xf32> to vector<1x8x16x9xf32>
    %4 = arith.mulf %1, %3 : vector<1x8x16x9xf32>
    %c0_7 = arith.constant 0 : index
    %c0_8 = arith.constant 0 : index
    %c0_9 = arith.constant 0 : index
    %c0_10 = arith.constant 0 : index
    %5 = vector.load %arg4[%c0_7, %c0_8, %c0_9, %c0_10] : memref<1x1x1x9xf32, #tpu.memory_space<vmem>>, vector<1x1x1x9xf32>
    %6 = vector.broadcast %5 : vector<1x1x1x9xf32> to vector<1x8x16x9xf32>
    %7 = arith.addf %4, %6 : vector<1x8x16x9xf32>
    %cst = arith.constant 0.000000e+00 : f32
    %8 = vector.broadcast %cst : f32 to vector<1x8x16x9xf32>
    %9 = arith.maximumf %7, %8 : vector<1x8x16x9xf32>
    %10 = arith.truncf %9 : vector<1x8x16x9xf32> to vector<1x8x16x9xbf16>
    %11 = vector.shape_cast %10 : vector<1x8x16x9xbf16> to vector<128x9xbf16>
    %cst_11 = arith.constant 0.000000e+00 : bf16
    %12 = vector.broadcast %cst_11 : bf16 to vector<16x9xbf16>
    %c0_12 = arith.constant 0 : index
    %c0_13 = arith.constant 0 : index
    %13 = vector.load %arg8[%c0_12, %c0_13] : memref<128x27xbf16, #tpu.memory_space<vmem>>, vector<16x9xbf16>
    tpu.vector_store %arg8[%c0_12, %c0_13], %12 {strides = array<i32>} : memref<128x27xbf16, #tpu.memory_space<vmem>>, vector<16x9xbf16>,
    %14 = vector.extract_strided_slice %11 {offsets = [0, 0], sizes = [112, 9], strides = [1, 1]} : vector<128x9xbf16> to vector<112x9xbf16>
    %c16 = arith.constant 16 : index
    %c0_14 = arith.constant 0 : index
    %15 = vector.load %arg8[%c16, %c0_14] : memref<128x27xbf16, #tpu.memory_space<vmem>>, vector<112x9xbf16>
    tpu.vector_store %arg8[%c16, %c0_14], %14 {strides = array<i32>} : memref<128x27xbf16, #tpu.memory_space<vmem>>, vector<112x9xbf16>,
    %c0_15 = arith.constant 0 : index
    %c9 = arith.constant 9 : index
    %16 = vector.load %arg8[%c0_15, %c9] : memref<128x27xbf16, #tpu.memory_space<vmem>>, vector<128x9xbf16>
    tpu.vector_store %arg8[%c0_15, %c9], %11 {strides = array<i32>} : memref<128x27xbf16, #tpu.memory_space<vmem>>, vector<128x9xbf16>,
    %17 = vector.extract_strided_slice %11 {offsets = [16, 0], sizes = [112, 9], strides = [1, 1]} : vector<128x9xbf16> to vector<112x9xbf16>
    %c0_16 = arith.constant 0 : index
    %c18 = arith.constant 18 : index
    %18 = vector.load %arg8[%c0_16, %c18] : memref<128x27xbf16, #tpu.memory_space<vmem>>, vector<112x9xbf16>
    tpu.vector_store %arg8[%c0_16, %c18], %17 {strides = array<i32>} : memref<128x27xbf16, #tpu.memory_space<vmem>>, vector<112x9xbf16>,
    %c112 = arith.constant 112 : index
    %c18_17 = arith.constant 18 : index
    %19 = vector.load %arg8[%c112, %c18_17] : memref<128x27xbf16, #tpu.memory_space<vmem>>, vector<16x9xbf16>
    tpu.vector_store %arg8[%c112, %c18_17], %12 {strides = array<i32>} : memref<128x27xbf16, #tpu.memory_space<vmem>>, vector<16x9xbf16>,
    %c0_18 = arith.constant 0 : index
    %c0_19 = arith.constant 0 : index
    %20 = vector.load %arg8[%c0_18, %c0_19] : memref<128x27xbf16, #tpu.memory_space<vmem>>, vector<128x27xbf16>
    %c0_20 = arith.constant 0 : index
    %c0_21 = arith.constant 0 : index
    %21 = vector.load %arg5[%c0_20, %c0_21] : memref<27x4xbf16, #tpu.memory_space<vmem>>, vector<27x4xbf16>
    %cst_22 = arith.constant dense<0.000000e+00> : vector<128x4xf32>
    %22 = tpu.matmul %20, %21, %cst_22 {dimension_numbers = #tpu.dot_dimension_numbers<[1], [0], [0], [1], [0, 0, 1, 1], [], []>} : vector<128x27xbf16>, vector<27x4xbf16>, vector<128x4xf32> -> vector<128x4xf32>
    %23 = vector.shape_cast %22 : vector<128x4xf32> to vector<1x8x16x4xf32>
    %24 = arith.truncf %23 : vector<1x8x16x4xf32> to vector<1x8x16x4xbf16>
    %c0_23 = arith.constant 0 : index
    %c0_24 = arith.constant 0 : index
    %c0_25 = arith.constant 0 : index
    %c0_26 = arith.constant 0 : index
    %25 = vector.load %arg6[%c0_23, %c0_24, %c0_25, %c0_26] : memref<1x8x16x4xbf16, #tpu.memory_space<vmem>>, vector<1x8x16x4xbf16>
    tpu.vector_store %arg6[%c0_23, %c0_24, %c0_25, %c0_26], %24 {strides = array<i32>} : memref<1x8x16x4xbf16, #tpu.memory_space<vmem>>, vector<1x8x16x4xbf16>,
    %cst_27 = arith.constant dense<0.000000e+00> : vector<4xf32>
    %26 = vector.multi_reduction <add>, %22, %cst_27 [0] : vector<128x4xf32> to vector<4xf32>
    %27 = vector.shape_cast %26 : vector<4xf32> to vector<1x4xf32>
    %cst_28 = arith.constant 1.280000e+02 : f32
    %28 = vector.broadcast %cst_28 : f32 to vector<1x4xf32>
    %29 = arith.divf %27, %28 : vector<1x4xf32>
    %cst_29 = arith.constant dense<0.000000e+00> : vector<4xf32>
    %30 = vector.multi_reduction <add>, %22, %cst_29 [0] : vector<128x4xf32> to vector<4xf32>
    %31 = vector.shape_cast %30 : vector<4xf32> to vector<1x4xf32>
    %32 = vector.broadcast %29 : vector<1x4xf32> to vector<128x4xf32>
    %33 = arith.subf %22, %32 : vector<128x4xf32>
    %34 = arith.mulf %33, %33 : vector<128x4xf32>
    %cst_30 = arith.constant dense<0.000000e+00> : vector<4xf32>
    %35 = vector.multi_reduction <add>, %34, %cst_30 [0] : vector<128x4xf32> to vector<4xf32>
    %36 = vector.shape_cast %35 : vector<4xf32> to vector<1x4xf32>
    %37 = tpu.concatenate %31, %36 in 0 : vector<1x4xf32>, vector<1x4xf32> -> vector<2x4xf32>
    %38 = vector.shape_cast %37 : vector<2x4xf32> to vector<1x1x2x4xf32>
    %c0_31 = arith.constant 0 : index
    %c0_32 = arith.constant 0 : index
    %c0_33 = arith.constant 0 : index
    %c0_34 = arith.constant 0 : index
    %39 = vector.load %arg7[%c0_31, %c0_32, %c0_33, %c0_34] : memref<1x1x2x4xf32, #tpu.memory_space<vmem>>, vector<1x1x2x4xf32>
    tpu.vector_store %arg7[%c0_31, %c0_32, %c0_33, %c0_34], %38 {strides = array<i32>} : memref<1x1x2x4xf32, #tpu.memory_space<vmem>>, vector<1x1x2x4xf32>,
    return
  }
  func.func @transform_0(%arg0: i32, %arg1: i32) -> (i32, i32, i32, i32) {
    %c0_i32 = arith.constant 0 : i32
    %c0_i32_0 = arith.constant 0 : i32
    %c0_i32_1 = arith.constant 0 : i32
    return %arg0, %c0_i32, %arg1, %c0_i32_0 : i32, i32, i32, i32
  }
  func.func @transform_1(%arg0: i32, %arg1: i32) -> (i32, i32, i32, i32) {
    %c0_i32 = arith.constant 0 : i32
    %c0_i32_0 = arith.constant 0 : i32
    %c0_i32_1 = arith.constant 0 : i32
    %c0_i32_2 = arith.constant 0 : i32
    %c0_i32_3 = arith.constant 0 : i32
    return %c0_i32, %c0_i32_0, %c0_i32_1, %c0_i32_2 : i32, i32, i32, i32
  }
  func.func @transform_2(%arg0: i32, %arg1: i32) -> (i32, i32, i32, i32) {
    %c0_i32 = arith.constant 0 : i32
    %c0_i32_0 = arith.constant 0 : i32
    %c0_i32_1 = arith.constant 0 : i32
    %c0_i32_2 = arith.constant 0 : i32
    %c0_i32_3 = arith.constant 0 : i32
    return %c0_i32, %c0_i32_0, %c0_i32_1, %c0_i32_2 : i32, i32, i32, i32
  }
  func.func @transform_3(%arg0: i32, %arg1: i32) -> (i32, i32) {
    %c0_i32 = arith.constant 0 : i32
    %c0_i32_0 = arith.constant 0 : i32
    %c0_i32_1 = arith.constant 0 : i32
    return %c0_i32, %c0_i32_0 : i32, i32
  }
  func.func @transform_4(%arg0: i32, %arg1: i32) -> (i32, i32, i32, i32) {
    %c0_i32 = arith.constant 0 : i32
    %c0_i32_0 = arith.constant 0 : i32
    %c0_i32_1 = arith.constant 0 : i32
    return %arg0, %c0_i32, %arg1, %c0_i32_0 : i32, i32, i32, i32
  }
  func.func @transform_5(%arg0: i32, %arg1: i32) -> (i32, i32, i32, i32) {
    %c0_i32 = arith.constant 0 : i32
    %c0_i32_0 = arith.constant 0 : i32
    %c0_i32_1 = arith.constant 0 : i32
    return %arg0, %arg1, %c0_i32, %c0_i32_0 : i32, i32, i32, i32
  }
}

module attributes {stable_mosaic.version = 11 : i64} {
  func.func @_spatial_conv_kernel(%arg0: i32, %arg1: memref<2x8x8x4xbf16, #tpu.memory_space<vmem>>, %arg2: memref<1x1x1x4xf32, #tpu.memory_space<vmem>>, %arg3: memref<1x1x1x4xf32, #tpu.memory_space<vmem>>, %arg4: memref<36x9xbf16, #tpu.memory_space<vmem>>, %arg5: memref<128x9xbf16, #tpu.memory_space<vmem>>, %arg6: memref<1x2x9xf32, #tpu.memory_space<vmem>>, %arg7: memref<2x10x10x4xbf16, #tpu.memory_space<vmem>>, %arg8: memref<128x36xbf16, #tpu.memory_space<vmem>>) attributes {dimension_semantics = [#tpu.dimension_semantics<parallel>], iteration_bounds = array<i64: 8>, scalar_prefetch = 0 : i64, scratch_operands = 2 : i64, tpu.core_type = #tpu.core_type<tc>, window_params = [{transform_indices = @transform_0, window_bounds = array<i64: 2, 8, 8, 4>}, {pipeline_mode = #tpu.pipeline_mode<synchronous>, transform_indices = @transform_1, window_bounds = array<i64: 1, 1, 1, 4>}, {pipeline_mode = #tpu.pipeline_mode<synchronous>, transform_indices = @transform_2, window_bounds = array<i64: 1, 1, 1, 4>}, {pipeline_mode = #tpu.pipeline_mode<synchronous>, transform_indices = @transform_3, window_bounds = array<i64: 36, 9>}, {transform_indices = @transform_4, window_bounds = array<i64: 128, 9>}, {transform_indices = @transform_5, window_bounds = array<i64: 1, 2, 9>}]} {
    %c0 = arith.constant 0 : index
    %c0_0 = arith.constant 0 : index
    %c0_1 = arith.constant 0 : index
    %c0_2 = arith.constant 0 : index
    %0 = vector.load %arg1[%c0, %c0_0, %c0_1, %c0_2] : memref<2x8x8x4xbf16, #tpu.memory_space<vmem>>, vector<2x8x8x4xbf16>
    %1 = arith.extf %0 : vector<2x8x8x4xbf16> to vector<2x8x8x4xf32>
    %c0_3 = arith.constant 0 : index
    %c0_4 = arith.constant 0 : index
    %c0_5 = arith.constant 0 : index
    %c0_6 = arith.constant 0 : index
    %2 = vector.load %arg2[%c0_3, %c0_4, %c0_5, %c0_6] : memref<1x1x1x4xf32, #tpu.memory_space<vmem>>, vector<1x1x1x4xf32>
    %3 = vector.broadcast %2 : vector<1x1x1x4xf32> to vector<2x8x8x4xf32>
    %4 = arith.mulf %1, %3 : vector<2x8x8x4xf32>
    %c0_7 = arith.constant 0 : index
    %c0_8 = arith.constant 0 : index
    %c0_9 = arith.constant 0 : index
    %c0_10 = arith.constant 0 : index
    %5 = vector.load %arg3[%c0_7, %c0_8, %c0_9, %c0_10] : memref<1x1x1x4xf32, #tpu.memory_space<vmem>>, vector<1x1x1x4xf32>
    %6 = vector.broadcast %5 : vector<1x1x1x4xf32> to vector<2x8x8x4xf32>
    %7 = arith.addf %4, %6 : vector<2x8x8x4xf32>
    %cst = arith.constant 0.000000e+00 : f32
    %8 = vector.broadcast %cst : f32 to vector<2x8x8x4xf32>
    %9 = arith.maximumf %7, %8 : vector<2x8x8x4xf32>
    %10 = arith.truncf %9 : vector<2x8x8x4xf32> to vector<2x8x8x4xbf16>
    %cst_11 = arith.constant 0.000000e+00 : bf16
    %11 = vector.broadcast %cst_11 : bf16 to vector<2x1x10x4xbf16>
    %cst_12 = arith.constant 0.000000e+00 : bf16
    %12 = vector.broadcast %cst_12 : bf16 to vector<2x8x1x4xbf16>
    %c0_13 = arith.constant 0 : index
    %c0_14 = arith.constant 0 : index
    %c0_15 = arith.constant 0 : index
    %c0_16 = arith.constant 0 : index
    %13 = vector.load %arg7[%c0_13, %c0_14, %c0_15, %c0_16] : memref<2x10x10x4xbf16, #tpu.memory_space<vmem>>, vector<2x1x10x4xbf16>
    tpu.vector_store %arg7[%c0_13, %c0_14, %c0_15, %c0_16], %11 {strides = array<i32>} : memref<2x10x10x4xbf16, #tpu.memory_space<vmem>>, vector<2x1x10x4xbf16>,
    %c0_17 = arith.constant 0 : index
    %c9 = arith.constant 9 : index
    %c0_18 = arith.constant 0 : index
    %c0_19 = arith.constant 0 : index
    %14 = vector.load %arg7[%c0_17, %c9, %c0_18, %c0_19] : memref<2x10x10x4xbf16, #tpu.memory_space<vmem>>, vector<2x1x10x4xbf16>
    tpu.vector_store %arg7[%c0_17, %c9, %c0_18, %c0_19], %11 {strides = array<i32>} : memref<2x10x10x4xbf16, #tpu.memory_space<vmem>>, vector<2x1x10x4xbf16>,
    %c0_20 = arith.constant 0 : index
    %c1 = arith.constant 1 : index
    %c0_21 = arith.constant 0 : index
    %c0_22 = arith.constant 0 : index
    %15 = vector.load %arg7[%c0_20, %c1, %c0_21, %c0_22] : memref<2x10x10x4xbf16, #tpu.memory_space<vmem>>, vector<2x8x1x4xbf16>
    tpu.vector_store %arg7[%c0_20, %c1, %c0_21, %c0_22], %12 {strides = array<i32>} : memref<2x10x10x4xbf16, #tpu.memory_space<vmem>>, vector<2x8x1x4xbf16>,
    %c0_23 = arith.constant 0 : index
    %c1_24 = arith.constant 1 : index
    %c9_25 = arith.constant 9 : index
    %c0_26 = arith.constant 0 : index
    %16 = vector.load %arg7[%c0_23, %c1_24, %c9_25, %c0_26] : memref<2x10x10x4xbf16, #tpu.memory_space<vmem>>, vector<2x8x1x4xbf16>
    tpu.vector_store %arg7[%c0_23, %c1_24, %c9_25, %c0_26], %12 {strides = array<i32>} : memref<2x10x10x4xbf16, #tpu.memory_space<vmem>>, vector<2x8x1x4xbf16>,
    %c0_27 = arith.constant 0 : index
    %c1_28 = arith.constant 1 : index
    %c1_29 = arith.constant 1 : index
    %c0_30 = arith.constant 0 : index
    %17 = vector.load %arg7[%c0_27, %c1_28, %c1_29, %c0_30] : memref<2x10x10x4xbf16, #tpu.memory_space<vmem>>, vector<2x8x8x4xbf16>
    tpu.vector_store %arg7[%c0_27, %c1_28, %c1_29, %c0_30], %10 {strides = array<i32>} : memref<2x10x10x4xbf16, #tpu.memory_space<vmem>>, vector<2x8x8x4xbf16>,
    %c0_31 = arith.constant 0 : index
    %c0_32 = arith.constant 0 : index
    %c0_33 = arith.constant 0 : index
    %c0_34 = arith.constant 0 : index
    %18 = vector.load %arg7[%c0_31, %c0_32, %c0_33, %c0_34] : memref<2x10x10x4xbf16, #tpu.memory_space<vmem>>, vector<2x10x10x4xbf16>
    %19 = vector.extract_strided_slice %18 {offsets = [0, 0, 0, 0], sizes = [2, 8, 8, 4], strides = [1, 1, 1, 1]} : vector<2x10x10x4xbf16> to vector<2x8x8x4xbf16>
    %20 = vector.shape_cast %19 : vector<2x8x8x4xbf16> to vector<128x4xbf16>
    %c0_35 = arith.constant 0 : index
    %c0_36 = arith.constant 0 : index
    %21 = vector.load %arg8[%c0_35, %c0_36] : memref<128x36xbf16, #tpu.memory_space<vmem>>, vector<128x4xbf16>
    tpu.vector_store %arg8[%c0_35, %c0_36], %20 {strides = array<i32>} : memref<128x36xbf16, #tpu.memory_space<vmem>>, vector<128x4xbf16>,
    %22 = vector.extract_strided_slice %18 {offsets = [0, 0, 1, 0], sizes = [2, 8, 8, 4], strides = [1, 1, 1, 1]} : vector<2x10x10x4xbf16> to vector<2x8x8x4xbf16>
    %23 = vector.shape_cast %22 : vector<2x8x8x4xbf16> to vector<128x4xbf16>
    %c0_37 = arith.constant 0 : index
    %c4 = arith.constant 4 : index
    %24 = vector.load %arg8[%c0_37, %c4] : memref<128x36xbf16, #tpu.memory_space<vmem>>, vector<128x4xbf16>
    tpu.vector_store %arg8[%c0_37, %c4], %23 {strides = array<i32>} : memref<128x36xbf16, #tpu.memory_space<vmem>>, vector<128x4xbf16>,
    %25 = vector.extract_strided_slice %18 {offsets = [0, 0, 2, 0], sizes = [2, 8, 8, 4], strides = [1, 1, 1, 1]} : vector<2x10x10x4xbf16> to vector<2x8x8x4xbf16>
    %26 = vector.shape_cast %25 : vector<2x8x8x4xbf16> to vector<128x4xbf16>
    %c0_38 = arith.constant 0 : index
    %c8 = arith.constant 8 : index
    %27 = vector.load %arg8[%c0_38, %c8] : memref<128x36xbf16, #tpu.memory_space<vmem>>, vector<128x4xbf16>
    tpu.vector_store %arg8[%c0_38, %c8], %26 {strides = array<i32>} : memref<128x36xbf16, #tpu.memory_space<vmem>>, vector<128x4xbf16>,
    %28 = vector.extract_strided_slice %18 {offsets = [0, 1, 0, 0], sizes = [2, 8, 8, 4], strides = [1, 1, 1, 1]} : vector<2x10x10x4xbf16> to vector<2x8x8x4xbf16>
    %29 = vector.shape_cast %28 : vector<2x8x8x4xbf16> to vector<128x4xbf16>
    %c0_39 = arith.constant 0 : index
    %c12 = arith.constant 12 : index
    %30 = vector.load %arg8[%c0_39, %c12] : memref<128x36xbf16, #tpu.memory_space<vmem>>, vector<128x4xbf16>
    tpu.vector_store %arg8[%c0_39, %c12], %29 {strides = array<i32>} : memref<128x36xbf16, #tpu.memory_space<vmem>>, vector<128x4xbf16>,
    %31 = vector.extract_strided_slice %18 {offsets = [0, 1, 1, 0], sizes = [2, 8, 8, 4], strides = [1, 1, 1, 1]} : vector<2x10x10x4xbf16> to vector<2x8x8x4xbf16>
    %32 = vector.shape_cast %31 : vector<2x8x8x4xbf16> to vector<128x4xbf16>
    %c0_40 = arith.constant 0 : index
    %c16 = arith.constant 16 : index
    %33 = vector.load %arg8[%c0_40, %c16] : memref<128x36xbf16, #tpu.memory_space<vmem>>, vector<128x4xbf16>
    tpu.vector_store %arg8[%c0_40, %c16], %32 {strides = array<i32>} : memref<128x36xbf16, #tpu.memory_space<vmem>>, vector<128x4xbf16>,
    %34 = vector.extract_strided_slice %18 {offsets = [0, 1, 2, 0], sizes = [2, 8, 8, 4], strides = [1, 1, 1, 1]} : vector<2x10x10x4xbf16> to vector<2x8x8x4xbf16>
    %35 = vector.shape_cast %34 : vector<2x8x8x4xbf16> to vector<128x4xbf16>
    %c0_41 = arith.constant 0 : index
    %c20 = arith.constant 20 : index
    %36 = vector.load %arg8[%c0_41, %c20] : memref<128x36xbf16, #tpu.memory_space<vmem>>, vector<128x4xbf16>
    tpu.vector_store %arg8[%c0_41, %c20], %35 {strides = array<i32>} : memref<128x36xbf16, #tpu.memory_space<vmem>>, vector<128x4xbf16>,
    %37 = vector.extract_strided_slice %18 {offsets = [0, 2, 0, 0], sizes = [2, 8, 8, 4], strides = [1, 1, 1, 1]} : vector<2x10x10x4xbf16> to vector<2x8x8x4xbf16>
    %38 = vector.shape_cast %37 : vector<2x8x8x4xbf16> to vector<128x4xbf16>
    %c0_42 = arith.constant 0 : index
    %c24 = arith.constant 24 : index
    %39 = vector.load %arg8[%c0_42, %c24] : memref<128x36xbf16, #tpu.memory_space<vmem>>, vector<128x4xbf16>
    tpu.vector_store %arg8[%c0_42, %c24], %38 {strides = array<i32>} : memref<128x36xbf16, #tpu.memory_space<vmem>>, vector<128x4xbf16>,
    %40 = vector.extract_strided_slice %18 {offsets = [0, 2, 1, 0], sizes = [2, 8, 8, 4], strides = [1, 1, 1, 1]} : vector<2x10x10x4xbf16> to vector<2x8x8x4xbf16>
    %41 = vector.shape_cast %40 : vector<2x8x8x4xbf16> to vector<128x4xbf16>
    %c0_43 = arith.constant 0 : index
    %c28 = arith.constant 28 : index
    %42 = vector.load %arg8[%c0_43, %c28] : memref<128x36xbf16, #tpu.memory_space<vmem>>, vector<128x4xbf16>
    tpu.vector_store %arg8[%c0_43, %c28], %41 {strides = array<i32>} : memref<128x36xbf16, #tpu.memory_space<vmem>>, vector<128x4xbf16>,
    %43 = vector.extract_strided_slice %18 {offsets = [0, 2, 2, 0], sizes = [2, 8, 8, 4], strides = [1, 1, 1, 1]} : vector<2x10x10x4xbf16> to vector<2x8x8x4xbf16>
    %44 = vector.shape_cast %43 : vector<2x8x8x4xbf16> to vector<128x4xbf16>
    %c0_44 = arith.constant 0 : index
    %c32 = arith.constant 32 : index
    %45 = vector.load %arg8[%c0_44, %c32] : memref<128x36xbf16, #tpu.memory_space<vmem>>, vector<128x4xbf16>
    tpu.vector_store %arg8[%c0_44, %c32], %44 {strides = array<i32>} : memref<128x36xbf16, #tpu.memory_space<vmem>>, vector<128x4xbf16>,
    %c0_45 = arith.constant 0 : index
    %c0_46 = arith.constant 0 : index
    %46 = vector.load %arg8[%c0_45, %c0_46] : memref<128x36xbf16, #tpu.memory_space<vmem>>, vector<128x36xbf16>
    %c0_47 = arith.constant 0 : index
    %c0_48 = arith.constant 0 : index
    %47 = vector.load %arg4[%c0_47, %c0_48] : memref<36x9xbf16, #tpu.memory_space<vmem>>, vector<36x9xbf16>
    %cst_49 = arith.constant dense<0.000000e+00> : vector<128x9xf32>
    %48 = tpu.matmul %46, %47, %cst_49 {dimension_numbers = #tpu.dot_dimension_numbers<[1], [0], [0], [1], [0, 0, 1, 1], [], []>} : vector<128x36xbf16>, vector<36x9xbf16>, vector<128x9xf32> -> vector<128x9xf32>
    %49 = arith.truncf %48 : vector<128x9xf32> to vector<128x9xbf16>
    %c0_50 = arith.constant 0 : index
    %c0_51 = arith.constant 0 : index
    %50 = vector.load %arg5[%c0_50, %c0_51] : memref<128x9xbf16, #tpu.memory_space<vmem>>, vector<128x9xbf16>
    tpu.vector_store %arg5[%c0_50, %c0_51], %49 {strides = array<i32>} : memref<128x9xbf16, #tpu.memory_space<vmem>>, vector<128x9xbf16>,
    %cst_52 = arith.constant dense<0.000000e+00> : vector<9xf32>
    %51 = vector.multi_reduction <add>, %48, %cst_52 [0] : vector<128x9xf32> to vector<9xf32>
    %52 = vector.shape_cast %51 : vector<9xf32> to vector<1x9xf32>
    %cst_53 = arith.constant 1.280000e+02 : f32
    %53 = vector.broadcast %cst_53 : f32 to vector<1x9xf32>
    %54 = arith.divf %52, %53 : vector<1x9xf32>
    %cst_54 = arith.constant dense<0.000000e+00> : vector<9xf32>
    %55 = vector.multi_reduction <add>, %48, %cst_54 [0] : vector<128x9xf32> to vector<9xf32>
    %56 = vector.shape_cast %55 : vector<9xf32> to vector<1x9xf32>
    %57 = vector.broadcast %54 : vector<1x9xf32> to vector<128x9xf32>
    %58 = arith.subf %48, %57 : vector<128x9xf32>
    %59 = arith.mulf %58, %58 : vector<128x9xf32>
    %cst_55 = arith.constant dense<0.000000e+00> : vector<9xf32>
    %60 = vector.multi_reduction <add>, %59, %cst_55 [0] : vector<128x9xf32> to vector<9xf32>
    %61 = vector.shape_cast %60 : vector<9xf32> to vector<1x9xf32>
    %62 = tpu.concatenate %56, %61 in 0 : vector<1x9xf32>, vector<1x9xf32> -> vector<2x9xf32>
    %63 = vector.shape_cast %62 : vector<2x9xf32> to vector<1x2x9xf32>
    %c0_56 = arith.constant 0 : index
    %c0_57 = arith.constant 0 : index
    %c0_58 = arith.constant 0 : index
    %64 = vector.load %arg6[%c0_56, %c0_57, %c0_58] : memref<1x2x9xf32, #tpu.memory_space<vmem>>, vector<1x2x9xf32>
    tpu.vector_store %arg6[%c0_56, %c0_57, %c0_58], %63 {strides = array<i32>} : memref<1x2x9xf32, #tpu.memory_space<vmem>>, vector<1x2x9xf32>,
    return
  }
  func.func @transform_0(%arg0: i32) -> (i32, i32, i32, i32) {
    %c0_i32 = arith.constant 0 : i32
    %c0_i32_0 = arith.constant 0 : i32
    %c0_i32_1 = arith.constant 0 : i32
    %c0_i32_2 = arith.constant 0 : i32
    return %arg0, %c0_i32, %c0_i32_0, %c0_i32_1 : i32, i32, i32, i32
  }
  func.func @transform_1(%arg0: i32) -> (i32, i32, i32, i32) {
    %c0_i32 = arith.constant 0 : i32
    %c0_i32_0 = arith.constant 0 : i32
    %c0_i32_1 = arith.constant 0 : i32
    %c0_i32_2 = arith.constant 0 : i32
    %c0_i32_3 = arith.constant 0 : i32
    return %c0_i32, %c0_i32_0, %c0_i32_1, %c0_i32_2 : i32, i32, i32, i32
  }
  func.func @transform_2(%arg0: i32) -> (i32, i32, i32, i32) {
    %c0_i32 = arith.constant 0 : i32
    %c0_i32_0 = arith.constant 0 : i32
    %c0_i32_1 = arith.constant 0 : i32
    %c0_i32_2 = arith.constant 0 : i32
    %c0_i32_3 = arith.constant 0 : i32
    return %c0_i32, %c0_i32_0, %c0_i32_1, %c0_i32_2 : i32, i32, i32, i32
  }
  func.func @transform_3(%arg0: i32) -> (i32, i32) {
    %c0_i32 = arith.constant 0 : i32
    %c0_i32_0 = arith.constant 0 : i32
    %c0_i32_1 = arith.constant 0 : i32
    return %c0_i32, %c0_i32_0 : i32, i32
  }
  func.func @transform_4(%arg0: i32) -> (i32, i32) {
    %c0_i32 = arith.constant 0 : i32
    %c0_i32_0 = arith.constant 0 : i32
    return %arg0, %c0_i32 : i32, i32
  }
  func.func @transform_5(%arg0: i32) -> (i32, i32, i32) {
    %c0_i32 = arith.constant 0 : i32
    %c0_i32_0 = arith.constant 0 : i32
    %c0_i32_1 = arith.constant 0 : i32
    return %arg0, %c0_i32, %c0_i32_0 : i32, i32, i32
  }
}

module attributes {stable_mosaic.version = 11 : i64} {
  func.func @_bn_add_relu_kernel(%arg0: i32, %arg1: memref<16x256xbf16, #tpu.memory_space<vmem>>, %arg2: memref<16x256xf32, #tpu.memory_space<vmem>>, %arg3: memref<1x256xf32, #tpu.memory_space<vmem>>, %arg4: memref<1x256xf32, #tpu.memory_space<vmem>>, %arg5: memref<16x256xf32, #tpu.memory_space<vmem>>) attributes {dimension_semantics = [#tpu.dimension_semantics<parallel>], iteration_bounds = array<i64: 1>, scalar_prefetch = 0 : i64, scratch_operands = 0 : i64, tpu.core_type = #tpu.core_type<tc>, window_params = [{transform_indices = @transform_0, window_bounds = array<i64: 16, 256>}, {transform_indices = @transform_1, window_bounds = array<i64: 16, 256>}, {pipeline_mode = #tpu.pipeline_mode<synchronous>, transform_indices = @transform_2, window_bounds = array<i64: 1, 256>}, {pipeline_mode = #tpu.pipeline_mode<synchronous>, transform_indices = @transform_3, window_bounds = array<i64: 1, 256>}, {transform_indices = @transform_4, window_bounds = array<i64: 16, 256>}]} {
    %c0 = arith.constant 0 : index
    %c0_0 = arith.constant 0 : index
    %0 = vector.load %arg1[%c0, %c0_0] : memref<16x256xbf16, #tpu.memory_space<vmem>>, vector<16x256xbf16>
    %1 = arith.extf %0 : vector<16x256xbf16> to vector<16x256xf32>
    %c0_1 = arith.constant 0 : index
    %c0_2 = arith.constant 0 : index
    %2 = vector.load %arg3[%c0_1, %c0_2] : memref<1x256xf32, #tpu.memory_space<vmem>>, vector<1x256xf32>
    %3 = vector.broadcast %2 : vector<1x256xf32> to vector<16x256xf32>
    %4 = arith.mulf %1, %3 : vector<16x256xf32>
    %c0_3 = arith.constant 0 : index
    %c0_4 = arith.constant 0 : index
    %5 = vector.load %arg4[%c0_3, %c0_4] : memref<1x256xf32, #tpu.memory_space<vmem>>, vector<1x256xf32>
    %6 = vector.broadcast %5 : vector<1x256xf32> to vector<16x256xf32>
    %7 = arith.addf %4, %6 : vector<16x256xf32>
    %c0_5 = arith.constant 0 : index
    %c0_6 = arith.constant 0 : index
    %8 = vector.load %arg2[%c0_5, %c0_6] : memref<16x256xf32, #tpu.memory_space<vmem>>, vector<16x256xf32>
    %9 = arith.addf %7, %8 : vector<16x256xf32>
    %cst = arith.constant 0.000000e+00 : f32
    %10 = vector.broadcast %cst : f32 to vector<16x256xf32>
    %11 = arith.maximumf %9, %10 : vector<16x256xf32>
    %c0_7 = arith.constant 0 : index
    %c0_8 = arith.constant 0 : index
    %12 = vector.load %arg5[%c0_7, %c0_8] : memref<16x256xf32, #tpu.memory_space<vmem>>, vector<16x256xf32>
    tpu.vector_store %arg5[%c0_7, %c0_8], %11 {strides = array<i32>} : memref<16x256xf32, #tpu.memory_space<vmem>>, vector<16x256xf32>,
    return
  }
  func.func @transform_0(%arg0: i32) -> (i32, i32) {
    %c0_i32 = arith.constant 0 : i32
    %c0_i32_0 = arith.constant 0 : i32
    return %arg0, %c0_i32 : i32, i32
  }
  func.func @transform_1(%arg0: i32) -> (i32, i32) {
    %c0_i32 = arith.constant 0 : i32
    %c0_i32_0 = arith.constant 0 : i32
    return %arg0, %c0_i32 : i32, i32
  }
  func.func @transform_2(%arg0: i32) -> (i32, i32) {
    %c0_i32 = arith.constant 0 : i32
    %c0_i32_0 = arith.constant 0 : i32
    %c0_i32_1 = arith.constant 0 : i32
    return %c0_i32, %c0_i32_0 : i32, i32
  }
  func.func @transform_3(%arg0: i32) -> (i32, i32) {
    %c0_i32 = arith.constant 0 : i32
    %c0_i32_0 = arith.constant 0 : i32
    %c0_i32_1 = arith.constant 0 : i32
    return %c0_i32, %c0_i32_0 : i32, i32
  }
  func.func @transform_4(%arg0: i32) -> (i32, i32) {
    %c0_i32 = arith.constant 0 : i32
    %c0_i32_0 = arith.constant 0 : i32
    return %arg0, %c0_i32 : i32, i32
  }
}

</mosaic_0001>

<bundles_post_ra>
// kernel: basic_block_forward.6
= control target key start
LH: loop header
LB: loop body
LE: loop exit
PB: predicated region body
PF: predicated region fallthrough
CT: control target
= control target key end

     0   :  { %s1411_s18 = smov 0   ;;  %s1413_s19 = smov 0   ;;  %s1751_s0 = inlined_call_operand.vmem [shape: bf16[2,8,64,9], index: 0, kind: input, shape index: {}]   ;;  %s1752_s1 = inlined_call_operand.vmem [shape: f32[1,1,1,9], index: 1, kind: input, shape index: {}]   ;;  %s1753_s2 = inlined_call_operand.vmem [shape: f32[1,1,1,9], index: 2, kind: input, shape index: {}]   ;;  %s1754_s3 = inlined_call_operand.vmem [shape: bf16[27,4], index: 3, kind: input, shape index: {}]   ;;  %s1755_s4 = inlined_call_operand.vmem [shape: bf16[2,8,64,4], index: 4, kind: output, shape index: {0}]   ;;  %s1756_s5 = inlined_call_operand.vmem [shape: f32[2,4,2,4], index: 5, kind: output, shape index: {1}]  }
   0x1   :  { %s1415_s20 = smov 0   ;;  %s1417_s21 = smov 0  }
   0x2   :  { %s1419_s22 = smov 0   ;;  %s1421_s23 = smov 0  }
   0x3   :  { %s1423_s24 = smov 0  }
   0x4 LB: > { %s25_s25 = sadd.s32 1, %s1367_s22  ;;  %s28_s26 = sadd.s32 1, %s1371_s23  ;;  %s1375_s24 = sphi %s1423_s24, %s16_s24   ;;  %s1371_s23 = sphi %s1421_s23, %s1763_s23   ;;  %s1367_s22 = sphi %s1419_s22, %s1762_s22   ;;  %s1363_s21 = sphi %s1417_s21, %s1761_s21   ;;  %s1359_s20 = sphi %s1415_s20, %s1760_s20   ;;  %s1355_s19 = sphi %s1413_s19, %s1759_s19   ;;  %s1351_s18 = sphi %s1411_s18, %s1758_s18  }
   0x5   : > { %p26_p0 = scmp.ge.s32.totalorder %s25_s25, 4  ;;  %s1123_s27 = sadd.s32 4294967295, %s1375_s24  }
   0x6   : > { %p44_p1 = scmp.ne.s32.totalorder %s1355_s19, %s1351_s18  ;;  %p45_p2 = scmp.eq.s32.totalorder %s1375_s24, 0 }
   0x7   : > { %s1765_s25 = smov (%p26_p0, %s25_s25), 0  ;;  %s1767_s26 = smov (!%p26_p0, %s28_s26), %s1371_s23 }
   0x8   : > { %p30_p3 = scmp.ge.s32.totalorder %s1767_s26, 2  ;;  %p139_p4 = scmp.eq.s32.totalorder %s1123_s27, 7 }
   0x9   : > { %s33_s28 = ssub.s32 %s1367_s22, %s1765_s25  ;;  %p46_p5 = por %p45_p2, %p44_p1 }
   0xa   : > { %s1769_s26 = smov (%p30_p3, %s1767_s26), 0  ;;  %p1459_p6 = por %p139_p4, %p44_p1 }
   0xb   : > { %s32_s30 = ssub.s32 %s1371_s23, %s1769_s26  ;;  %s37_s7 = sadd.s32 1, %s1355_s19 }
   0xc   : > { %s34_s6 = sor.u32 %s33_s28, %s32_s30  ;;  %p1126_p8 = scmp.ge.s32.totalorder %s1375_s24, 8 }
   0xd   : > { %p35_p7 = scmp.eq.s32.totalorder %s34_s6, 0 }
   0xe   : > { %198 = sbr.rel (%p1126_p8) target bundleno = 36 (0x24), region = 28 }
   0xf   : > { %s1467_s8 = scalar_select %p35_p7, %s1355_s19, %s37_s7  }
  0x15   : > { %201 = sbr.rel (!%p46_p5) target bundleno = 36 (0x24), region = 32  ;;  %s203_s9 = sand.u32 (%p46_p5), 1, %s1355_s19  }
  0x16   : > { %s1128_s10 = sshll.u32 (%p46_p5), %s1367_s22, 1  ;;  %s1127_s11 = sshll.u32 (%p46_p5), %s203_s9, 6 }
  0x17   : > { %s1129_s12 = sshll.u32 (%p46_p5), %s1371_s23, 6  ;;  %s205_s27 = scalar_lea.vmem (%p46_p5), [#allocation3], %s1127_s11 }
  0x18   : > { %s208_s13 = sadd.s32 (%p46_p5), %s1129_s12, %s1128_s10 }
  0x19   : > { %s1130_s14 = sshll.u32 (%p46_p5), %s208_s13, 2 }
  0x1a   : > { %s210_s17 = scalar_lea.vmem (%p46_p5), %s1751_s0, %s1130_s14 }
  0x1b   : > { %v226_v0 = vld [vmem:[%s210_s17] sm:$0xff] (%p46_p5)  }
  0x1c   : > { %v230_v1 = vld [vmem:[%s210_s17 + $0x20] sm:$0xff]   ;;  %227 = vst [vmem:[%s205_s27] sm:$0xff] %v226_v0  }
  0x1d   : > { %v234_v2 = vld [vmem:[%s210_s17 + $0x40] sm:$0xff]   ;;  %231 = vst [vmem:[%s205_s27 + $0x8] sm:$0xff] %v230_v1  }
  0x1e   : > { %235 = vst [vmem:[%s205_s27 + $0x10] sm:$0xff] %v234_v2   ;;  %v238_v3 = vld [vmem:[%s210_s17 + $0x60] sm:$0xff]  }
  0x1f   : > { %v242_v4 = vld [vmem:[%s210_s17 + $0x80] sm:$0xff]   ;;  %239 = vst [vmem:[%s205_s27 + $0x18] sm:$0xff] %v238_v3  }
  0x20   : > { %v246_v5 = vld [vmem:[%s210_s17 + $0xa0] sm:$0xff]   ;;  %243 = vst [vmem:[%s205_s27 + $0x20] sm:$0xff] %v242_v4  }
  0x21   : > { %247 = vst [vmem:[%s205_s27 + $0x28] sm:$0xff] %v246_v5   ;;  %v250_v6 = vld [vmem:[%s210_s17 + $0xc0] sm:$0xff]  }
  0x22   : > { %v254_v7 = vld [vmem:[%s210_s17 + $0xe0] sm:$0xff]   ;;  %251 = vst [vmem:[%s205_s27 + $0x30] sm:$0xff] %v250_v6  }
  0x23   : > { %255 = vst [vmem:[%s205_s27 + $0x38] sm:$0xff] %v254_v7  }
  0x24 PF: > { %p1131_p9 = scmp.ge.s32.totalorder %s1375_s24, 1  ;;  %p311_p10 = scmp.lt.s32.totalorder %s1375_s24, 9 }
  0x26   : > { %p312_p11 = pnand %p1131_p9, %p311_p10 }
  0x27   : > { %s318_s28 = sand.u32 (!%p312_p11), 1, %s1351_s18   ;;  %vm465_vm0 = vcmask (!%p312_p11), 72704   ;;  %v1484_v8 = vld [vmem:[%s1752_s1] ss:$0 sm:$0xff] (!%p312_p11)  ;;  %v1377_v9 = vmov (!%p312_p11), 0   ;;  %s1378_s13 = smov (!%p312_p11), 9  }
  0x28   : > { %315 = sbr.rel (%p312_p11) target bundleno = 493 (0x1ed), region = 73  ;;  %s1479_s30 = sshll.u32 (!%p312_p11), %s318_s28, 6  ;;  %466 = vst.msk [vmem:[#allocation2] sm:$0xff] (!%p312_p11), %vm465_vm0, %v1377_v9  ;;  %v1498_v18 = vld [vmem:[%s1753_s2] ss:$0 sm:$0xff] (!%p312_p11)  ;;  %vm593_vm1 = vcmask (!%p312_p11), 1044480  }
  0x29   : > { %s1489_s9 = scalar_lea.vmem (!%p312_p11), [#allocation3], %s1479_s30  ;;  %v1319_v23 = vld [vmem:[%s1754_s3] sm:$0xff] (!%p312_p11)   ;;  %s1379_s14 = smov (!%p312_p11), 18   ;;  %vm594_vm2 = vcmask (!%p312_p11), 1045504   ;;  %vm506_vm3 = vcmask (!%p312_p11), 146504   ;;  %vm536_vm4 = vcmask (!%p312_p11), 220304  }
  0x2a   : > { %v1187_v10 = vld [vmem:[%s1489_s9] sm:$0xff] (!%p312_p11)   ;;  %v1218_v11 = vld [vmem:[%s1489_s9 + $0x8] sm:$0xff] (!%p312_p11)   ;;  %v1219_v12 = vld [vmem:[%s1489_s9 + $0x10] sm:$0xff] (!%p312_p11)   ;;  %1235 = vmatprep.subr.bf16.mxu0 (!%p312_p11), %v1319_v23  ;;  %1255 = vmatprep.subr.bf16.mxu1 (!%p312_p11), %v1319_v23  ;;  %vm568_vm5 = vcmask (!%p312_p11), 220160   ;;  %vm761_vm6 = vcmask (!%p312_p11), 27648   ;;  %vm778_vm7 = vcmask (!%p312_p11), 31744  }
  0x2b   : > { %v1188_v13 = vunpack.c.l.bf16 (!%p312_p11), %v1187_v10  ;;  %v1189_v14 = vunpack.c.h.bf16 (!%p312_p11), %v1187_v10  ;;  %v1192_v15 = vunpack.c.l.bf16 (!%p312_p11), %v1218_v11  ;;  %v1193_v16 = vunpack.c.h.bf16 (!%p312_p11), %v1218_v11  ;;  %v1220_v17 = vld [vmem:[%s1489_s9 + $0x18] sm:$0xff] (!%p312_p11)   ;;  %1236 = vmatpush3.bf16.msra.mxu0 (!%p312_p11), %v1319_v23  ;;  %v1221_v40 = vld [vmem:[%s1489_s9 + $0x20] sm:$0xff] (!%p312_p11)   ;;  %v1222_v45 = vld [vmem:[%s1489_s9 + $0x28] sm:$0xff] (!%p312_p11)   ;;  %1257 = vmatpush3.bf16.msra.mxu1 (!%p312_p11), %v1319_v23  ;;  %s1600_s17 = scalar_lea.vmem (!%p312_p11), [#allocation4], %s1479_s30  ;;  %p354_p12 = scmp.lt.s32.totalorder (!%p312_p11), %s1363_s21, 1 }
  0x2c   : > { %v1196_v19 = vunpack.c.l.bf16 (!%p312_p11), %v1219_v12  ;;  %v1197_v20 = vunpack.c.h.bf16 (!%p312_p11), %v1219_v12  ;;  %v1200_v21 = vunpack.c.l.bf16 (!%p312_p11), %v1220_v17  ;;  %v1201_v22 = vunpack.c.h.bf16 (!%p312_p11), %v1220_v17  ;;  %v1223_v50 = vld [vmem:[%s1489_s9 + $0x30] sm:$0xff] (!%p312_p11)   ;;  %v1224_v63 = vld [vmem:[%s1489_s9 + $0x38] sm:$0xff] (!%p312_p11)   ;;  %v1320_v23 = vld [vmem:[%s1754_s3 + $0x8] sm:$0x3f] (!%p312_p11)   ;;  %p356_p13 = scmp.lt.s32.totalorder (!%p312_p11), %s1359_s20, 3 }
  0x2d   : > { %v402_v24 = vmul.f32 (!%p312_p11), %v1188_v13, %v1484_v8  ;;  %v403_v25 = vmul.f32 (!%p312_p11), %v1189_v14, %v1484_v8  ;;  %v404_v26 = vmul.f32 (!%p312_p11), %v1192_v15, %v1484_v8  ;;  %v405_v27 = vmul.f32 (!%p312_p11), %v1193_v16, %v1484_v8 }
  0x2e   : > { %v406_v28 = vmul.f32 (!%p312_p11), %v1196_v19, %v1484_v8  ;;  %v407_v29 = vmul.f32 (!%p312_p11), %v1197_v20, %v1484_v8  ;;  %v408_v30 = vmul.f32 (!%p312_p11), %v1200_v21, %v1484_v8  ;;  %v409_v31 = vmul.f32 (!%p312_p11), %v1201_v22, %v1484_v8 }
  0x2f   : > { %v425_v32 = vadd.f32 %v1498_v18, %v402_v24  ;;  %v426_v33 = vadd.f32 %v1498_v18, %v403_v25  ;;  %v427_v34 = vadd.f32 %v1498_v18, %v404_v26  ;;  %v428_v35 = vadd.f32 %v1498_v18, %v405_v27  ;;  %s355_s27 = scalar_select %p354_p12, %s1363_s21, 1 }
  0x30   : > { %v429_v36 = vadd.f32 %v1498_v18, %v406_v28  ;;  %v430_v37 = vadd.f32 %v1498_v18, %v407_v29  ;;  %v431_v38 = vadd.f32 %v1498_v18, %v408_v30  ;;  %v432_v39 = vadd.f32 %v1498_v18, %v409_v31  ;;  %s357_s28 = scalar_select %p356_p13, %s1359_s20, 3 }
  0x31   : > { %v441_v41 = vmax.f32 %v425_v32, 0.0  ;;  %v442_v42 = vmax.f32 %v426_v33, 0.0  ;;  %v443_v43 = vmax.f32 %v427_v34, 0.0  ;;  %v444_v44 = vmax.f32 %v428_v35, 0.0  ;;  %s1134_s30 = sshll.u32 %s355_s27, 2  ;;  %s1165_s11 = sshll.u32 (%p1459_p6), %s1359_s20, 1 }
  0x32   : > { %v445_v46 = vmax.f32 %v429_v36, 0.0  ;;  %v446_v47 = vmax.f32 %v430_v37, 0.0  ;;  %v447_v48 = vmax.f32 %v431_v38, 0.0  ;;  %v448_v49 = vmax.f32 %v432_v39, 0.0  ;;  %s359_s6 = sadd.s32 %s1134_s30, %s357_s28  ;;  %s1166_s12 = sshll.u32 (%p1459_p6), %s1363_s21, 6 }
  0x33   : > { %v457_v51 = vpack.c.bf16 %v442_v42, %v441_v41  ;;  %v458_v52 = vpack.c.bf16 %v444_v44, %v443_v43  ;;  %v1204_v53 = vunpack.c.l.bf16 %v1221_v40  ;;  %v1205_v54 = vunpack.c.h.bf16 %v1221_v40  ;;  %s1135_s7 = sshll.u32 %s359_s6, 1 }
  0x34   : > { %v459_v55 = vpack.c.bf16 %v446_v47, %v445_v46  ;;  %v460_v56 = vpack.c.bf16 %v448_v49, %v447_v48  ;;  %v1208_v57 = vunpack.c.l.bf16 %v1222_v45  ;;  %v1209_v58 = vunpack.c.h.bf16 %v1222_v45  ;;  %s361_s10 = scalar_lea.vmem %s1756_s5, %s1135_s7 }
  0x35   : > { %482 = vrot.lane.b32.xlu0 %v457_v51, %s1378_s13  ;;  %467 = vst.msk [vmem:[#allocation2 + $0x8] sm:$0xff] %vm465_vm0, %v457_v51  ;;  %515 = vrot.lane.b32.xlu1 %v458_v52, %s1379_s14  ;;  %468 = vst.msk [vmem:[#allocation2 + $0x10] sm:$0xff] %vm465_vm0, %v458_v52  ;;  %v410_v59 = vmul.f32 %v1204_v53, %v1484_v8  ;;  %v411_v60 = vmul.f32 %v1205_v54, %v1484_v8  ;;  %v1212_v61 = vunpack.c.l.bf16 %v1223_v50  ;;  %v1380_v27 = vmov 65535  }
  0x36   : > { %v1213_v62 = vunpack.c.h.bf16 %v1223_v50  ;;  %469 = vst.msk [vmem:[#allocation2 + $0x18] sm:$0xff] %vm465_vm0, %v459_v55  ;;  %470 = vst.msk [vmem:[#allocation2 + $0x20] sm:$0xff] %vm465_vm0, %v460_v56  ;;  %v412_v0 = vmul.f32 %v1208_v57, %v1484_v8  ;;  %v413_v1 = vmul.f32 %v1209_v58, %v1484_v8  ;;  %v1216_v10 = vunpack.c.l.bf16 %v1224_v63 }
  0x37   : > { %v433_v2 = vadd.f32 %v1498_v18, %v410_v59  ;;  %v434_v3 = vadd.f32 %v1498_v18, %v411_v60  ;;  %v414_v4 = vmul.f32 %v1212_v61, %v1484_v8  ;;  %v1217_v11 = vunpack.c.h.bf16 %v1224_v63 }
  0x38   : > { %v415_v5 = vmul.f32 %v1213_v62, %v1484_v8  ;;  %v435_v6 = vadd.f32 %v1498_v18, %v412_v0  ;;  %v436_v7 = vadd.f32 %v1498_v18, %v413_v1  ;;  %v416_v25 = vmul.f32 %v1216_v10, %v1484_v8 }
  0x39   : > { %484 = vrot.lane.b32.xlu0 %v458_v52, %s1378_s13  ;;  %517 = vrot.lane.b32.xlu1 %v459_v55, %s1379_s14  ;;  %v449_v12 = vmax.f32 %v433_v2, 0.0  ;;  %v450_v13 = vmax.f32 %v434_v3, 0.0  ;;  %v437_v14 = vadd.f32 %v1498_v18, %v414_v4  ;;  %v417_v26 = vmul.f32 %v1217_v11, %v1484_v8 }
  0x3a   : > { %v438_v15 = vadd.f32 %v1498_v18, %v415_v5  ;;  %v451_v16 = vmax.f32 %v435_v6, 0.0  ;;  %v452_v17 = vmax.f32 %v436_v7, 0.0  ;;  %v595_v28 = vsel %vm593_vm1, 4294967295, %v1380_v27 }
  0x3b   : > { %v461_v19 = vpack.c.bf16 %v450_v13, %v449_v12  ;;  %v453_v20 = vmax.f32 %v437_v14, 0.0  ;;  %v596_v29 = vsel %vm594_vm2, %v595_v28, 0  ;;  %v439_v31 = vadd.f32 %v1498_v18, %v416_v25 }
  0x3c   : > { %v454_v21 = vmax.f32 %v438_v15, 0.0  ;;  %v462_v22 = vpack.c.bf16 %v452_v17, %v451_v16  ;;  %v598_v30 = vand.u32 %v1320_v23, %v596_v29  ;;  %v440_v32 = vadd.f32 %v1498_v18, %v417_v26 }
  0x3d   : > { %486 = vrot.lane.b32.xlu0 %v459_v55, %s1378_s13  ;;  %488 = vrot.lane.b32.xlu1 %v460_v56, %s1378_s13  ;;  %471 = vst.msk [vmem:[#allocation2 + $0x28] sm:$0xff] %vm465_vm0, %v461_v19  ;;  %v455_v8 = vmax.f32 %v439_v31, 0.0  ;;  %vm887_vm8 = vcmask 1040384   ;;  %vm889_vm9 = vcmask 25600  }
  0x3e   : > { %v463_v24 = vpack.c.bf16 %v454_v21, %v453_v20  ;;  %472 = vst.msk [vmem:[#allocation2 + $0x30] sm:$0xff] %vm465_vm0, %v462_v22  ;;  %1237 = vmatprep.subr.bf16.mxu0 %v598_v30  ;;  %1256 = vmatprep.subr.bf16.mxu1 %v598_v30  ;;  %v456_v33 = vmax.f32 %v440_v32, 0.0 }
  0x3f   : > { %1238 = vmatpush3.bf16.msra.mxu0 %v598_v30  ;;  %1258 = vmatpush3.bf16.msra.mxu1 %v598_v30 }
  0x40   : > { %473 = vst.msk [vmem:[#allocation2 + $0x38] sm:$0xff] %vm465_vm0, %v463_v24  ;;  %v464_v34 = vpack.c.bf16 %v456_v33, %v455_v8 }
  0x41   : > { %519 = vrot.lane.b32.xlu0 %v460_v56, %s1379_s14  ;;  %521 = vrot.lane.b32.xlu1 %v461_v19, %s1379_s14 }
  0x45   : > { %490 = vrot.lane.b32.xlu0 %v461_v19, %s1378_s13  ;;  %492 = vrot.lane.b32.xlu1 %v462_v22, %s1378_s13 }
  0x49   : > { %523 = vrot.lane.b32.xlu0 %v462_v22, %s1379_s14  ;;  %525 = vrot.lane.b32.xlu1 %v463_v24, %s1379_s14 }
  0x4d   : > { %494 = vrot.lane.b32.xlu0 %v463_v24, %s1378_s13  ;;  %496 = vrot.lane.b32.xlu1 %v464_v34, %s1378_s13  ;;  %s908_s13 = sadd.s32 (%p1459_p6), %s1166_s12, %s1165_s11 }
  0x4e   : > { %s1167_s29 = sshll.u32 (%p1459_p6), %s908_s13, 2 }
  0x4f   : > { %s910_s16 = scalar_lea.vmem (%p1459_p6), %s1755_s4, %s1167_s29 }
  0x51   : > { %527 = vrot.lane.b32.xlu0 %v464_v34, %s1379_s14 }
  0xa7   : > { %v483_v18 = vpop.permute.xlu0 %482  ;;  %v516_v35 = vpop.permute.xlu1 %515 }
  0xa8   : > { %507 = vst.msk [vmem:[#allocation2] sm:$0xff] %vm506_vm3, %v483_v18 }
  0xa9   : > { %537 = vst.msk [vmem:[#allocation2] sm:$0xff] %vm536_vm4, %v516_v35 }
  0xab   : > { %v485_v36 = vpop.permute.xlu0 %484  ;;  %v518_v37 = vpop.permute.xlu1 %517 }
  0xac   : > { %508 = vst.msk [vmem:[#allocation2 + $0x8] sm:$0xff] %vm506_vm3, %v485_v36 }
  0xad   : > { %538 = vst.msk [vmem:[#allocation2 + $0x8] sm:$0xff] %vm536_vm4, %v518_v37 }
  0xaf   : > { %v487_v38 = vpop.permute.xlu0 %486  ;;  %v489_v39 = vpop.permute.xlu1 %488 }
  0xb0   : > { %509 = vst.msk [vmem:[#allocation2 + $0x10] sm:$0xff] %vm506_vm3, %v487_v38  ;;  %510 = vst.msk [vmem:[#allocation2 + $0x18] sm:$0xff] %vm506_vm3, %v489_v39  ;;  %v545_v40 = vld [vmem:[#allocation2] sm:$0xff] }
  0xb1   : > { %1239 = vmatprep.mubr.msk.bf16.mxu0 %vm568_vm5, %v545_v40 }
  0xb3   : > { %v520_v41 = vpop.permute.xlu0 %519  ;;  %v522_v42 = vpop.permute.xlu1 %521 }
  0xb4   : > { %539 = vst.msk [vmem:[#allocation2 + $0x10] sm:$0xff] %vm536_vm4, %v520_v41  ;;  %540 = vst.msk [vmem:[#allocation2 + $0x18] sm:$0xff] %vm536_vm4, %v522_v42  ;;  %v546_v43 = vld [vmem:[#allocation2 + $0x8] sm:$0xff] }
  0xb5   : > { %1240 = vmatmul.mubr.msk.bf16.vlgmr.msra.gmra.mrb[0].mxu0 %vm568_vm5, %v546_v43 }
  0xb7   : > { %v491_v44 = vpop.permute.xlu0 %490  ;;  %v493_v45 = vpop.permute.xlu1 %492 }
  0xb8   : > { %511 = vst.msk [vmem:[#allocation2 + $0x20] sm:$0xff] %vm506_vm3, %v491_v44  ;;  %512 = vst.msk [vmem:[#allocation2 + $0x28] sm:$0xff] %vm506_vm3, %v493_v45 }
  0xbb   : > { %v524_v46 = vpop.permute.xlu0 %523  ;;  %v526_v47 = vpop.permute.xlu1 %525  ;;  %v547_v48 = vld [vmem:[#allocation2 + $0x10] sm:$0xff]  ;;  %v548_v49 = vld [vmem:[#allocation2 + $0x18] sm:$0xff] }
  0xbc   : > { %541 = vst.msk [vmem:[#allocation2 + $0x20] sm:$0xff] %vm536_vm4, %v524_v46  ;;  %542 = vst.msk [vmem:[#allocation2 + $0x28] sm:$0xff] %vm536_vm4, %v526_v47  ;;  %1243 = vmatprep.mubr.msk.bf16.mxu0 %vm568_vm5, %v547_v48 }
  0xbd   : > { %1244 = vmatmul.mubr.msk.bf16.gmra.mrb[4].mxu0 %vm568_vm5, %v548_v49 }
  0xbf   : > { %v495_v50 = vpop.permute.xlu0 %494  ;;  %v497_v51 = vpop.permute.xlu1 %496 }
  0xc0   : > { %513 = vst.msk [vmem:[#allocation2 + $0x30] sm:$0xff] %vm506_vm3, %v495_v50  ;;  %514 = vst.msk [vmem:[#allocation2 + $0x38] sm:$0xff] %vm506_vm3, %v497_v51 }
  0xc1   : > { %544 = vst.msk [vmem:[#allocation2 + $0x38] sm:$0xff] %vm536_vm4, %v1377_v9 }
  0xc3   : > { %v528_v52 = vpop.permute.xlu0 %527  ;;  %v549_v53 = vld [vmem:[#allocation2 + $0x20] sm:$0xff]  ;;  %v550_v54 = vld [vmem:[#allocation2 + $0x28] sm:$0xff] }
  0xc4   : > { %543 = vst.msk [vmem:[#allocation2 + $0x30] sm:$0xff] %vm536_vm4, %v528_v52  ;;  %1247 = vmatprep.mubr.msk.bf16.mxu1 %vm568_vm5, %v549_v53 }
  0xc5   : > { %1248 = vmatmul.mubr.msk.bf16.vlgmr.msra.gmra.mrb[0].mxu1 %vm568_vm5, %v550_v54 }
  0xc8   : > { %v552_v55 = vld [vmem:[#allocation2 + $0x38] sm:$0xff] }
  0xcb   : > { %v551_v56 = vld [vmem:[#allocation2 + $0x30] sm:$0xff] }
  0xcc   : > { %1251 = vmatprep.mubr.msk.bf16.mxu1 %vm568_vm5, %v551_v56 }
  0xcd   : > { %1252 = vmatmul.mubr.msk.bf16.gmra.mrb[4].mxu1 %vm568_vm5, %v552_v55 }
 0x188   : > { %v1589_v57 = vpop.f32.mrb[0].mxu0 }
 0x189   : > { %v1172_v9 = vpack.c.bf16 %v1589_v57, %v1589_v57  ;;  %v1593_v58 = vpop.f32.mrb[1].mxu0  ;;  %v782_v3 = vsel %vm778_vm7, %v1589_v57, 0.0 }
 0x18a   : > { %v1170_v59 = vpack.c.bf16 %v1593_v58, %v1593_v58  ;;  %v1597_v60 = vpop.f32.mrb[2].mxu0  ;;  %v779_v63 = vsel %vm778_vm7, %v1593_v58, 0.0 }
 0x18b   : > { %764 = vst.msk [vmem:[%s1600_s17 + $0x8] sm:$0xf] %vm761_vm6, %v1172_v9  ;;  %v1173_v61 = vpack.c.bf16 %v1597_v60, %v1597_v60  ;;  %v1606_v62 = vpop.f32.mrb[3].mxu0  ;;  %v784_v5 = vsel %vm778_vm7, %v1597_v60, 0.0 }
 0x18c   : > { %762 = vst.msk [vmem:[%s1600_s17] sm:$0xf] %vm761_vm6, %v1170_v59  ;;  %v1171_v0 = vpack.c.bf16 %v1606_v62, %v1606_v62  ;;  %v780_v1 = vsel %vm778_vm7, %v1606_v62, 0.0 }
 0x18d   : > { %765 = vst.msk [vmem:[%s1600_s17 + $0xc] sm:$0xf] %vm761_vm6, %v1173_v61  ;;  %v781_v2 = vadd.f32 %v780_v1, %v779_v63 }
 0x18e   : > { %763 = vst.msk [vmem:[%s1600_s17 + $0x4] sm:$0xf] %vm761_vm6, %v1171_v0 }
 0x18f   : > { %v783_v4 = vadd.f32 %v782_v3, %v781_v2 }
 0x190   : > { %v1624_v6 = vpop.f32.mrb[4].mxu0 }
 0x191   : > { %v1176_v7 = vpack.c.bf16 %v1624_v6, %v1624_v6  ;;  %v1628_v10 = vpop.f32.mrb[5].mxu0  ;;  %v785_v11 = vadd.f32 %v784_v5, %v783_v4  ;;  %v790_v22 = vsel %vm778_vm7, %v1624_v6, 0.0 }
 0x192   : > { %v1174_v12 = vpack.c.bf16 %v1628_v10, %v1628_v10  ;;  %v786_v13 = vsel %vm778_vm7, %v1628_v10, 0.0  ;;  %v1634_v14 = vpop.f32.mrb[6].mxu0 }
 0x193   : > { %768 = vst.msk [vmem:[%s1600_s17 + $0x18] sm:$0xf] %vm761_vm6, %v1176_v7  ;;  %v787_v15 = vadd.f32 %v786_v13, %v785_v11  ;;  %v1177_v16 = vpack.c.bf16 %v1634_v14, %v1634_v14  ;;  %v1640_v17 = vpop.f32.mrb[7].mxu0  ;;  %v792_v24 = vsel %vm778_vm7, %v1634_v14, 0.0 }
 0x194   : > { %766 = vst.msk [vmem:[%s1600_s17 + $0x10] sm:$0xf] %vm761_vm6, %v1174_v12  ;;  %v1175_v19 = vpack.c.bf16 %v1640_v17, %v1640_v17  ;;  %v788_v20 = vsel %vm778_vm7, %v1640_v17, 0.0 }
 0x195   : > { %769 = vst.msk [vmem:[%s1600_s17 + $0x1c] sm:$0xf] %vm761_vm6, %v1177_v16  ;;  %v789_v21 = vadd.f32 %v788_v20, %v787_v15 }
 0x196   : > { %767 = vst.msk [vmem:[%s1600_s17 + $0x14] sm:$0xf] %vm761_vm6, %v1175_v19 }
 0x197   : > { %v791_v23 = vadd.f32 %v790_v22, %v789_v21 }
 0x198   : > { %v1249_v25 = vpop.f32.mrb[0].mxu1 }
 0x199   : > { %v1180_v26 = vpack.c.bf16 %v1249_v25, %v1249_v25  ;;  %v666_v27 = vpop.f32.mrb[1].mxu1  ;;  %v793_v28 = vadd.f32 %v792_v24, %v791_v23  ;;  %v798_v36 = vsel %vm778_vm7, %v1249_v25, 0.0 }
 0x19a   : > { %v1178_v29 = vpack.c.bf16 %v666_v27, %v666_v27  ;;  %v794_v30 = vsel %vm778_vm7, %v666_v27, 0.0  ;;  %v1250_v31 = vpop.f32.mrb[2].mxu1 }
 0x19b   : > { %772 = vst.msk [vmem:[%s1600_s17 + $0x28] sm:$0xf] %vm761_vm6, %v1180_v26  ;;  %v795_v32 = vadd.f32 %v794_v30, %v793_v28  ;;  %v1181_v8 = vpack.c.bf16 %v1250_v31, %v1250_v31  ;;  %v669_v33 = vpop.f32.mrb[3].mxu1  ;;  %v800_v38 = vsel %vm778_vm7, %v1250_v31, 0.0 }
 0x19c   : > { %770 = vst.msk [vmem:[%s1600_s17 + $0x20] sm:$0xf] %vm761_vm6, %v1178_v29  ;;  %v1179_v34 = vpack.c.bf16 %v669_v33, %v669_v33  ;;  %v796_v18 = vsel %vm778_vm7, %v669_v33, 0.0 }
 0x19d   : > { %773 = vst.msk [vmem:[%s1600_s17 + $0x2c] sm:$0xf] %vm761_vm6, %v1181_v8  ;;  %v797_v35 = vadd.f32 %v796_v18, %v795_v32 }
 0x19e   : > { %771 = vst.msk [vmem:[%s1600_s17 + $0x24] sm:$0xf] %vm761_vm6, %v1179_v34 }
 0x19f   : > { %v799_v37 = vadd.f32 %v798_v36, %v797_v35 }
 0x1a0   : > { %v1253_v39 = vpop.f32.mrb[4].mxu1 }
 0x1a1   : > { %v1184_v40 = vpack.c.bf16 %v1253_v39, %v1253_v39  ;;  %v682_v41 = vpop.f32.mrb[5].mxu1  ;;  %v801_v42 = vadd.f32 %v800_v38, %v799_v37  ;;  %v806_v52 = vsel %vm778_vm7, %v1253_v39, 0.0 }
 0x1a2   : > { %v1182_v43 = vpack.c.bf16 %v682_v41, %v682_v41  ;;  %v802_v44 = vsel %vm778_vm7, %v682_v41, 0.0  ;;  %v1254_v45 = vpop.f32.mrb[6].mxu1 }
 0x1a3   : > { %776 = vst.msk [vmem:[%s1600_s17 + $0x38] sm:$0xf] %vm761_vm6, %v1184_v40  ;;  %v803_v46 = vadd.f32 %v802_v44, %v801_v42  ;;  %v1185_v47 = vpack.c.bf16 %v1254_v45, %v1254_v45  ;;  %v685_v48 = vpop.f32.mrb[7].mxu1  ;;  %v808_v54 = vsel %vm778_vm7, %v1254_v45, 0.0 }
 0x1a4   : > { %774 = vst.msk [vmem:[%s1600_s17 + $0x30] sm:$0xf] %vm761_vm6, %v1182_v43  ;;  %v1183_v49 = vpack.c.bf16 %v685_v48, %v685_v48  ;;  %v804_v50 = vsel %vm778_vm7, %v685_v48, 0.0 }
 0x1a5   : > { %777 = vst.msk [vmem:[%s1600_s17 + $0x3c] sm:$0xf] %vm761_vm6, %v1185_v47  ;;  %v805_v51 = vadd.f32 %v804_v50, %v803_v46 }
 0x1a6   : > { %775 = vst.msk [vmem:[%s1600_s17 + $0x34] sm:$0xf] %vm761_vm6, %v1183_v49 }
 0x1a7   : > { %v807_v53 = vadd.f32 %v806_v52, %v805_v51 }
 0x1a9   : > { %v809_v55 = vadd.f32 %v808_v54, %v807_v53 }
 0x1ab   : > { %v810_v56 = vrot.slane %v809_v55, 4 }
 0x1ad   : > { %v811_v9 = vadd.f32 %v810_v56, %v809_v55 }
 0x1af   : > { %v812_v59 = vrot.slane %v811_v9, 2 }
 0x1b1   : > { %v813_v61 = vadd.f32 %v812_v59, %v811_v9 }
 0x1b3   : > { %v814_v63 = vrot.slane %v813_v61, 1 }
 0x1b5   : > { %v1680_v0 = vadd.f32 %v814_v63, %v813_v61 }
 0x1b7   : > { %v817_v1 = vmul.f32 0.0078125, %v1680_v0 }
 0x1b9   : > { %v818_v2 = vsub.f32 %v1593_v58, %v817_v1  ;;  %v819_v3 = vsub.f32 %v1606_v62, %v817_v1  ;;  %v820_v4 = vsub.f32 %v1589_v57, %v817_v1  ;;  %v821_v5 = vsub.f32 %v1597_v60, %v817_v1 }
 0x1ba   : > { %v822_v7 = vsub.f32 %v1628_v10, %v817_v1  ;;  %v823_v11 = vsub.f32 %v1640_v17, %v817_v1  ;;  %v824_v12 = vsub.f32 %v1624_v6, %v817_v1  ;;  %v825_v13 = vsub.f32 %v1634_v14, %v817_v1 }
 0x1bb   : > { %v826_v15 = vsub.f32 %v666_v27, %v817_v1  ;;  %v827_v16 = vsub.f32 %v669_v33, %v817_v1  ;;  %v828_v19 = vsub.f32 %v1249_v25, %v817_v1  ;;  %v829_v20 = vsub.f32 %v1250_v31, %v817_v1 }
 0x1bc   : > { %v830_v21 = vsub.f32 %v682_v41, %v817_v1  ;;  %v831_v58 = vsub.f32 %v685_v48, %v817_v1  ;;  %v832_v22 = vsub.f32 %v1253_v39, %v817_v1  ;;  %v833_v62 = vsub.f32 %v1254_v45, %v817_v1 }
 0x1bd   : > { %v834_v23 = vmul.f32 %v818_v2, %v818_v2  ;;  %v835_v57 = vmul.f32 %v819_v3, %v819_v3  ;;  %v836_v24 = vmul.f32 %v820_v4, %v820_v4  ;;  %v843_v60 = vmul.f32 %v827_v16, %v827_v16  ;;  %v934_v16 = vld [vmem:[%s1600_s17 + $0x10] sm:$0xff] (%p1459_p6)  }
 0x1be   : > { %v844_v26 = vmul.f32 %v828_v19, %v828_v19  ;;  %v837_v10 = vmul.f32 %v821_v5, %v821_v5  ;;  %v845_v28 = vmul.f32 %v829_v20, %v829_v20  ;;  %v846_v17 = vmul.f32 %v830_v21, %v830_v21  ;;  %v942_v19 = vld [vmem:[%s1600_s17 + $0x20] sm:$0xff] (%p1459_p6)   ;;  %v946_v20 = vld [vmem:[%s1600_s17 + $0x28] sm:$0xff] (%p1459_p6)   ;;  %v950_v21 = vld [vmem:[%s1600_s17 + $0x30] sm:$0xff] (%p1459_p6)   ;;  %935 = vst [vmem:[%s910_s16 + $0x40] sm:$0xff] (%p1459_p6), %v934_v16  }
 0x1bf   : > { %v847_v29 = vmul.f32 %v831_v58, %v831_v58  ;;  %v848_v6 = vmul.f32 %v832_v22, %v832_v22  ;;  %v849_v30 = vmul.f32 %v833_v62, %v833_v62  ;;  %v850_v14 = vsel %vm778_vm7, %v834_v23, 0.0  ;;  %v954_v58 = vld [vmem:[%s1600_s17 + $0x38] sm:$0xff] (%p1459_p6)   ;;  %943 = vst [vmem:[%s910_s16 + $0x80] sm:$0xff] (%p1459_p6), %v942_v19   ;;  %947 = vst [vmem:[%s910_s16 + $0xa0] sm:$0xff] (%p1459_p6), %v946_v20  }
 0x1c0   : > { %v851_v25 = vsel %vm778_vm7, %v835_v57, 0.0  ;;  %v838_v31 = vmul.f32 %v822_v7, %v822_v7  ;;  %v853_v32 = vsel %vm778_vm7, %v836_v24, 0.0  ;;  %v867_v8 = vsel %vm778_vm7, %v843_v60, 0.0  ;;  %951 = vst [vmem:[%s910_s16 + $0xc0] sm:$0xff] (%p1459_p6), %v950_v21   ;;  %955 = vst [vmem:[%s910_s16 + $0xe0] sm:$0xff] (%p1459_p6), %v954_v58  }
 0x1c1   : > { %v852_v27 = vadd.f32 %v851_v25, %v850_v14  ;;  %v869_v33 = vsel %vm778_vm7, %v844_v26, 0.0  ;;  %v871_v18 = vsel %vm778_vm7, %v845_v28, 0.0  ;;  %v873_v35 = vsel %vm778_vm7, %v846_v17, 0.0 }
 0x1c2   : > { %v875_v36 = vsel %vm778_vm7, %v847_v29, 0.0  ;;  %v839_v37 = vmul.f32 %v823_v11, %v823_v11  ;;  %v855_v38 = vsel %vm778_vm7, %v837_v10, 0.0  ;;  %v877_v39 = vsel %vm778_vm7, %v848_v6, 0.0 }
 0x1c3   : > { %v854_v34 = vadd.f32 %v853_v32, %v852_v27  ;;  %v879_v40 = vsel %vm778_vm7, %v849_v30, 0.0  ;;  %v840_v42 = vmul.f32 %v824_v12, %v824_v12  ;;  %v857_v43 = vsel %vm778_vm7, %v838_v31, 0.0 }
 0x1c4   : > { %v841_v45 = vmul.f32 %v825_v13, %v825_v13  ;;  %v859_v46 = vsel %vm778_vm7, %v839_v37, 0.0  ;;  %v842_v48 = vmul.f32 %v826_v15, %v826_v15  ;;  %v926_v13 = vld [vmem:[%s1600_s17] sm:$0xff] (%p1459_p6)   ;;  %v930_v15 = vld [vmem:[%s1600_s17 + $0x8] sm:$0xff] (%p1459_p6)  }
 0x1c5   : > { %v856_v41 = vadd.f32 %v855_v38, %v854_v34  ;;  %v861_v49 = vsel %vm778_vm7, %v840_v42, 0.0  ;;  %927 = vst [vmem:[%s910_s16] sm:$0xff] (%p1459_p6), %v926_v13   ;;  %931 = vst [vmem:[%s910_s16 + $0x20] sm:$0xff] (%p1459_p6), %v930_v15  }
 0x1c6   : > { %v863_v51 = vsel %vm778_vm7, %v841_v45, 0.0  ;;  %v865_v53 = vsel %vm778_vm7, %v842_v48, 0.0 }
 0x1c7   : > { %v858_v44 = vadd.f32 %v857_v43, %v856_v41 }
 0x1c9   : > { %v860_v47 = vadd.f32 %v859_v46, %v858_v44 }
 0x1cb   : > { %v862_v50 = vadd.f32 %v861_v49, %v860_v47 }
 0x1cd   : > { %v864_v52 = vadd.f32 %v863_v51, %v862_v50 }
 0x1cf   : > { %v866_v54 = vadd.f32 %v865_v53, %v864_v52 }
 0x1d1   : > { %v868_v55 = vadd.f32 %v867_v8, %v866_v54 }
 0x1d3   : > { %v870_v56 = vadd.f32 %v869_v33, %v868_v55 }
 0x1d5   : > { %v872_v9 = vadd.f32 %v871_v18, %v870_v56 }
 0x1d7   : > { %v874_v59 = vadd.f32 %v873_v35, %v872_v9 }
 0x1d9   : > { %v876_v61 = vadd.f32 %v875_v36, %v874_v59 }
 0x1db   : > { %v878_v63 = vadd.f32 %v877_v39, %v876_v61 }
 0x1dd   : > { %v880_v1 = vadd.f32 %v879_v40, %v878_v63 }
 0x1df   : > { %v881_v2 = vrot.slane %v880_v1, 4 }
 0x1e1   : > { %v882_v3 = vadd.f32 %v881_v2, %v880_v1 }
 0x1e3   : > { %v883_v4 = vrot.slane %v882_v3, 2 }
 0x1e5   : > { %v884_v5 = vadd.f32 %v883_v4, %v882_v3 }
 0x1e6   : > { %905 = sbr.rel (!%p1459_p6) target bundleno = 493 (0x1ed), region = 81 }
 0x1e7   : > { %v885_v7 = vrot.slane %v884_v5, 1 }
 0x1e9   : > { %v886_v11 = vadd.f32 %v885_v7, %v884_v5 }
 0x1eb   : > { %v888_v12 = vsel %vm887_vm8, %v1680_v0, %v886_v11  ;;  %v938_v0 = vld [vmem:[%s1600_s17 + $0x18] sm:$0xff] (%p1459_p6)  }
 0x1ec   : > { %890 = vst.msk [vmem:[%s361_s10] sm:$0x3] %vm889_vm9, %v888_v12  ;;  %939 = vst [vmem:[%s910_s16 + $0x60] sm:$0xff] (%p1459_p6), %v938_v0  }
 0x1ed PF: > { %s16_s24 = sadd.s32 1, %s1375_s24   ;;  %s1758_s18 = smov %s1355_s19 }
 0x1ee   : > { %p13_p0 = scmp.ge.s32.totalorder %s16_s24, 10   ;;  %s1759_s19 = smov %s1467_s8 }
 0x1ef   : > { %s1760_s20 = smov %s1367_s22  ;;  %s1761_s21 = smov %s1371_s23 }
 0x1f0   : > { %s1762_s22 = smov %s1765_s25  ;;  %s1763_s23 = smov %s1769_s26 }
 0x1f1   :  { %15 = sbr.rel (!%p13_p0) target bundleno = 4 (0x4), region = 165 }

// kernel: basic_block_forward.5
= control target key start
LH: loop header
LB: loop body
LE: loop exit
PB: predicated region body
PF: predicated region fallthrough
CT: control target
= control target key end

     0   :  { %s2182_s12 = smov 0   ;;  %s3101_s0 = inlined_call_operand.vmem [shape: f32[16,8,8,4], index: 0, kind: input, shape index: {}]   ;;  %s3102_s1 = inlined_call_operand.vmem [shape: bf16[36,9], index: 1, kind: input, shape index: {}]   ;;  %s3103_s2 = inlined_call_operand.vmem [shape: bf16[1024,9], index: 2, kind: output, shape index: {0}]   ;;  %s3104_s3 = inlined_call_operand.vmem [shape: f32[8,2,9], index: 3, kind: output, shape index: {1}]  }
   0x1 LB: > { %s2188_s13 = sadd.s32 4294967295, %s2151_s12   ;;  %p1920_p0 = scmp.ge.s32.totalorder %s2151_s12, 1  ;;  %s2151_s12 = sphi %s2182_s12, %s14_s12  }
   0x2   : > { %p142_p1 = scmp.lt.s32.totalorder %s2151_s12, 9 }
   0x4   : > { %p143_p2 = pnand %p1920_p0, %p142_p1 }
   0x5   : > { %s1921_s14 = sshll.u32 (!%p143_p2), %s2188_s13, 1  ;;  %vm223_vm0 = vcmask (!%p143_p2), 24576   ;;  %vm234_vm1 = vsmask.f32 (!%p143_p2), 256  ;;  %v242_v1 = vld [vmem:[#allocation2 + $0x18] sm:$0x1] (!%p143_p2) }
   0x6   : > { %146 = sbr.rel (%p143_p2) target bundleno = 582 (0x246), region = 28  ;;  %p172_p3 = scmp.lt.s32.totalorder (!%p143_p2), %s1921_s14, 15  ;;  %vm2194_vm2 = vmand (!%p143_p2), %vm223_vm0, %vm234_vm1  ;;  %v245_v2 = vld [vmem:[#allocation2 + $0x20] sm:$0x1] (!%p143_p2)  ;;  %vm284_vm3 = vsmask.f32 (!%p143_p2), 7938 }
   0x7   : > { %v243_v3 = vsel (!%p143_p2), %vm2194_vm2, 0, %v242_v1  ;;  %v246_v4 = vsel (!%p143_p2), %vm2194_vm2, 0, %v245_v2  ;;  %v236_v5 = vld [vmem:[#allocation2 + $0x8] sm:$0x1] (!%p143_p2)  ;;  %vm2204_vm4 = vmand (!%p143_p2), %vm223_vm0, %vm284_vm3  ;;  %v239_v8 = vld [vmem:[#allocation2 + $0x10] sm:$0x1] (!%p143_p2) }
   0x8   : > { %244 = vst [vmem:[#allocation2 + $0x18] sm:$0x1] (!%p143_p2), %v243_v3  ;;  %247 = vst [vmem:[#allocation2 + $0x20] sm:$0x1] (!%p143_p2), %v246_v4  ;;  %v237_v7 = vsel (!%p143_p2), %vm2194_vm2, 0, %v236_v5  ;;  %v240_v10 = vsel (!%p143_p2), %vm2194_vm2, 0, %v239_v8 }
   0x9   : > { %v248_v9 = vld [vmem:[#allocation2 + $0x28] sm:$0x1] (!%p143_p2)  ;;  %238 = vst [vmem:[#allocation2 + $0x8] sm:$0x1] (!%p143_p2), %v237_v7  ;;  %v286_v12 = vld [vmem:[#allocation2 + $0xc] sm:$0x1] (!%p143_p2) }
   0xa   : > { %v249_v11 = vsel (!%p143_p2), %vm2194_vm2, 0, %v248_v9  ;;  %v289_v13 = vld [vmem:[#allocation2 + $0x14] sm:$0x1] (!%p143_p2)  ;;  %241 = vst [vmem:[#allocation2 + $0x10] sm:$0x1] (!%p143_p2), %v240_v10  ;;  %v287_v14 = vsel (!%p143_p2), %vm2204_vm4, 0, %v286_v12 }
   0xb   : > { %250 = vst [vmem:[#allocation2 + $0x28] sm:$0x1] (!%p143_p2), %v249_v11  ;;  %v290_v15 = vsel (!%p143_p2), %vm2204_vm4, 0, %v289_v13  ;;  %vm221_vm5 = vcmask (!%p143_p2), 27648   ;;  %288 = vst [vmem:[#allocation2 + $0xc] sm:$0x1] (!%p143_p2), %v287_v14 }
   0xc   : > { %291 = vst [vmem:[#allocation2 + $0x14] sm:$0x1] (!%p143_p2), %v290_v15  ;;  %v292_v16 = vld [vmem:[#allocation2 + $0x1c] sm:$0x1] (!%p143_p2)  ;;  %v295_v17 = vld [vmem:[#allocation2 + $0x24] sm:$0x1] (!%p143_p2)  ;;  %vm2245_vm8 = vmand (!%p143_p2), %vm221_vm5, %vm284_vm3 }
   0xd   : > { %s3116_s14 = smov (!%p172_p3, %s1921_s14), 15  ;;  %v2153_v21 = vmov 0   ;;  %v293_v22 = vsel %vm2204_vm4, 0, %v292_v16  ;;  %v296_v23 = vsel %vm2204_vm4, 0, %v295_v17  ;;  %v298_v29 = vld [vmem:[#allocation2 + $0x2c] sm:$0x1] }
   0xe   : > { %s2046_s15 = sshll.u32 %s3116_s14, 6  ;;  %222 = vst.msk [vmem:[#allocation2] sm:$0xf] %vm221_vm5, %v2153_v21  ;;  %225 = vst.msk [vmem:[#allocation2 + $0x50] sm:$0xf] %vm221_vm5, %v2153_v21  ;;  %v299_v32 = vsel %vm2204_vm4, 0, %v298_v29 }
   0xf   : > { %s2221_s18 = scalar_lea.vmem %s3101_s0, %s2046_s15  ;;  %224 = vst.msk [vmem:[#allocation2 + $0x4] sm:$0x1] %vm223_vm0, %v2153_v21  ;;  %226 = vst.msk [vmem:[#allocation2 + $0x54] sm:$0x1] %vm223_vm0, %v2153_v21  ;;  %vm1037_vm6 = vcmask 1042432   ;;  %vm1038_vm7 = vcmask 1046532  }
  0x10   : > { %v191_v18 = vld [vmem:[%s2221_s18 + $0x10] sm:$0xff]  ;;  %v192_v19 = vld [vmem:[%s2221_s18 + $0x18] sm:$0xff]  ;;  %v189_v20 = vld [vmem:[%s2221_s18] sm:$0xff]  ;;  %228 = vst.msk [vmem:[#allocation2 + $0x48] sm:$0xf] %vm221_vm5, %v2153_v21  ;;  %s2154_s19 = smov 12  }
  0x11   : > { %229 = vst.msk [vmem:[#allocation2 + $0x4c] sm:$0x1] %vm223_vm0, %v2153_v21  ;;  %231 = vst.msk [vmem:[#allocation2 + $0x9c] sm:$0x1] %vm223_vm0, %v2153_v21  ;;  %v2049_v24 = vpack.c.bf16 %v191_v18, %v191_v18  ;;  %v2050_v25 = vpack.c.bf16 %v192_v19, %v192_v19  ;;  %v190_v26 = vld [vmem:[%s2221_s18 + $0x8] sm:$0xff]  ;;  %v2047_v27 = vpack.c.bf16 %v189_v20, %v189_v20  ;;  %v193_v28 = vld [vmem:[%s2221_s18 + $0x20] sm:$0xff] }
  0x12   : > { %230 = vst.msk [vmem:[#allocation2 + $0x98] sm:$0xf] %vm221_vm5, %v2153_v21  ;;  %294 = vst [vmem:[#allocation2 + $0x1c] sm:$0x1] %v293_v22  ;;  %v2048_v30 = vpack.c.bf16 %v190_v26, %v190_v26  ;;  %v2051_v31 = vpack.c.bf16 %v193_v28, %v193_v28  ;;  %v194_v41 = vld [vmem:[%s2221_s18 + $0x28] sm:$0xff]  ;;  %v195_v52 = vld [vmem:[%s2221_s18 + $0x30] sm:$0xff] }
  0x13   : > { %297 = vst [vmem:[#allocation2 + $0x24] sm:$0x1] %v296_v23  ;;  %v399_v33 = vshrl.u32 %v2049_v24, 16  ;;  %v402_v34 = vshll.u32 %v2049_v24, 16  ;;  %v407_v35 = vshrl.u32 %v2050_v25, 16  ;;  %v410_v36 = vshll.u32 %v2050_v25, 16  ;;  %vm2292_vm9 = vmor %vm1037_vm6, %vm1038_vm7 }
  0x14   : > { %300 = vst [vmem:[#allocation2 + $0x2c] sm:$0x1] %v299_v32  ;;  %v383_v37 = vshrl.u32 %v2047_v27, 16  ;;  %v386_v38 = vshll.u32 %v2047_v27, 16  ;;  %v391_v39 = vshrl.u32 %v2048_v30, 16  ;;  %v394_v40 = vshll.u32 %v2048_v30, 16 }
  0x15   : > { %v401_v42 = vrot.slane %v399_v33, 7  ;;  %v409_v43 = vrot.slane %v407_v35, 7  ;;  %v556_v44 = vld [vmem:[#allocation2 + $0x18] sm:$0xf]  ;;  %v562_v45 = vld [vmem:[#allocation2 + $0x20] sm:$0xf]  ;;  %v2252_v59 = vpack.c.bf16 %v194_v41, %v194_v41  ;;  %v2269_v22 = vpack.c.bf16 %v195_v52, %v195_v52 }
  0x16   : > { %v385_v47 = vrot.slane %v383_v37, 7  ;;  %v393_v48 = vrot.slane %v391_v39, 7  ;;  %v544_v49 = vld [vmem:[#allocation2 + $0x8] sm:$0xf]  ;;  %v415_v50 = vshrl.u32 %v2051_v31, 16  ;;  %v418_v51 = vshll.u32 %v2051_v31, 16 }
  0x17   : > { %v404_v53 = vor.u32 %v402_v34, %v401_v42  ;;  %v412_v54 = vor.u32 %v410_v36, %v409_v43  ;;  %v550_v55 = vld [vmem:[#allocation2 + $0x10] sm:$0xf]  ;;  %v547_v56 = vld [vmem:[#allocation2 + $0xc] sm:$0x1]  ;;  %v2250_v57 = vld [vmem:[#allocation2] sm:$0xf] }
  0x18   : > { %v251_v58 = vld [vmem:[#allocation2 + $0x30] sm:$0x1]  ;;  %v388_v60 = vor.u32 %v386_v38, %v385_v47  ;;  %v396_v61 = vor.u32 %v394_v40, %v393_v48  ;;  %v417_v62 = vrot.slane %v415_v50, 7  ;;  %v568_v63 = vld [vmem:[#allocation2 + $0x28] sm:$0xf]  ;;  %v389_v1 = vrot.slane %v385_v47, 4 }
  0x19   : > { %v553_v2 = vld [vmem:[#allocation2 + $0x14] sm:$0x1]  ;;  %v557_v3 = vsel %vm2245_vm8, %v404_v53, %v556_v44  ;;  %v563_v4 = vsel %vm2245_vm8, %v412_v54, %v562_v45  ;;  %v397_v5 = vrot.slane %v393_v48, 4  ;;  %v2258_v7 = vld [vmem:[#allocation2 + $0x4] sm:$0x1]  ;;  %v1959_v8 = vrot.slane %v2250_v57, 9 }
  0x1a   : > { %v254_v9 = vld [vmem:[#allocation2 + $0x38] sm:$0x1]  ;;  %558 = vst [vmem:[#allocation2 + $0x18] sm:$0xf] %v557_v3  ;;  %564 = vst [vmem:[#allocation2 + $0x20] sm:$0xf] %v563_v4  ;;  %v545_v10 = vsel %vm2245_vm8, %v388_v60, %v544_v49  ;;  %v551_v11 = vsel %vm2245_vm8, %v396_v61, %v550_v55  ;;  %v420_v12 = vor.u32 %v418_v51, %v417_v62 }
  0x1b   : > { %v548_v13 = vsel %vm2194_vm2, %v389_v1, %v547_v56  ;;  %v559_v14 = vld [vmem:[#allocation2 + $0x1c] sm:$0x1]  ;;  %v565_v15 = vld [vmem:[#allocation2 + $0x24] sm:$0x1]  ;;  %v301_v16 = vld [vmem:[#allocation2 + $0x34] sm:$0x1]  ;;  %v554_v17 = vsel %vm2194_vm2, %v397_v5, %v553_v2 }
  0x1c   : > { %546 = vst [vmem:[#allocation2 + $0x8] sm:$0xf] %v545_v10  ;;  %552 = vst [vmem:[#allocation2 + $0x10] sm:$0xf] %v551_v11  ;;  %v405_v18 = vrot.slane %v401_v42, 4  ;;  %v413_v19 = vrot.slane %v409_v43, 4  ;;  %v569_v23 = vsel %vm2245_vm8, %v420_v12, %v568_v63 }
  0x1d   : > { %549 = vst [vmem:[#allocation2 + $0xc] sm:$0x1] %v548_v13  ;;  %v571_v20 = vld [vmem:[#allocation2 + $0x2c] sm:$0x1]  ;;  %v304_v21 = vld [vmem:[#allocation2 + $0x3c] sm:$0x1] }
  0x1e   : > { %555 = vst [vmem:[#allocation2 + $0x14] sm:$0x1] %v554_v17  ;;  %v421_v24 = vrot.slane %v417_v62, 4  ;;  %v252_v25 = vsel %vm2194_vm2, 0, %v251_v58  ;;  %v255_v26 = vsel %vm2194_vm2, 0, %v254_v9  ;;  %v1042_v27 = vrot.slane %v2258_v7, 5 }
  0x1f   : > { %570 = vst [vmem:[#allocation2 + $0x28] sm:$0xf] %v569_v23  ;;  %v560_v28 = vsel %vm2194_vm2, %v405_v18, %v559_v14  ;;  %v566_v29 = vsel %vm2194_vm2, %v413_v19, %v565_v15  ;;  %253 = vst [vmem:[#allocation2 + $0x30] sm:$0x1] %v252_v25  ;;  %v302_v30 = vsel %vm2204_vm4, 0, %v301_v16  ;;  %v305_v33 = vsel %vm2204_vm4, 0, %v304_v21 }
  0x20   : > { %256 = vst [vmem:[#allocation2 + $0x38] sm:$0x1] %v255_v26  ;;  %v257_v31 = vld [vmem:[#allocation2 + $0x40] sm:$0x1]  ;;  %561 = vst [vmem:[#allocation2 + $0x1c] sm:$0x1] %v560_v28  ;;  %v572_v32 = vsel %vm2194_vm2, %v421_v24, %v571_v20  ;;  %v1043_v53 = vsel %vm2292_vm9, %v1959_v8, %v1042_v27 }
  0x21   : > { %567 = vst [vmem:[#allocation2 + $0x24] sm:$0x1] %v566_v29  ;;  %303 = vst [vmem:[#allocation2 + $0x34] sm:$0x1] %v302_v30  ;;  %v423_v34 = vshrl.u32 %v2252_v59, 16  ;;  %v426_v35 = vshll.u32 %v2252_v59, 16 }
  0x22   : > { %573 = vst [vmem:[#allocation2 + $0x2c] sm:$0x1] %v572_v32  ;;  %306 = vst [vmem:[#allocation2 + $0x3c] sm:$0x1] %v305_v33  ;;  %v431_v37 = vshrl.u32 %v2269_v22, 16  ;;  %v434_v38 = vshll.u32 %v2269_v22, 16 }
  0x23   : > { %v741_v39 = vshrl.u32 %v2250_v57, 16  ;;  %v425_v40 = vrot.slane %v423_v34, 7  ;;  %v744_v41 = vshll.u32 %v2250_v57, 16  ;;  %v750_v42 = vshll.u32 %v2258_v7, 16  ;;  %v2303_v44 = vld [vmem:[#allocation2 + $0x18] sm:$0xf] }
  0x24   : > { %v258_v43 = vsel %vm2194_vm2, 0, %v257_v31  ;;  %v2305_v45 = vld [vmem:[#allocation2 + $0x20] sm:$0xf]  ;;  %v433_v47 = vrot.slane %v431_v37, 7  ;;  %v2311_v50 = vld [vmem:[#allocation2 + $0x8] sm:$0xf] }
  0x25   : > { %v2307_v48 = vrot.slane %v741_v39, 4  ;;  %259 = vst [vmem:[#allocation2 + $0x40] sm:$0x1] %v258_v43  ;;  %v1984_v49 = vcombine.low %v2303_v44, %v2305_v45  ;;  %v2313_v51 = vld [vmem:[#allocation2 + $0x10] sm:$0xf]  ;;  %v428_v54 = vor.u32 %v426_v35, %v425_v40  ;;  %v1960_v59 = vrot.slane %v2311_v50, 9 }
  0x26   : > { %v2315_v52 = vld [vmem:[#allocation2 + $0xc] sm:$0x1]  ;;  %v1983_v55 = vcombine.low %v2311_v50, %v2313_v51  ;;  %v2323_v56 = vcombine.low %v2313_v51, %v2303_v44  ;;  %v2325_v58 = vld [vmem:[#allocation2 + $0x14] sm:$0x1]  ;;  %v196_v61 = vld [vmem:[%s2221_s18 + $0x38] sm:$0xff]  ;;  %v1961_v63 = vrot.slane %v2313_v51, 9  ;;  %v436_v18 = vor.u32 %v434_v38, %v433_v47 }
  0x27   : > { %v1046_v60 = vrot.slane %v2315_v52, 5  ;;  %1175 = vrot.lane.b32.xlu1 %v1984_v49, %s2154_s19  ;;  %v2331_v62 = vld [vmem:[#allocation2 + $0x28] sm:$0xf]  ;;  %v1050_v1 = vrot.slane %v2325_v58, 5  ;;  %v1962_v2 = vrot.slane %v2303_v44, 9  ;;  %v1963_v3 = vrot.slane %v2305_v45, 9 }
  0x28   : > { %vm737_vm10 = vsmask.f32 3328  ;;  %vm738_vm11 = vsmask.f32 7440  ;;  %1173 = vrot.lane.b32.xlu0 %v1983_v55, %s2154_s19  ;;  %v2340_v4 = vcombine.low %v2305_v45, %v2331_v62  ;;  %v647_v8 = vld [vmem:[#allocation2 + $0x1c] sm:$0x1]  ;;  %v2350_v22 = vpack.c.bf16 %v196_v61, %v196_v61 }
  0x29   : > { %v1047_v5 = vsel %vm2292_vm9, %v1960_v59, %v1046_v60  ;;  %v649_v9 = vld [vmem:[#allocation2 + $0x24] sm:$0x1]  ;;  %v1964_v10 = vrot.slane %v2331_v62, 9  ;;  %v429_v11 = vrot.slane %v425_v40, 4  ;;  %v1051_v12 = vsel %vm2292_vm9, %v1961_v63, %v1050_v1  ;;  %v2347_v14 = vld [vmem:[#allocation2 + $0x2c] sm:$0x1]  ;;  %vm2392_vm12 = vmor %vm737_vm10, %vm738_vm11 }
  0x2a   : > { %v1054_v13 = vrot.slane %v647_v8, 5  ;;  %v1058_v15 = vrot.slane %v649_v9, 5  ;;  %v574_v16 = vld [vmem:[#allocation2 + $0x30] sm:$0xf]  ;;  %v1062_v17 = vrot.slane %v2347_v14, 5  ;;  %v437_v19 = vrot.slane %v433_v47, 4 }
  0x2b   : > { %v577_v20 = vld [vmem:[#allocation2 + $0x34] sm:$0x1]  ;;  %v580_v21 = vld [vmem:[#allocation2 + $0x38] sm:$0xf]  ;;  %s2155_s20 = smov 24   ;;  %v1975_v23 = vcombine.low %v1043_v53, %v1047_v5  ;;  %v575_v25 = vsel %vm2245_vm8, %v428_v54, %v574_v16  ;;  %v2001_v28 = vcombine.low %v1047_v5, %v1051_v12  ;;  %v783_v34 = vshrl.u32 %v2303_v44, 16 }
  0x2c   : > { %1338 = vrot.lane.b32.xlu1 %v2340_v4, %s2155_s20  ;;  %v2356_v24 = vsel %vm2292_vm9, %v1962_v2, %v1054_v13  ;;  %v578_v26 = vsel %vm2194_vm2, %v429_v11, %v577_v20  ;;  %v583_v27 = vld [vmem:[#allocation2 + $0x3c] sm:$0x1]  ;;  %1336 = vrot.lane.b32.xlu0 %v2323_v56, %s2155_s20  ;;  %v1059_v30 = vsel %vm2292_vm9, %v1963_v3, %v1058_v15  ;;  %v786_v35 = vshll.u32 %v2303_v44, 16  ;;  %s2156_s21 = smov 8   ;;  %s2157_s22 = smov 20  }
  0x2d   : > { %v1976_v29 = vcombine.low %v1051_v12, %v2356_v24  ;;  %576 = vst [vmem:[#allocation2 + $0x30] sm:$0xf] %v575_v25  ;;  %579 = vst [vmem:[#allocation2 + $0x34] sm:$0x1] %v578_v26  ;;  %v581_v31 = vsel %vm2245_vm8, %v436_v18, %v580_v21  ;;  %v2371_v32 = vsel %vm2292_vm9, %v1964_v10, %v1062_v17  ;;  %v792_v37 = vshll.u32 %v647_v8, 16  ;;  %s2158_s23 = smov 32  }
  0x2e   : > { %582 = vst [vmem:[#allocation2 + $0x38] sm:$0xf] %v581_v31  ;;  %v584_v33 = vsel %vm2194_vm2, %v437_v19, %v583_v27  ;;  %v797_v38 = vshrl.u32 %v2305_v45, 16  ;;  %v800_v39 = vshll.u32 %v2305_v45, 16  ;;  %v806_v40 = vshll.u32 %v649_v9, 16  ;;  %s2159_s26 = smov 16  }
  0x2f   : > { %585 = vst [vmem:[#allocation2 + $0x3c] sm:$0x1] %v584_v33  ;;  %v785_v43 = vrot.slane %v783_v34, 4  ;;  %v788_v47 = vrot.slane %v786_v35, 5  ;;  %v746_v49 = vrot.slane %v744_v41, 5  ;;  %v2384_v53 = vrot.slane %v750_v42, 5 }
  0x30   : > { %1128 = vrot.lane.b32.xlu1 %v1975_v23, %s2156_s21  ;;  %1297 = vrot.lane.b32.xlu0 %v2001_v28, %s2157_s22  ;;  %v794_v44 = vrot.slane %v792_v37, 5  ;;  %v799_v54 = vrot.slane %v797_v38, 4  ;;  %v802_v55 = vrot.slane %v800_v39, 5  ;;  %v808_v45 = vrot.slane %v806_v40, 5  ;;  %s2160_s27 = smov 4   ;;  %s2161_s30 = smov 28  }
  0x31   : > { %v789_v59 = vor.u32 %v788_v47, %v785_v43  ;;  %v747_v60 = vor.u32 %v746_v49, %v2307_v48  ;;  %v755_v61 = vshrl.u32 %v2311_v50, 16  ;;  %v758_v63 = vshll.u32 %v2311_v50, 16  ;;  %s1924_s6 = sshll.u32 %s2188_s13, 4  ;;  %p184_p5 = scmp.lt.s32.totalorder %s2188_s13, 7 }
  0x32   : > { %v803_v41 = vor.u32 %v802_v55, %v799_v54  ;;  %v764_v42 = vshll.u32 %v2315_v52, 16  ;;  %v811_v1 = vshrl.u32 %v2331_v62, 16  ;;  %v814_v2 = vshll.u32 %v2331_v62, 16  ;;  %p179_p4 = scmp.lt.s32.totalorder %s1924_s6, 127 }
  0x33   : > { %v1977_v48 = vcombine.low %v1059_v30, %v2371_v32  ;;  %v2002_v3 = vcombine.low %v2356_v24, %v1059_v30  ;;  %v790_v9 = vrot.slane %v789_v59, 4  ;;  %v748_v10 = vrot.slane %v747_v60, 4  ;;  %s3120_s13 = smov (!%p184_p5, %s2188_s13), 7 }
  0x34   : > { %1130 = vrot.lane.b32.xlu1 %v1976_v29, %s2156_s21  ;;  %v2402_v5 = vld [vmem:[#allocation2 + $0x30] sm:$0xf]  ;;  %v2404_v8 = vld [vmem:[#allocation2 + $0x34] sm:$0x1]  ;;  %1448 = vrot.lane.b32.xlu0 %v1976_v29, %s2158_s23  ;;  %v804_v13 = vrot.slane %v803_v41, 4  ;;  %v757_v15 = vrot.slane %v755_v61, 4 }
  0x35   : > { %v2407_v52 = vld [vmem:[#allocation2 + $0x38] sm:$0xf]  ;;  %v1965_v11 = vrot.slane %v2402_v5, 9  ;;  %v1066_v12 = vrot.slane %v2404_v8, 5  ;;  %v795_v18 = vsel %vm2392_vm12, %v790_v9, %v794_v44  ;;  %v753_v19 = vsel %vm2392_vm12, %v748_v10, %v2384_v53  ;;  %v307_v9 = vld [vmem:[#allocation2 + $0x44] sm:$0x1] }
  0x36   : > { %v2411_v16 = vld [vmem:[#allocation2 + $0x3c] sm:$0x1]  ;;  %v1966_v17 = vrot.slane %v2407_v52, 9  ;;  %v760_v20 = vrot.slane %v758_v63, 5  ;;  %v809_v24 = vsel %vm2392_vm12, %v804_v13, %v808_v45  ;;  %v766_v25 = vrot.slane %v764_v42, 5  ;;  %v197_v10 = vld [vmem:[%s2221_s18 + $0x40] sm:$0xff] }
  0x37   : > { %v2421_v21 = vsel %vm2292_vm9, %v1965_v11, %v1066_v12  ;;  %v1070_v23 = vrot.slane %v2411_v16, 5  ;;  %v1992_v26 = vcombine.low %v795_v18, %v809_v24  ;;  %v813_v28 = vrot.slane %v811_v1, 4  ;;  %v2142_v1 = vld [vmem:[%s3102_s1] sm:$0xff]   ;;  %s3118_s6 = smov (!%p179_p4, %s1924_s6), 127  ;;  %s1926_s11 = sshll.u32 %s3120_s13, 1 }
  0x38   : > { %1299 = vrot.lane.b32.xlu1 %v2002_v3, %s2157_s22  ;;  %v761_v27 = vor.u32 %v760_v20, %v757_v15  ;;  %v816_v29 = vrot.slane %v814_v2, 5  ;;  %1450 = vrot.lane.b32.xlu0 %v1977_v48, %s2158_s23  ;;  %v820_v31 = vshll.u32 %v2347_v14, 16  ;;  %v769_v33 = vshrl.u32 %v2313_v51, 16  ;;  %s1925_s7 = sshll.u32 %s3118_s6, 2  ;;  %s187_s16 = scalar_lea.vmem %s3104_s3, %s1926_s11 }
  0x39   : > { %v2430_v30 = vsel %vm2292_vm9, %v1966_v17, %v1070_v23  ;;  %v772_v34 = vshll.u32 %v2313_v51, 16  ;;  %v778_v39 = vshll.u32 %v2325_v58, 16  ;;  %v825_v49 = vshrl.u32 %v2402_v5, 16  ;;  %2090 = vmatprep.subr.bf16.mxu0 %v2142_v1  ;;  %v2143_v17 = vld [vmem:[%s3102_s1 + $0x8] sm:$0xff]   ;;  %2112 = vmatprep.subr.bf16.mxu1 %v2142_v1  ;;  %s2975_s10 = scalar_lea.vmem %s3103_s2, %s1925_s7 }
  0x3a   : > { %v2437_v35 = vcombine.low %v2421_v21, %v2430_v30  ;;  %v762_v37 = vrot.slane %v761_v27, 4  ;;  %v817_v38 = vor.u32 %v816_v29, %v813_v28  ;;  %v822_v40 = vrot.slane %v820_v31, 5  ;;  %2091 = vmatpush3.bf16.msra.mxu0 %v2142_v1  ;;  %v260_v28 = vld [vmem:[#allocation2 + $0x58] sm:$0x1]  ;;  %v310_v29 = vld [vmem:[#allocation2 + $0x5c] sm:$0x1]  ;;  %2115 = vmatpush3.bf16.msra.mxu1 %v2142_v1 }
  0x3b   : > { %v771_v43 = vrot.slane %v769_v33, 4  ;;  %v774_v47 = vrot.slane %v772_v34, 5  ;;  %v780_v53 = vrot.slane %v778_v39, 5  ;;  %v828_v44 = vshll.u32 %v2402_v5, 16  ;;  %2092 = vmatprep.subr.bf16.mxu0 %v2143_v17  ;;  %v586_v31 = vld [vmem:[#allocation2 + $0x40] sm:$0xf]  ;;  %2113 = vmatprep.subr.bf16.mxu1 %v2143_v17 }
  0x3c   : > { %1134 = vrot.lane.b32.xlu1 %v2437_v35, %s2156_s21  ;;  %v2445_v14 = vsel %vm2392_vm12, %v762_v37, %v766_v25  ;;  %v818_v51 = vrot.slane %v817_v38, 4  ;;  %1132 = vrot.lane.b32.xlu0 %v1977_v48, %s2156_s21  ;;  %v827_v55 = vrot.slane %v825_v49, 4  ;;  %v834_v45 = vshll.u32 %v2404_v8, 16  ;;  %v2476_v25 = vld [vmem:[#allocation2 + $0x4c] sm:$0x1]  ;;  %v199_v38 = vld [vmem:[%s2221_s18 + $0x50] sm:$0xff] }
  0x3d   : > { %v1951_v58 = vcombine.low %v753_v19, %v2445_v14  ;;  %v775_v54 = vor.u32 %v774_v47, %v771_v43  ;;  %v830_v60 = vrot.slane %v828_v44, 5  ;;  %v839_v61 = vshrl.u32 %v2407_v52, 16 }
  0x3e   : > { %v2453_v59 = vsel %vm2392_vm12, %v818_v51, %v822_v40  ;;  %v842_v63 = vshll.u32 %v2407_v52, 16  ;;  %v848_v42 = vshll.u32 %v2411_v16, 16  ;;  %v836_v12 = vrot.slane %v834_v45, 5  ;;  %v2469_v16 = vld [vmem:[#allocation2 + $0x48] sm:$0xf]  ;;  %2093 = vmatpush3.bf16.msra.mxu0 %v2143_v17  ;;  %2116 = vmatpush3.bf16.msra.mxu1 %v2143_v17 }
  0x3f   : > { %v776_v41 = vrot.slane %v775_v54, 4  ;;  %v1953_v2 = vcombine.low %v809_v24, %v2453_v59  ;;  %v831_v48 = vor.u32 %v830_v60, %v827_v55  ;;  %v841_v3 = vrot.slane %v839_v61, 4  ;;  %v201_v54 = vld [vmem:[%s2221_s18 + $0x60] sm:$0xff]  ;;  %v2510_v60 = vld [vmem:[#allocation2 + $0x50] sm:$0xf] }
  0x40   : > { %1246 = vrot.lane.b32.xlu1 %v1992_v26, %s2159_s26  ;;  %v844_v8 = vrot.slane %v842_v63, 5  ;;  %988 = vrot.lane.b32.xlu0 %v1951_v58, %s2160_s27  ;;  %v439_v13 = vshrl.u32 %v2350_v22, 16  ;;  %v442_v15 = vshll.u32 %v2350_v22, 16  ;;  %v850_v24 = vrot.slane %v848_v42, 5  ;;  %v198_v26 = vld [vmem:[%s2221_s18 + $0x48] sm:$0xff]  ;;  %v200_v58 = vld [vmem:[%s2221_s18 + $0x58] sm:$0xff] }
  0x41   : > { %v781_v11 = vsel %vm2392_vm12, %v776_v41, %v780_v53  ;;  %v832_v20 = vrot.slane %v831_v48, 4  ;;  %v308_v22 = vsel %vm2204_vm4, 0, %v307_v9  ;;  %v1370_v33 = vshrl.u32 %v2469_v16, 16  ;;  %v263_v61 = vld [vmem:[#allocation2 + $0x60] sm:$0x1] }
  0x42   : > { %v2474_v19 = vcombine.low %v781_v11, %v795_v18  ;;  %v845_v23 = vor.u32 %v844_v8, %v841_v3  ;;  %v2479_v27 = vrot.slane %v439_v13, 7  ;;  %309 = vst [vmem:[#allocation2 + $0x44] sm:$0x1] %v308_v22  ;;  %v1373_v34 = vshll.u32 %v2469_v16, 16  ;;  %v266_v3 = vld [vmem:[#allocation2 + $0x68] sm:$0x1] }
  0x43   : > { %v2055_v37 = vpack.c.bf16 %v197_v10, %v197_v10  ;;  %v1991_v39 = vcombine.low %v2445_v14, %v781_v11  ;;  %v2492_v40 = vsel %vm2392_vm12, %v832_v20, %v836_v12  ;;  %v2495_v47 = vpack.c.bf16 %v198_v26, %v198_v26  ;;  %v313_v20 = vld [vmem:[#allocation2 + $0x64] sm:$0x1] }
  0x44   : > { %1403 = vrot.lane.b32.xlu1 %v1953_v2, %s2161_s30  ;;  %v846_v18 = vrot.slane %v845_v23, 4  ;;  %990 = vrot.lane.b32.xlu0 %v2474_v19, %s2160_s27  ;;  %v444_v43 = vor.u32 %v442_v15, %v2479_v27  ;;  %v1372_v51 = vrot.slane %v1370_v33, 4  ;;  %v1375_v53 = vrot.slane %v1373_v34, 5 }
  0x45   : > { %v261_v44 = vsel %vm2194_vm2, 0, %v260_v28  ;;  %v1379_v55 = vshll.u32 %v2476_v25, 16  ;;  %v311_v45 = vsel %vm2204_vm4, 0, %v310_v29  ;;  %v2512_v63 = vpack.c.bf16 %v199_v38, %v199_v38 }
  0x46   : > { %v2499_v49 = vsel %vm2392_vm12, %v846_v18, %v850_v24  ;;  %v587_v14 = vsel %vm2245_vm8, %v444_v43, %v586_v31  ;;  %262 = vst [vmem:[#allocation2 + $0x58] sm:$0x1] %v261_v44  ;;  %v445_v42 = vrot.slane %v2479_v27, 4  ;;  %312 = vst [vmem:[#allocation2 + $0x5c] sm:$0x1] %v311_v45  ;;  %v447_v1 = vshrl.u32 %v2055_v37, 16 }
  0x47   : > { %v2517_v41 = vcombine.low %v2492_v40, %v2499_v49  ;;  %588 = vst [vmem:[#allocation2 + $0x40] sm:$0xf] %v587_v14  ;;  %v450_v48 = vshll.u32 %v2055_v37, 16  ;;  %v1985_v8 = vcombine.low %v2331_v62, %v2402_v5  ;;  %v2003_v9 = vcombine.low %v2371_v32, %v2421_v21  ;;  %v316_v62 = vld [vmem:[#allocation2 + $0x6c] sm:$0x1] }
  0x48   : > { %992 = vrot.lane.b32.xlu1 %v1953_v2, %s2160_s27  ;;  %1244 = vrot.lane.b32.xlu0 %v1991_v39, %s2159_s26  ;;  %v2525_v2 = vld [vmem:[#allocation2 + $0x54] sm:$0x1]  ;;  %v2527_v10 = vpack.c.bf16 %v200_v58, %v200_v58  ;;  %v2529_v11 = vpack.c.bf16 %v201_v54, %v201_v54  ;;  %v2533_v12 = vcombine.low %v2402_v5, %v2407_v52  ;;  %v449_v15 = vrot.slane %v447_v1, 7 }
  0x49   : > { %v1376_v13 = vor.u32 %v1375_v53, %v1372_v51  ;;  %v264_v17 = vsel %vm2194_vm2, 0, %v263_v61  ;;  %v589_v23 = vld [vmem:[#allocation2 + $0x44] sm:$0x1]  ;;  %v2537_v24 = vrot.slane %v1379_v55, 5  ;;  %v853_v26 = vshrl.u32 %v2510_v60, 16 }
  0x4a   : > { %v856_v27 = vshll.u32 %v2510_v60, 16  ;;  %265 = vst [vmem:[#allocation2 + $0x60] sm:$0x1] %v264_v17  ;;  %v267_v22 = vsel %vm2194_vm2, 0, %v266_v3  ;;  %v590_v5 = vsel %vm2194_vm2, %v445_v42, %v589_v23  ;;  %v452_v28 = vor.u32 %v450_v48, %v449_v15  ;;  %v269_v42 = vld [vmem:[#allocation2 + $0x70] sm:$0x1] }
  0x4b   : > { %v862_v29 = vshll.u32 %v2525_v2, 16  ;;  %v2013_v18 = vrot.slane %v2469_v16, 9  ;;  %268 = vst [vmem:[#allocation2 + $0x68] sm:$0x1] %v267_v22  ;;  %591 = vst [vmem:[#allocation2 + $0x44] sm:$0x1] %v590_v5  ;;  %v1993_v44 = vcombine.low %v2453_v59, %v2492_v40 }
  0x4c   : > { %994 = vrot.lane.b32.xlu1 %v2517_v41, %s2160_s27  ;;  %1401 = vrot.lane.b32.xlu0 %v2474_v19, %s2161_s30  ;;  %v453_v31 = vrot.slane %v449_v15, 4  ;;  %v314_v33 = vsel %vm2204_vm4, 0, %v313_v20  ;;  %v317_v34 = vsel %vm2204_vm4, 0, %v316_v62  ;;  %v455_v37 = vshrl.u32 %v2495_v47, 16 }
  0x4d   : > { %v2556_v38 = vrot.slane %v1376_v13, 4  ;;  %v592_v39 = vld [vmem:[#allocation2 + $0x58] sm:$0xf]  ;;  %v1438_v43 = vrot.slane %v2476_v25, 5  ;;  %315 = vst [vmem:[#allocation2 + $0x64] sm:$0x1] %v314_v33 }
  0x4e   : > { %318 = vst [vmem:[#allocation2 + $0x6c] sm:$0x1] %v317_v34  ;;  %v458_v51 = vshll.u32 %v2495_v47, 16  ;;  %v463_v19 = vshrl.u32 %v2512_v63, 16  ;;  %v2561_v53 = vld [vmem:[#allocation2 + $0x40] sm:$0xf]  ;;  %v593_v58 = vsel %vm2245_vm8, %v452_v28, %v592_v39 }
  0x4f   : > { %v595_v54 = vld [vmem:[#allocation2 + $0x5c] sm:$0x1]  ;;  %v855_v14 = vrot.slane %v853_v26, 4  ;;  %v457_v55 = vrot.slane %v455_v37, 7  ;;  %v1986_v25 = vcombine.low %v2407_v52, %v2561_v53  ;;  %v1207_v45 = vshrl.u32 %v2561_v53, 16 }
  0x50   : > { %v1210_v47 = vshll.u32 %v2561_v53, 16  ;;  %594 = vst [vmem:[#allocation2 + $0x58] sm:$0xf] %v593_v58  ;;  %v466_v61 = vshll.u32 %v2512_v63, 16  ;;  %1177 = vrot.lane.b32.xlu0 %v1985_v8, %s2154_s19  ;;  %v596_v59 = vsel %vm2194_vm2, %v453_v31, %v595_v54  ;;  %v858_v40 = vrot.slane %v856_v27, 5 }
  0x51   : > { %v2575_v1 = vrot.slane %v862_v29, 5  ;;  %v460_v48 = vor.u32 %v458_v51, %v457_v55  ;;  %1179 = vrot.lane.b32.xlu1 %v1986_v25, %s2154_s19  ;;  %v1209_v52 = vrot.slane %v1207_v45, 4  ;;  %597 = vst [vmem:[#allocation2 + $0x5c] sm:$0x1] %v596_v59  ;;  %v461_v13 = vrot.slane %v457_v55, 4 }
  0x52   : > { %v1212_v3 = vrot.slane %v1210_v47, 5  ;;  %v465_v15 = vrot.slane %v463_v19, 7  ;;  %v598_v17 = vld [vmem:[#allocation2 + $0x60] sm:$0xf]  ;;  %v1999_v63 = vrot.slane %v2561_v53, 9  ;;  %v270_v62 = vsel %vm2194_vm2, 0, %v269_v42 }
  0x53   : > { %v599_v8 = vsel %vm2245_vm8, %v460_v48, %v598_v17  ;;  %v604_v20 = vld [vmem:[#allocation2 + $0x68] sm:$0xf]  ;;  %v471_v23 = vshrl.u32 %v2527_v10, 16  ;;  %v657_v26 = vld [vmem:[#allocation2 + $0x44] sm:$0x1]  ;;  %v474_v28 = vshll.u32 %v2527_v10, 16  ;;  %v859_v34 = vor.u32 %v858_v40, %v855_v14 }
  0x54   : > { %v1213_v27 = vor.u32 %v1212_v3, %v1209_v52  ;;  %v468_v22 = vor.u32 %v466_v61, %v465_v15  ;;  %v469_v5 = vrot.slane %v465_v15, 4  ;;  %600 = vst [vmem:[#allocation2 + $0x60] sm:$0xf] %v599_v8  ;;  %271 = vst [vmem:[#allocation2 + $0x70] sm:$0x1] %v270_v62  ;;  %1248 = vrot.lane.b32.xlu0 %v1993_v44, %s2159_s26  ;;  %v1216_v31 = vshll.u32 %v657_v26, 16 }
  0x55   : > { %v319_v29 = vld [vmem:[#allocation2 + $0x74] sm:$0x1]  ;;  %v1281_v33 = vrot.slane %v657_v26, 5  ;;  %v2588_v37 = vsel %vm2292_vm9, %v2013_v18, %v1438_v43  ;;  %v601_v39 = vld [vmem:[#allocation2 + $0x64] sm:$0x1]  ;;  %v202_v44 = vld [vmem:[%s2221_s18 + $0x68] sm:$0xff]  ;;  %v1382_v18 = vsel %vm2392_vm12, %v2556_v38, %v2537_v24  ;;  %v1943_v8 = vcombine.low %v2250_v57, %v2311_v50 }
  0x56   : > { %v607_v51 = vld [vmem:[#allocation2 + $0x6c] sm:$0x1]  ;;  %v1214_v19 = vrot.slane %v1213_v27, 4  ;;  %v602_v58 = vsel %vm2194_vm2, %v461_v13, %v601_v39  ;;  %v605_v54 = vsel %vm2245_vm8, %v468_v22, %v604_v20  ;;  %v1218_v55 = vrot.slane %v1216_v31, 5  ;;  %v203_v22 = vld [vmem:[%s2221_s18 + $0x70] sm:$0xff] }
  0x57   : > { %v608_v10 = vsel %vm2194_vm2, %v469_v5, %v607_v51  ;;  %v2601_v43 = vld [vmem:[#allocation2 + $0x58] sm:$0xf]  ;;  %603 = vst [vmem:[#allocation2 + $0x64] sm:$0x1] %v602_v58  ;;  %606 = vst [vmem:[#allocation2 + $0x68] sm:$0xf] %v605_v54  ;;  %v2609_v45 = vsel %vm2292_vm9, %v1999_v63, %v1281_v33  ;;  %v2623_v48 = vpack.c.bf16 %v202_v44, %v202_v44 }
  0x58   : > { %609 = vst [vmem:[#allocation2 + $0x6c] sm:$0x1] %v608_v10  ;;  %v2603_v14 = vrot.slane %v471_v23, 7  ;;  %v320_v25 = vsel %vm2204_vm4, 0, %v319_v29  ;;  %v867_v47 = vshrl.u32 %v2601_v43, 16  ;;  %v870_v61 = vshll.u32 %v2601_v43, 16  ;;  %1301 = vrot.lane.b32.xlu0 %v2003_v9, %s2157_s22 }
  0x59   : > { %v1967_v24 = vrot.slane %v2510_v60, 9  ;;  %321 = vst [vmem:[#allocation2 + $0x74] sm:$0x1] %v320_v25  ;;  %v1219_v38 = vsel %vm2392_vm12, %v1214_v19, %v1218_v55  ;;  %v663_v42 = vld [vmem:[#allocation2 + $0x5c] sm:$0x1]  ;;  %v2620_v59 = vrot.slane %v859_v34, 4  ;;  %v2004_v17 = vcombine.low %v2430_v30, %v2609_v45 }
  0x5a   : > { %v476_v40 = vor.u32 %v474_v28, %v2603_v14  ;;  %v1994_v52 = vcombine.low %v2499_v49, %v1219_v38  ;;  %v869_v3 = vrot.slane %v867_v47, 4  ;;  %v872_v13 = vrot.slane %v870_v61, 5  ;;  %v204_v5 = vld [vmem:[%s2221_s18 + $0x78] sm:$0xff] }
  0x5b   : > { %v1074_v15 = vrot.slane %v2525_v2, 5  ;;  %v876_v63 = vshll.u32 %v663_v42, 16  ;;  %v2629_v32 = vld [vmem:[#allocation2 + $0x60] sm:$0xf]  ;;  %v1968_v21 = vrot.slane %v2601_v43, 9  ;;  %v1078_v62 = vrot.slane %v663_v42, 5 }
  0x5c   : > { %v610_v9 = vld [vmem:[#allocation2 + $0x70] sm:$0xf]  ;;  %1250 = vrot.lane.b32.xlu1 %v1994_v52, %s2159_s26  ;;  %v873_v49 = vor.u32 %v872_v13, %v869_v3  ;;  %v881_v20 = vshrl.u32 %v2629_v32, 16  ;;  %v884_v2 = vshll.u32 %v2629_v32, 16  ;;  %1340 = vrot.lane.b32.xlu0 %v2533_v12, %s2155_s20  ;;  %v2009_v30 = vcombine.low %v2561_v53, %v2469_v16  ;;  %v272_v61 = vld [vmem:[#allocation2 + $0x78] sm:$0x1] }
  0x5d   : > { %v878_v23 = vrot.slane %v876_v63, 5  ;;  %v611_v26 = vsel %vm2245_vm8, %v476_v40, %v610_v9  ;;  %v477_v27 = vrot.slane %v2603_v14, 4  ;;  %v865_v28 = vsel %vm2392_vm12, %v2620_v59, %v2575_v1  ;;  %v322_v42 = vld [vmem:[#allocation2 + $0x7c] sm:$0x1]  ;;  %v275_v3 = vld [vmem:[#allocation2 + $0x80] sm:$0x1] }
  0x5e   : > { %v874_v29 = vrot.slane %v873_v49, 4  ;;  %v665_v31 = vld [vmem:[#allocation2 + $0x64] sm:$0x1]  ;;  %v2650_v33 = vld [vmem:[#allocation2 + $0x68] sm:$0xf]  ;;  %v883_v34 = vrot.slane %v881_v20, 4  ;;  %v2654_v16 = vsel %vm2292_vm9, %v1967_v24, %v1074_v15  ;;  %v2011_v1 = vcombine.low %v1219_v38, %v1382_v18 }
  0x5f   : > { %612 = vst [vmem:[#allocation2 + $0x70] sm:$0xf] %v611_v26  ;;  %v2656_v53 = vld [vmem:[#allocation2 + $0x6c] sm:$0x1]  ;;  %v886_v39 = vrot.slane %v884_v2, 5  ;;  %v890_v51 = vshll.u32 %v665_v31, 16  ;;  %v2015_v54 = vcombine.low %v2609_v45, %v2588_v37  ;;  %v2665_v10 = vsel %vm2292_vm9, %v1968_v21, %v1078_v62 }
  0x60   : > { %v895_v19 = vshrl.u32 %v2650_v33, 16  ;;  %v898_v58 = vshll.u32 %v2650_v33, 16  ;;  %1303 = vrot.lane.b32.xlu1 %v2004_v17, %s2157_s22  ;;  %v613_v44 = vld [vmem:[#allocation2 + $0x74] sm:$0x1]  ;;  %v2667_v55 = vpack.c.bf16 %v203_v22, %v203_v22  ;;  %1405 = vrot.lane.b32.xlu0 %v2517_v41, %s2161_s30  ;;  %v904_v47 = vshll.u32 %v2656_v53, 16 }
  0x61   : > { %v887_v14 = vor.u32 %v886_v39, %v883_v34  ;;  %v2672_v24 = vpack.c.bf16 %v204_v5, %v204_v5  ;;  %v1969_v37 = vrot.slane %v2629_v32, 9  ;;  %v1082_v45 = vrot.slane %v665_v31, 5  ;;  %v278_v13 = vld [vmem:[#allocation2 + $0x88] sm:$0x1]  ;;  %v325_v9 = vld [vmem:[#allocation2 + $0x84] sm:$0x1] }
  0x62   : > { %v897_v25 = vrot.slane %v895_v19, 4  ;;  %v900_v18 = vrot.slane %v898_v58, 5  ;;  %v1987_v38 = vcombine.low %v2601_v43, %v2629_v32  ;;  %v2679_v59 = vsel %vm2392_vm12, %v874_v29, %v878_v23  ;;  %v328_v31 = vld [vmem:[#allocation2 + $0x8c] sm:$0x1]  ;;  %v281_v39 = vld [vmem:[#allocation2 + $0x90] sm:$0x1] }
  0x63   : > { %v892_v41 = vrot.slane %v890_v51, 5  ;;  %v1979_v40 = vcombine.low %v2654_v16, %v2665_v10  ;;  %v614_v52 = vsel %vm2194_vm2, %v477_v27, %v613_v44  ;;  %v888_v15 = vrot.slane %v887_v14, 4 }
  0x64   : > { %1342 = vrot.lane.b32.xlu1 %v2009_v30, %s2155_s20  ;;  %v901_v17 = vor.u32 %v900_v18, %v897_v25  ;;  %615 = vst [vmem:[#allocation2 + $0x74] sm:$0x1] %v614_v52  ;;  %v273_v63 = vsel %vm2194_vm2, 0, %v272_v61  ;;  %v479_v21 = vshrl.u32 %v2529_v11, 16  ;;  %1452 = vrot.lane.b32.xlu0 %v2437_v35, %s2158_s23  ;;  %v906_v49 = vrot.slane %v904_v47, 5 }
  0x65   : > { %v1970_v20 = vrot.slane %v2650_v33, 9  ;;  %274 = vst [vmem:[#allocation2 + $0x78] sm:$0x1] %v273_v63  ;;  %v482_v62 = vshll.u32 %v2529_v11, 16  ;;  %v323_v30 = vsel %vm2204_vm4, 0, %v322_v42  ;;  %v1955_v23 = vcombine.low %v865_v28, %v2679_v59 }
  0x66   : > { %v2692_v2 = vld [vmem:[#allocation2 + $0x70] sm:$0xf]  ;;  %v902_v26 = vrot.slane %v901_v17, 4  ;;  %v2700_v27 = vsel %vm2292_vm9, %v1969_v37, %v1082_v45  ;;  %324 = vst [vmem:[#allocation2 + $0x7c] sm:$0x1] %v323_v30  ;;  %v1086_v22 = vrot.slane %v2656_v53, 5  ;;  %v2710_v28 = vsel %vm2392_vm12, %v888_v15, %v892_v41 }
  0x67   : > { %v909_v35 = vshrl.u32 %v2692_v2, 16  ;;  %v912_v5 = vshll.u32 %v2692_v2, 16  ;;  %v481_v29 = vrot.slane %v479_v21, 7  ;;  %v276_v11 = vsel %vm2194_vm2, 0, %v275_v3 }
  0x68   : > { %1407 = vrot.lane.b32.xlu1 %v2011_v1, %s2161_s30  ;;  %277 = vst [vmem:[#allocation2 + $0x80] sm:$0x1] %v276_v11  ;;  %v279_v16 = vsel %vm2194_vm2, 0, %v278_v13  ;;  %v326_v53 = vsel %vm2204_vm4, 0, %v325_v9  ;;  %1454 = vrot.lane.b32.xlu0 %v2015_v54, %s2158_s23  ;;  %v2719_v51 = vsel %vm2392_vm12, %v902_v26, %v906_v49  ;;  %v329_v44 = vsel %vm2204_vm4, 0, %v328_v31 }
  0x69   : > { %v911_v34 = vrot.slane %v909_v35, 4  ;;  %v914_v19 = vrot.slane %v912_v5, 5  ;;  %v484_v58 = vor.u32 %v482_v62, %v481_v29  ;;  %v485_v1 = vrot.slane %v481_v29, 4  ;;  %280 = vst [vmem:[#allocation2 + $0x88] sm:$0x1] %v279_v16 }
  0x6a   : > { %327 = vst [vmem:[#allocation2 + $0x84] sm:$0x1] %v326_v53  ;;  %v487_v14 = vshrl.u32 %v2623_v48, 16  ;;  %v490_v25 = vshll.u32 %v2623_v48, 16  ;;  %v495_v47 = vshrl.u32 %v2667_v55, 16  ;;  %v2728_v54 = vsel %vm2292_vm9, %v1970_v20, %v1086_v22 }
  0x6b   : > { %v2730_v61 = vld [vmem:[#allocation2 + $0x74] sm:$0x1]  ;;  %330 = vst [vmem:[#allocation2 + $0x8c] sm:$0x1] %v329_v44  ;;  %v498_v18 = vshll.u32 %v2667_v55, 16  ;;  %v282_v37 = vsel %vm2194_vm2, 0, %v281_v39  ;;  %v2739_v48 = vcombine.low %v2710_v28, %v2719_v51  ;;  %v915_v42 = vor.u32 %v914_v19, %v911_v34 }
  0x6c   : > { %v503_v45 = vshrl.u32 %v2672_v24, 16  ;;  %996 = vrot.lane.b32.xlu1 %v1955_v23, %s2160_s27  ;;  %v616_v41 = vld [vmem:[#allocation2 + $0x78] sm:$0xf]  ;;  %v489_v52 = vrot.slane %v487_v14, 7  ;;  %v497_v3 = vrot.slane %v495_v47, 7  ;;  %1136 = vrot.lane.b32.xlu0 %v1979_v40, %s2156_s21  ;;  %v918_v55 = vshll.u32 %v2730_v61, 16 }
  0x6d   : > { %283 = vst [vmem:[#allocation2 + $0x90] sm:$0x1] %v282_v37  ;;  %v331_v13 = vld [vmem:[#allocation2 + $0x94] sm:$0x1]  ;;  %v617_v15 = vsel %vm2245_vm8, %v484_v58, %v616_v41  ;;  %v619_v17 = vld [vmem:[#allocation2 + $0x7c] sm:$0x1]  ;;  %v1947_v20 = vcombine.low %v2510_v60, %v2601_v43  ;;  %v2754_v40 = vcombine.low %v2700_v27, %v2728_v54  ;;  %v1948_v34 = vcombine.low %v2629_v32, %v2650_v33 }
  0x6e   : > { %v2745_v63 = vrot.slane %v503_v45, 7  ;;  %v506_v21 = vshll.u32 %v2672_v24, 16  ;;  %618 = vst [vmem:[#allocation2 + $0x78] sm:$0xf] %v617_v15  ;;  %v620_v9 = vsel %vm2194_vm2, %v485_v1, %v619_v17  ;;  %v492_v49 = vor.u32 %v490_v25, %v489_v52 }
  0x6f   : > { %621 = vst [vmem:[#allocation2 + $0x7c] sm:$0x1] %v620_v9  ;;  %v493_v62 = vrot.slane %v489_v52, 4  ;;  %v500_v30 = vor.u32 %v498_v18, %v497_v3  ;;  %v501_v23 = vrot.slane %v497_v3, 4  ;;  %v622_v26 = vld [vmem:[#allocation2 + $0x80] sm:$0xf]  ;;  %v1995_v24 = vcombine.low %v2679_v59, %v2710_v28 }
  0x70   : > { %998 = vrot.lane.b32.xlu1 %v2739_v48, %s2160_s27  ;;  %v623_v35 = vsel %vm2245_vm8, %v492_v49, %v622_v26  ;;  %v628_v60 = vld [vmem:[#allocation2 + $0x88] sm:$0xf]  ;;  %v508_v5 = vor.u32 %v506_v21, %v2745_v63  ;;  %v332_v29 = vsel %vm2204_vm4, 0, %v331_v13  ;;  %1181 = vrot.lane.b32.xlu0 %v1987_v38, %s2154_s19  ;;  %v916_v11 = vrot.slane %v915_v42, 4 }
  0x71   : > { %v625_v22 = vld [vmem:[#allocation2 + $0x84] sm:$0x1]  ;;  %v920_v31 = vrot.slane %v918_v55, 5  ;;  %624 = vst [vmem:[#allocation2 + $0x80] sm:$0xf] %v623_v35  ;;  %v629_v28 = vsel %vm2245_vm8, %v500_v30, %v628_v60  ;;  %vm728_vm13 = vcmask 31744   ;;  %v1988_v16 = vcombine.low %v2650_v33, %v2692_v2 }
  0x72   : > { %v626_v59 = vsel %vm2194_vm2, %v493_v62, %v625_v22  ;;  %333 = vst [vmem:[#allocation2 + $0x94] sm:$0x1] %v332_v29  ;;  %630 = vst [vmem:[#allocation2 + $0x88] sm:$0xf] %v629_v28  ;;  %v631_v6 = vld [vmem:[#allocation2 + $0x8c] sm:$0x1]  ;;  %v2005_v57 = vcombine.low %v2665_v10, %v2700_v27 }
  0x73   : > { %627 = vst [vmem:[#allocation2 + $0x84] sm:$0x1] %v626_v59  ;;  %v632_v43 = vsel %vm2194_vm2, %v501_v23, %v631_v6  ;;  %729 = vst.msk [vmem:[#allocation3] sm:$0xff] %vm728_vm13, %v1943_v8  ;;  %v921_v46 = vsel %vm2392_vm12, %v916_v11, %v920_v31  ;;  %v1971_v50 = vrot.slane %v2692_v2, 9  ;;  %vm1534_vm14 = vcmask 1041408  }
  0x74   : > { %v634_v38 = vld [vmem:[#allocation2 + $0x90] sm:$0xf]  ;;  %1138 = vrot.lane.b32.xlu1 %v2754_v40, %s2156_s21  ;;  %633 = vst [vmem:[#allocation2 + $0x8c] sm:$0x1] %v632_v43  ;;  %730 = vst.msk [vmem:[#allocation3 + $0x8] sm:$0xff] %vm728_vm13, %v2323_v56  ;;  %1252 = vrot.lane.b32.xlu0 %v1995_v24, %s2159_s26  ;;  %v1090_v56 = vrot.slane %v2730_v61, 5  ;;  %v1996_v39 = vcombine.low %v2719_v51, %v921_v46 }
  0x75   : > { %v635_v53 = vsel %vm2245_vm8, %v508_v5, %v634_v38  ;;  %731 = vst.msk [vmem:[#allocation3 + $0x10] sm:$0xff] %vm728_vm13, %v2340_v4  ;;  %732 = vst.msk [vmem:[#allocation3 + $0x18] sm:$0xff] %vm728_vm13, %v2533_v12  ;;  %v2802_v4 = vld [vmem:[#allocation2 + $0x78] sm:$0xf]  ;;  %v509_v51 = vrot.slane %v2745_v63, 4  ;;  %vm1012_vm15 = vcmask 64544  }
  0x76   : > { %734 = vst.msk [vmem:[#allocation3 + $0x28] sm:$0xff] %vm728_vm13, %v1948_v34  ;;  %733 = vst.msk [vmem:[#allocation3 + $0x20] sm:$0xff] %vm728_vm13, %v1947_v20  ;;  %v1949_v12 = vcombine.low %v2692_v2, %v2802_v4  ;;  %v671_v32 = vld [vmem:[#allocation2 + $0x7c] sm:$0x1]  ;;  %v923_v8 = vshrl.u32 %v2802_v4, 16  ;;  %v926_v33 = vshll.u32 %v2802_v4, 16  ;;  %v1091_v2 = vsel %vm2292_vm9, %v1971_v50, %v1090_v56 }
  0x77   : > { %636 = vst [vmem:[#allocation2 + $0x90] sm:$0xf] %v635_v53  ;;  %v932_v58 = vshll.u32 %v671_v32, 16  ;;  %v1972_v47 = vrot.slane %v2802_v4, 9  ;;  %v1094_v61 = vrot.slane %v671_v32, 5  ;;  %v2006_v45 = vcombine.low %v2728_v54, %v1091_v2 }
  0x78   : > { %1183 = vrot.lane.b32.xlu1 %v1988_v16, %s2154_s19  ;;  %v925_v10 = vrot.slane %v923_v8, 4  ;;  %v928_v27 = vrot.slane %v926_v33, 5  ;;  %v2810_v19 = vld [vmem:[#allocation2 + $0x80] sm:$0xf]  ;;  %735 = vst.msk [vmem:[#allocation3 + $0x30] sm:$0xff] %vm728_vm13, %v1949_v12  ;;  %1305 = vrot.lane.b32.xlu0 %v2005_v57, %s2157_s22  ;;  %vm1152_vm0 = vcmask 97344  }
  0x79   : > { %v2816_v1 = vld [vmem:[#allocation2 + $0x88] sm:$0xf]  ;;  %v937_v44 = vshrl.u32 %v2810_v19, 16  ;;  %v940_v25 = vshll.u32 %v2810_v19, 16  ;;  %v637_v3 = vld [vmem:[#allocation2 + $0x94] sm:$0x1]  ;;  %v2829_v21 = vsel %vm2292_vm9, %v1972_v47, %v1094_v61  ;;  %v1989_v57 = vcombine.low %v2802_v4, %v2810_v19 }
  0x7a   : > { %v929_v14 = vor.u32 %v928_v27, %v925_v10  ;;  %v951_v18 = vshrl.u32 %v2816_v1, 16  ;;  %v954_v37 = vshll.u32 %v2816_v1, 16  ;;  %v673_v42 = vld [vmem:[#allocation2 + $0x84] sm:$0x1]  ;;  %v934_v55 = vrot.slane %v932_v58, 5 }
  0x7b   : > { %v939_v41 = vrot.slane %v937_v44, 4  ;;  %v942_v52 = vrot.slane %v940_v25, 5  ;;  %v675_v15 = vld [vmem:[#allocation2 + $0x8c] sm:$0x1]  ;;  %v946_v49 = vshll.u32 %v673_v42, 16  ;;  %v638_v20 = vsel %vm2194_vm2, %v509_v51, %v637_v3 }
  0x7c   : > { %1254 = vrot.lane.b32.xlu1 %v1996_v39, %s2159_s26  ;;  %1344 = vrot.lane.b32.xlu0 %v1948_v34, %s2155_s20  ;;  %v930_v13 = vrot.slane %v929_v14, 4  ;;  %v953_v17 = vrot.slane %v951_v18, 4  ;;  %v956_v63 = vrot.slane %v954_v37, 5  ;;  %v960_v54 = vshll.u32 %v675_v15, 16  ;;  %639 = vst [vmem:[#allocation2 + $0x94] sm:$0x1] %v638_v20 }
  0x7d   : > { %v943_v9 = vor.u32 %v942_v52, %v939_v41  ;;  %v2842_v26 = vcombine.low %v2810_v19, %v2816_v1  ;;  %v2144_v24 = vld [vmem:[%s3102_s1 + $0x10] ss:$0 sps:$4 sm:$0x33]   ;;  %v1981_v0 = vcombine.low %v1091_v2, %v2829_v21  ;;  %v948_v22 = vrot.slane %v946_v49, 5  ;;  %v678_v8 = vld [vmem:[#allocation2 + $0x98] sm:$0xf] }
  0x7e   : > { %v935_v62 = vsel %vm2392_vm12, %v930_v13, %v934_v55  ;;  %v957_v30 = vor.u32 %v956_v63, %v953_v17  ;;  %v2838_v23 = vld [vmem:[#allocation2 + $0x90] sm:$0xf]  ;;  %v962_v60 = vrot.slane %v960_v54, 5  ;;  %2118 = vmatprep.subr.msk.bf16.mxu0 %vm1534_vm14, %v2144_v24  ;;  %v1536_v31 = vsel %vm1534_vm14, %v2144_v24, 0  ;;  %2119 = vmatprep.subr.msk.bf16.mxu1 %vm1534_vm14, %v2144_v24  ;;  %v679_v61 = vld [vmem:[#allocation2 + $0x9c] sm:$0x1] }
  0x7f   : > { %v944_v35 = vrot.slane %v943_v9, 4  ;;  %736 = vst.msk [vmem:[#allocation3 + $0x38] sm:$0xff] %vm728_vm13, %v2842_v26  ;;  %v1221_v29 = vshrl.u32 %v2838_v23, 16  ;;  %v1224_v11 = vshll.u32 %v2838_v23, 16  ;;  %2095 = vmatpush3.bf16.msra.mxu0 %v1536_v31  ;;  %2117 = vmatpush3.bf16.msra.mxu1 %v1536_v31  ;;  %v1973_v59 = vrot.slane %v2810_v19, 9 }
  0x80   : > { %1307 = vrot.lane.b32.xlu1 %v2006_v45, %s2157_s22  ;;  %1409 = vrot.lane.b32.xlu0 %v2739_v48, %s2161_s30  ;;  %v1957_v48 = vcombine.low %v921_v46, %v935_v62  ;;  %v958_v5 = vrot.slane %v957_v30, 4  ;;  %v1098_v28 = vrot.slane %v673_v42, 5  ;;  %v1974_v34 = vrot.slane %v2816_v1, 9 }
  0x81   : > { %v1102_v6 = vrot.slane %v675_v15, 5  ;;  %v1223_v38 = vrot.slane %v1221_v29, 4  ;;  %v1226_v16 = vrot.slane %v1224_v11, 5  ;;  %v1384_v39 = vshrl.u32 %v678_v8, 16 }
  0x82   : > { %v963_v43 = vsel %vm2392_vm12, %v958_v5, %v962_v60  ;;  %v1099_v50 = vsel %vm2292_vm9, %v1973_v59, %v1098_v28  ;;  %v1387_v10 = vshll.u32 %v678_v8, 16  ;;  %v1990_v2 = vcombine.low %v2816_v1, %v2838_v23 }
  0x83   : > { %v677_v53 = vld [vmem:[#allocation2 + $0x94] sm:$0x1]  ;;  %v1103_v56 = vsel %vm2292_vm9, %v1974_v34, %v1102_v6  ;;  %v1386_v58 = vrot.slane %v1384_v39, 4  ;;  %v2007_v25 = vcombine.low %v2829_v21, %v1099_v50  ;;  %v2000_v51 = vrot.slane %v2838_v23, 9 }
  0x84   : > { %1346 = vrot.lane.b32.xlu1 %v1949_v12, %s2155_s20  ;;  %1456 = vrot.lane.b32.xlu0 %v2754_v40, %s2158_s23  ;;  %v949_v40 = vsel %vm2392_vm12, %v944_v35, %v948_v22  ;;  %v1227_v12 = vor.u32 %v1226_v16, %v1223_v38  ;;  %v1230_v32 = vshll.u32 %v677_v53, 16  ;;  %v1982_v33 = vcombine.low %v1099_v50, %v1103_v56 }
  0x85   : > { %v1958_v46 = vcombine.low %v949_v40, %v963_v43  ;;  %v1997_v27 = vcombine.low %v935_v62, %v949_v40  ;;  %v1389_v44 = vrot.slane %v1387_v10, 5  ;;  %v1285_v47 = vrot.slane %v677_v53, 5 }
  0x86   : > { %v1228_v4 = vrot.slane %v1227_v12, 4  ;;  %v1232_v19 = vrot.slane %v1230_v32, 5  ;;  %v1393_v45 = vshll.u32 %v679_v61, 16  ;;  %v2010_v17 = vcombine.low %v2838_v23, %v678_v8 }
  0x87   : > { %v1286_v1 = vsel %vm2292_vm9, %v2000_v51, %v1285_v47  ;;  %v1390_v37 = vor.u32 %v1389_v44, %v1386_v58  ;;  %v2014_v21 = vrot.slane %v678_v8, 9  ;;  %v1442_v9 = vrot.slane %v679_v61, 5 }
  0x88   : > { %1411 = vrot.lane.b32.xlu1 %v1957_v48, %s2161_s30  ;;  %1458 = vrot.lane.b32.xlu0 %v1981_v0, %s2158_s23  ;;  %v1233_v14 = vsel %vm2392_vm12, %v1228_v4, %v1232_v19  ;;  %v2008_v52 = vcombine.low %v1103_v56, %v1286_v1  ;;  %v1395_v13 = vrot.slane %v1393_v45, 5  ;;  %vm1197_vm1 = vcmask 130144  }
  0x89   : > { %v1998_v18 = vcombine.low %v963_v43, %v1233_v14  ;;  %v1391_v3 = vrot.slane %v1390_v37, 4  ;;  %v1443_v62 = vsel %vm2292_vm9, %v2014_v21, %v1442_v9  ;;  %vm1268_vm2 = vcmask 162944  }
  0x8a   : > { %v2016_v23 = vcombine.low %v1286_v1, %v1443_v62  ;;  %vm1321_vm3 = vcmask 195744   ;;  %vm1360_vm4 = vcmask 228544   ;;  %vm1425_vm5 = vcmask 261344  }
  0x8b   : > { %v1396_v63 = vsel %vm2392_vm12, %v1391_v3, %v1395_v13  ;;  %vm1472_vm6 = vcmask 294144   ;;  %vm1509_vm7 = vcmask 293888   ;;  %vm1699_vm8 = vcmask 68608  }
  0x8c   : > { %1000 = vrot.lane.b32.xlu1 %v1957_v48, %s2160_s27  ;;  %1140 = vrot.lane.b32.xlu0 %v1981_v0, %s2156_s21  ;;  %v2012_v20 = vcombine.low %v1233_v14, %v1396_v63  ;;  %vm1716_vm9 = vcmask 72704   ;;  %vm1825_vm10 = vcmask 1040384   ;;  %vm1827_vm11 = vcmask 66560  }
  0x90   : > { %1002 = vrot.lane.b32.xlu1 %v1958_v46, %s2160_s27  ;;  %1185 = vrot.lane.b32.xlu0 %v1989_v57, %s2154_s19 }
  0x94   : > { %1142 = vrot.lane.b32.xlu1 %v1982_v33, %s2156_s21  ;;  %1256 = vrot.lane.b32.xlu0 %v1997_v27, %s2159_s26 }
  0x98   : > { %1187 = vrot.lane.b32.xlu1 %v1990_v2, %s2154_s19  ;;  %1309 = vrot.lane.b32.xlu0 %v2007_v25, %s2157_s22 }
  0x99   : > { %v1176_v42 = vpop.permute.xlu1 %1175 }
  0x9a   : > { %v1174_v41 = vpop.permute.xlu0 %1173 }
  0x9c   : > { %1258 = vrot.lane.b32.xlu1 %v1998_v18, %s2159_s26  ;;  %1348 = vrot.lane.b32.xlu0 %v2842_v26, %s2155_s20 }
  0x9e   : > { %v1339_v55 = vpop.permute.xlu1 %1338  ;;  %v1337_v15 = vpop.permute.xlu0 %1336 }
  0xa0   : > { %1311 = vrot.lane.b32.xlu1 %v2008_v52, %s2157_s22  ;;  %1413 = vrot.lane.b32.xlu0 %v1958_v46, %s2161_s30 }
  0xa2   : > { %v1129_v49 = vpop.permute.xlu1 %1128  ;;  %v1298_v54 = vpop.permute.xlu0 %1297 }
  0xa4   : > { %1350 = vrot.lane.b32.xlu1 %v2010_v17, %s2155_s20  ;;  %1460 = vrot.lane.b32.xlu0 %v1982_v33, %s2158_s23 }
  0xa6   : > { %v1131_v30 = vpop.permute.xlu1 %1130  ;;  %v1449_v26 = vpop.permute.xlu0 %1448 }
  0xa8   : > { %1415 = vrot.lane.b32.xlu1 %v2012_v20, %s2161_s30 }
  0xaa   : > { %v1300_v24 = vpop.permute.xlu1 %1299  ;;  %v1451_v7 = vpop.permute.xlu0 %1450 }
  0xac   : > { %1462 = vrot.lane.b32.xlu1 %v2016_v23, %s2158_s23 }
  0xae   : > { %v1135_v0 = vpop.permute.xlu1 %1134  ;;  %v1133_v48 = vpop.permute.xlu0 %1132 }
  0xb2   : > { %v1247_v35 = vpop.permute.xlu1 %1246  ;;  %v989_v22 = vpop.permute.xlu0 %988 }
  0xb3   : > { %1013 = vst.msk [vmem:[#allocation3] sm:$0xff] %vm1012_vm15, %v989_v22 }
  0xb4   : > { %1153 = vst.msk [vmem:[#allocation3] sm:$0xff] %vm1152_vm0, %v1129_v49 }
  0xb5   : > { %1198 = vst.msk [vmem:[#allocation3] sm:$0xff] %vm1197_vm1, %v1174_v41 }
  0xb6   : > { %v1404_v36 = vpop.permute.xlu1 %1403  ;;  %v991_v60 = vpop.permute.xlu0 %990 }
  0xb7   : > { %1014 = vst.msk [vmem:[#allocation3 + $0x8] sm:$0xff] %vm1012_vm15, %v991_v60 }
  0xb8   : > { %1154 = vst.msk [vmem:[#allocation3 + $0x8] sm:$0xff] %vm1152_vm0, %v1131_v30 }
  0xb9   : > { %1199 = vst.msk [vmem:[#allocation3 + $0x8] sm:$0xff] %vm1197_vm1, %v1176_v42 }
  0xba   : > { %v993_v5 = vpop.permute.xlu1 %992  ;;  %1270 = vst.msk [vmem:[#allocation3 + $0x8] sm:$0xff] %vm1268_vm2, %v1247_v35  ;;  %v1245_v29 = vpop.permute.xlu0 %1244 }
  0xbb   : > { %1015 = vst.msk [vmem:[#allocation3 + $0x10] sm:$0xff] %vm1012_vm15, %v993_v5 }
  0xbc   : > { %1323 = vst.msk [vmem:[#allocation3 + $0x8] sm:$0xff] %vm1321_vm3, %v1300_v24 }
  0xbd   : > { %1155 = vst.msk [vmem:[#allocation3 + $0x10] sm:$0xff] %vm1152_vm0, %v1133_v48 }
  0xbe   : > { %1269 = vst.msk [vmem:[#allocation3] sm:$0xff] %vm1268_vm2, %v1245_v29  ;;  %v995_v11 = vpop.permute.xlu1 %994  ;;  %v1402_v31 = vpop.permute.xlu0 %1401 }
  0xbf   : > { %1362 = vst.msk [vmem:[#allocation3 + $0x8] sm:$0xff] %vm1360_vm4, %v1339_v55 }
  0xc0   : > { %1322 = vst.msk [vmem:[#allocation3] sm:$0xff] %vm1321_vm3, %v1298_v54 }
  0xc1   : > { %1427 = vst.msk [vmem:[#allocation3 + $0x8] sm:$0xff] %vm1425_vm5, %v1404_v36 }
  0xc2   : > { %1361 = vst.msk [vmem:[#allocation3] sm:$0xff] %vm1360_vm4, %v1337_v15  ;;  %v1178_v59 = vpop.permute.xlu0 %1177 }
  0xc3   : > { %1474 = vst.msk [vmem:[#allocation3 + $0x8] sm:$0xff] %vm1472_vm6, %v1451_v7  ;;  %v1180_v28 = vpop.permute.xlu1 %1179 }
  0xc4   : > { %1016 = vst.msk [vmem:[#allocation3 + $0x18] sm:$0xff] %vm1012_vm15, %v995_v11 }
  0xc5   : > { %1156 = vst.msk [vmem:[#allocation3 + $0x18] sm:$0xff] %vm1152_vm0, %v1135_v0 }
  0xc6   : > { %1426 = vst.msk [vmem:[#allocation3] sm:$0xff] %vm1425_vm5, %v1402_v31  ;;  %v1249_v34 = vpop.permute.xlu0 %1248 }
  0xc7   : > { %1473 = vst.msk [vmem:[#allocation3] sm:$0xff] %vm1472_vm6, %v1449_v26 }
  0xc8   : > { %1200 = vst.msk [vmem:[#allocation3 + $0x10] sm:$0xff] %vm1197_vm1, %v1178_v59  ;;  %1201 = vst.msk [vmem:[#allocation3 + $0x18] sm:$0xff] %vm1197_vm1, %v1180_v28 }
  0xc9   : > { %1271 = vst.msk [vmem:[#allocation3 + $0x10] sm:$0xff] %vm1268_vm2, %v1249_v34 }
  0xca   : > { %v1482_v40 = vld [vmem:[#allocation3 + $0x8] sm:$0xff]  ;;  %v1302_v43 = vpop.permute.xlu0 %1301 }
  0xcb   : > { %1324 = vst.msk [vmem:[#allocation3 + $0x10] sm:$0xff] %vm1321_vm3, %v1302_v43 }
  0xce   : > { %v1481_v6 = vld [vmem:[#allocation3] sm:$0xff]  ;;  %v1251_v38 = vpop.permute.xlu1 %1250  ;;  %v1341_v16 = vpop.permute.xlu0 %1340 }
  0xcf   : > { %2096 = vmatprep.mubr.msk.bf16.mxu0 %vm1509_vm7, %v1481_v6  ;;  %1272 = vst.msk [vmem:[#allocation3 + $0x18] sm:$0xff] %vm1268_vm2, %v1251_v38 }
  0xd0   : > { %2097 = vmatmul.mubr.msk.bf16.vlgmr.msra.gmra.mrb[0].mxu0 %vm1509_vm7, %v1482_v40  ;;  %1363 = vst.msk [vmem:[#allocation3 + $0x10] sm:$0xff] %vm1360_vm4, %v1341_v16 }
  0xd2   : > { %v1304_v53 = vpop.permute.xlu1 %1303  ;;  %v1406_v46 = vpop.permute.xlu0 %1405 }
  0xd3   : > { %1325 = vst.msk [vmem:[#allocation3 + $0x18] sm:$0xff] %vm1321_vm3, %v1304_v53 }
  0xd4   : > { %1428 = vst.msk [vmem:[#allocation3 + $0x10] sm:$0xff] %vm1425_vm5, %v1406_v46 }
  0xd6   : > { %v1343_v57 = vpop.permute.xlu1 %1342  ;;  %v1453_v50 = vpop.permute.xlu0 %1452 }
  0xd7   : > { %1364 = vst.msk [vmem:[#allocation3 + $0x18] sm:$0xff] %vm1360_vm4, %v1343_v57 }
  0xd8   : > { %1475 = vst.msk [vmem:[#allocation3 + $0x10] sm:$0xff] %vm1472_vm6, %v1453_v50 }
  0xda   : > { %v1408_v56 = vpop.permute.xlu1 %1407  ;;  %v1455_v12 = vpop.permute.xlu0 %1454 }
  0xdb   : > { %1429 = vst.msk [vmem:[#allocation3 + $0x18] sm:$0xff] %vm1425_vm5, %v1408_v56 }
  0xdc   : > { %1476 = vst.msk [vmem:[#allocation3 + $0x18] sm:$0xff] %vm1472_vm6, %v1455_v12 }
  0xde   : > { %v997_v32 = vpop.permute.xlu1 %996  ;;  %v1137_v8 = vpop.permute.xlu0 %1136 }
  0xdf   : > { %1017 = vst.msk [vmem:[#allocation3 + $0x20] sm:$0xff] %vm1012_vm15, %v997_v32  ;;  %v1483_v33 = vld [vmem:[#allocation3 + $0x10] sm:$0xff] }
  0xe0   : > { %1157 = vst.msk [vmem:[#allocation3 + $0x20] sm:$0xff] %vm1152_vm0, %v1137_v8  ;;  %2100 = vmatprep.mubr.msk.bf16.mxu0 %vm1509_vm7, %v1483_v33 }
  0xe2   : > { %v999_v39 = vpop.permute.xlu1 %998  ;;  %v1182_v10 = vpop.permute.xlu0 %1181 }
  0xe3   : > { %1018 = vst.msk [vmem:[#allocation3 + $0x28] sm:$0xff] %vm1012_vm15, %v999_v39  ;;  %v1484_v27 = vld [vmem:[#allocation3 + $0x18] sm:$0xff] }
  0xe4   : > { %1202 = vst.msk [vmem:[#allocation3 + $0x20] sm:$0xff] %vm1197_vm1, %v1182_v10  ;;  %2101 = vmatmul.mubr.msk.bf16.gmra.mrb[4].mxu0 %vm1509_vm7, %v1484_v27 }
  0xe6   : > { %v1139_v4 = vpop.permute.xlu1 %1138  ;;  %v1253_v19 = vpop.permute.xlu0 %1252 }
  0xe7   : > { %1158 = vst.msk [vmem:[#allocation3 + $0x28] sm:$0xff] %vm1152_vm0, %v1139_v4 }
  0xe8   : > { %1273 = vst.msk [vmem:[#allocation3 + $0x20] sm:$0xff] %vm1268_vm2, %v1253_v19 }
  0xea   : > { %v1184_v2 = vpop.permute.xlu1 %1183  ;;  %v1306_v58 = vpop.permute.xlu0 %1305 }
  0xeb   : > { %1203 = vst.msk [vmem:[#allocation3 + $0x28] sm:$0xff] %vm1197_vm1, %v1184_v2 }
  0xec   : > { %1326 = vst.msk [vmem:[#allocation3 + $0x20] sm:$0xff] %vm1321_vm3, %v1306_v58 }
  0xee   : > { %v1255_v44 = vpop.permute.xlu1 %1254  ;;  %v1345_v14 = vpop.permute.xlu0 %1344 }
  0xef   : > { %1274 = vst.msk [vmem:[#allocation3 + $0x28] sm:$0xff] %vm1268_vm2, %v1255_v44 }
  0xf0   : > { %1365 = vst.msk [vmem:[#allocation3 + $0x20] sm:$0xff] %vm1360_vm4, %v1345_v14 }
  0xf2   : > { %v1308_v25 = vpop.permute.xlu1 %1307  ;;  %v1410_v51 = vpop.permute.xlu0 %1409 }
  0xf3   : > { %1327 = vst.msk [vmem:[#allocation3 + $0x28] sm:$0xff] %vm1321_vm3, %v1308_v25 }
  0xf4   : > { %1430 = vst.msk [vmem:[#allocation3 + $0x20] sm:$0xff] %vm1425_vm5, %v1410_v51 }
  0xf6   : > { %v1347_v47 = vpop.permute.xlu1 %1346  ;;  %v1457_v61 = vpop.permute.xlu0 %1456 }
  0xf7   : > { %1366 = vst.msk [vmem:[#allocation3 + $0x28] sm:$0xff] %vm1360_vm4, %v1347_v47 }
  0xf8   : > { %1477 = vst.msk [vmem:[#allocation3 + $0x20] sm:$0xff] %vm1472_vm6, %v1457_v61 }
  0xfa   : > { %v1412_v18 = vpop.permute.xlu1 %1411  ;;  %v1459_v1 = vpop.permute.xlu0 %1458 }
  0xfb   : > { %1431 = vst.msk [vmem:[#allocation3 + $0x28] sm:$0xff] %vm1425_vm5, %v1412_v18 }
  0xfc   : > { %1478 = vst.msk [vmem:[#allocation3 + $0x28] sm:$0xff] %vm1472_vm6, %v1459_v1 }
  0xfe   : > { %v1001_v37 = vpop.permute.xlu1 %1000  ;;  %v1141_v45 = vpop.permute.xlu0 %1140 }
  0xff   : > { %1019 = vst.msk [vmem:[#allocation3 + $0x30] sm:$0xff] %vm1012_vm15, %v1001_v37  ;;  %v1485_v42 = vld [vmem:[#allocation3 + $0x20] sm:$0xff] }
 0x100   : > { %1159 = vst.msk [vmem:[#allocation3 + $0x30] sm:$0xff] %vm1152_vm0, %v1141_v45  ;;  %2104 = vmatprep.mubr.msk.bf16.mxu1 %vm1509_vm7, %v1485_v42 }
 0x102   : > { %v1003_v41 = vpop.permute.xlu1 %1002  ;;  %v1186_v52 = vpop.permute.xlu0 %1185 }
 0x103   : > { %1020 = vst.msk [vmem:[#allocation3 + $0x38] sm:$0xff] %vm1012_vm15, %v1003_v41  ;;  %v1486_v3 = vld [vmem:[#allocation3 + $0x28] sm:$0xff] }
 0x104   : > { %1204 = vst.msk [vmem:[#allocation3 + $0x30] sm:$0xff] %vm1197_vm1, %v1186_v52  ;;  %2105 = vmatmul.mubr.msk.bf16.vlgmr.msra.gmra.mrb[0].mxu1 %vm1509_vm7, %v1486_v3 }
 0x106   : > { %v1143_v13 = vpop.permute.xlu1 %1142  ;;  %v1257_v55 = vpop.permute.xlu0 %1256 }
 0x107   : > { %1160 = vst.msk [vmem:[#allocation3 + $0x38] sm:$0xff] %vm1152_vm0, %v1143_v13 }
 0x108   : > { %1275 = vst.msk [vmem:[#allocation3 + $0x30] sm:$0xff] %vm1268_vm2, %v1257_v55 }
 0x10a   : > { %v1188_v15 = vpop.permute.xlu1 %1187  ;;  %v1310_v17 = vpop.permute.xlu0 %1309 }
 0x10b   : > { %1205 = vst.msk [vmem:[#allocation3 + $0x38] sm:$0xff] %vm1197_vm1, %v1188_v15 }
 0x10c   : > { %1328 = vst.msk [vmem:[#allocation3 + $0x30] sm:$0xff] %vm1321_vm3, %v1310_v17 }
 0x10e   : > { %v1259_v63 = vpop.permute.xlu1 %1258  ;;  %v1349_v21 = vpop.permute.xlu0 %1348 }
 0x10f   : > { %1276 = vst.msk [vmem:[#allocation3 + $0x38] sm:$0xff] %vm1268_vm2, %v1259_v63 }
 0x110   : > { %1367 = vst.msk [vmem:[#allocation3 + $0x30] sm:$0xff] %vm1360_vm4, %v1349_v21 }
 0x112   : > { %v1312_v9 = vpop.permute.xlu1 %1311  ;;  %v1414_v49 = vpop.permute.xlu0 %1413 }
 0x113   : > { %1329 = vst.msk [vmem:[#allocation3 + $0x38] sm:$0xff] %vm1321_vm3, %v1312_v9 }
 0x114   : > { %1432 = vst.msk [vmem:[#allocation3 + $0x30] sm:$0xff] %vm1425_vm5, %v1414_v49 }
 0x116   : > { %v1351_v54 = vpop.permute.xlu1 %1350  ;;  %v1461_v20 = vpop.permute.xlu0 %1460 }
 0x117   : > { %1368 = vst.msk [vmem:[#allocation3 + $0x38] sm:$0xff] %vm1360_vm4, %v1351_v54 }
 0x118   : > { %1479 = vst.msk [vmem:[#allocation3 + $0x30] sm:$0xff] %vm1472_vm6, %v1461_v20 }
 0x11a   : > { %v1416_v62 = vpop.permute.xlu1 %1415 }
 0x11b   : > { %1433 = vst.msk [vmem:[#allocation3 + $0x38] sm:$0xff] %vm1425_vm5, %v1416_v62 }
 0x11e   : > { %v1463_v30 = vpop.permute.xlu1 %1462 }
 0x11f   : > { %1480 = vst.msk [vmem:[#allocation3 + $0x38] sm:$0xff] %vm1472_vm6, %v1463_v30  ;;  %v1487_v26 = vld [vmem:[#allocation3 + $0x30] sm:$0xff] }
 0x120   : > { %2108 = vmatprep.mubr.msk.bf16.mxu1 %vm1509_vm7, %v1487_v26 }
 0x126   : > { %v1488_v23 = vld [vmem:[#allocation3 + $0x38] sm:$0xff] }
 0x127   : > { %2109 = vmatmul.mubr.msk.bf16.gmra.mrb[4].mxu1 %vm1509_vm7, %v1488_v23 }
 0x1a3   : > { %v2977_v24 = vpop.f32.mrb[0].mxu0 }
 0x1a4   : > { %v2065_v7 = vpack.c.bf16 %v2977_v24, %v2977_v24  ;;  %v2981_v0 = vpop.f32.mrb[1].mxu0  ;;  %v1720_v31 = vsel %vm1716_vm9, %v2977_v24, 0.0 }
 0x1a5   : > { %v2063_v48 = vpack.c.bf16 %v2981_v0, %v2981_v0  ;;  %v2985_v35 = vpop.f32.mrb[2].mxu0  ;;  %v1717_v60 = vsel %vm1716_vm9, %v2981_v0, 0.0 }
 0x1a6   : > { %1702 = vst.msk [vmem:[%s2975_s10 + $0x8] sm:$0xf] %vm1699_vm8, %v2065_v7  ;;  %v2066_v22 = vpack.c.bf16 %v2985_v35, %v2985_v35  ;;  %v2991_v36 = vpop.f32.mrb[3].mxu0  ;;  %v1722_v28 = vsel %vm1716_vm9, %v2985_v35, 0.0 }
 0x1a7   : > { %1700 = vst.msk [vmem:[%s2975_s10] sm:$0xf] %vm1699_vm8, %v2063_v48  ;;  %v2064_v5 = vpack.c.bf16 %v2991_v36, %v2991_v36  ;;  %v1718_v29 = vsel %vm1716_vm9, %v2991_v36, 0.0 }
 0x1a8   : > { %1703 = vst.msk [vmem:[%s2975_s10 + $0xc] sm:$0xf] %vm1699_vm8, %v2066_v22  ;;  %v1719_v11 = vadd.f32 %v1718_v29, %v1717_v60 }
 0x1a9   : > { %1701 = vst.msk [vmem:[%s2975_s10 + $0x4] sm:$0xf] %vm1699_vm8, %v2064_v5 }
 0x1aa   : > { %v1721_v59 = vadd.f32 %v1720_v31, %v1719_v11 }
 0x1ac   : > { %v1723_v34 = vadd.f32 %v1722_v28, %v1721_v59 }
 0x1b7   : > { %v3009_v6 = vpop.f32.mrb[4].mxu0 }
 0x1b8   : > { %v2069_v40 = vpack.c.bf16 %v3009_v6, %v3009_v6  ;;  %v3013_v43 = vpop.f32.mrb[5].mxu0  ;;  %v1728_v8 = vsel %vm1716_vm9, %v3009_v6, 0.0 }
 0x1b9   : > { %v2067_v38 = vpack.c.bf16 %v3013_v43, %v3013_v43  ;;  %v1724_v16 = vsel %vm1716_vm9, %v3013_v43, 0.0  ;;  %v3019_v53 = vpop.f32.mrb[6].mxu0 }
 0x1ba   : > { %1706 = vst.msk [vmem:[%s2975_s10 + $0x18] sm:$0xf] %vm1699_vm8, %v2069_v40  ;;  %v1725_v46 = vadd.f32 %v1724_v16, %v1723_v34  ;;  %v2070_v57 = vpack.c.bf16 %v3019_v53, %v3019_v53  ;;  %v3025_v50 = vpop.f32.mrb[7].mxu0  ;;  %v1730_v39 = vsel %vm1716_vm9, %v3019_v53, 0.0 }
 0x1bb   : > { %1704 = vst.msk [vmem:[%s2975_s10 + $0x10] sm:$0xf] %vm1699_vm8, %v2067_v38  ;;  %v2068_v56 = vpack.c.bf16 %v3025_v50, %v3025_v50  ;;  %v1726_v12 = vsel %vm1716_vm9, %v3025_v50, 0.0 }
 0x1bc   : > { %1707 = vst.msk [vmem:[%s2975_s10 + $0x1c] sm:$0xf] %vm1699_vm8, %v2070_v57  ;;  %v1727_v32 = vadd.f32 %v1726_v12, %v1725_v46 }
 0x1bd   : > { %1705 = vst.msk [vmem:[%s2975_s10 + $0x14] sm:$0xf] %vm1699_vm8, %v2068_v56 }
 0x1be   : > { %v1729_v33 = vadd.f32 %v1728_v8, %v1727_v32 }
 0x1c0   : > { %v1731_v10 = vadd.f32 %v1730_v39, %v1729_v33 }
 0x1d7   : > { %v2106_v27 = vpop.f32.mrb[0].mxu1 }
 0x1d8   : > { %v2073_v4 = vpack.c.bf16 %v2106_v27, %v2106_v27  ;;  %v1604_v19 = vpop.f32.mrb[1].mxu1  ;;  %v1736_v1 = vsel %vm1716_vm9, %v2106_v27, 0.0 }
 0x1d9   : > { %v2071_v2 = vpack.c.bf16 %v1604_v19, %v1604_v19  ;;  %v1732_v58 = vsel %vm1716_vm9, %v1604_v19, 0.0  ;;  %v2107_v44 = vpop.f32.mrb[2].mxu1 }
 0x1da   : > { %1710 = vst.msk [vmem:[%s2975_s10 + $0x28] sm:$0xf] %vm1699_vm8, %v2073_v4  ;;  %v1733_v14 = vadd.f32 %v1732_v58, %v1731_v10  ;;  %v2074_v25 = vpack.c.bf16 %v2107_v44, %v2107_v44  ;;  %v1607_v51 = vpop.f32.mrb[3].mxu1  ;;  %v1738_v45 = vsel %vm1716_vm9, %v2107_v44, 0.0 }
 0x1db   : > { %1708 = vst.msk [vmem:[%s2975_s10 + $0x20] sm:$0xf] %vm1699_vm8, %v2071_v2  ;;  %v2072_v47 = vpack.c.bf16 %v1607_v51, %v1607_v51  ;;  %v1734_v61 = vsel %vm1716_vm9, %v1607_v51, 0.0 }
 0x1dc   : > { %1711 = vst.msk [vmem:[%s2975_s10 + $0x2c] sm:$0xf] %vm1699_vm8, %v2074_v25  ;;  %v1735_v18 = vadd.f32 %v1734_v61, %v1733_v14 }
 0x1dd   : > { %1709 = vst.msk [vmem:[%s2975_s10 + $0x24] sm:$0xf] %vm1699_vm8, %v2072_v47 }
 0x1de   : > { %v1737_v37 = vadd.f32 %v1736_v1, %v1735_v18 }
 0x1e0   : > { %v1739_v42 = vadd.f32 %v1738_v45, %v1737_v37 }
 0x1fa   : > { %v2110_v41 = vpop.f32.mrb[4].mxu1 }
 0x1fb   : > { %v2077_v52 = vpack.c.bf16 %v2110_v41, %v2110_v41  ;;  %v1620_v3 = vpop.f32.mrb[5].mxu1  ;;  %v1744_v20 = vsel %vm1716_vm9, %v2110_v41, 0.0 }
 0x1fc   : > { %v2075_v13 = vpack.c.bf16 %v1620_v3, %v1620_v3  ;;  %v1740_v55 = vsel %vm1716_vm9, %v1620_v3, 0.0  ;;  %v2111_v15 = vpop.f32.mrb[6].mxu1 }
 0x1fd   : > { %1714 = vst.msk [vmem:[%s2975_s10 + $0x38] sm:$0xf] %vm1699_vm8, %v2077_v52  ;;  %v1741_v17 = vadd.f32 %v1740_v55, %v1739_v42  ;;  %v2078_v63 = vpack.c.bf16 %v2111_v15, %v2111_v15  ;;  %v1623_v21 = vpop.f32.mrb[7].mxu1  ;;  %v1746_v30 = vsel %vm1716_vm9, %v2111_v15, 0.0 }
 0x1fe   : > { %1712 = vst.msk [vmem:[%s2975_s10 + $0x30] sm:$0xf] %vm1699_vm8, %v2075_v13  ;;  %v2076_v9 = vpack.c.bf16 %v1623_v21, %v1623_v21  ;;  %v1742_v49 = vsel %vm1716_vm9, %v1623_v21, 0.0 }
 0x1ff   : > { %1715 = vst.msk [vmem:[%s2975_s10 + $0x3c] sm:$0xf] %vm1699_vm8, %v2078_v63  ;;  %v1743_v54 = vadd.f32 %v1742_v49, %v1741_v17 }
 0x200   : > { %1713 = vst.msk [vmem:[%s2975_s10 + $0x34] sm:$0xf] %vm1699_vm8, %v2076_v9 }
 0x201   : > { %v1745_v62 = vadd.f32 %v1744_v20, %v1743_v54 }
 0x203   : > { %v1747_v26 = vadd.f32 %v1746_v30, %v1745_v62 }
 0x205   : > { %v1748_v23 = vrot.slane %v1747_v26, 4 }
 0x207   : > { %v1749_v7 = vadd.f32 %v1748_v23, %v1747_v26 }
 0x209   : > { %v1750_v48 = vrot.slane %v1749_v7, 2 }
 0x20b   : > { %v1751_v22 = vadd.f32 %v1750_v48, %v1749_v7 }
 0x20d   : > { %v1752_v60 = vrot.slane %v1751_v22, 1 }
 0x20f   : > { %v3065_v5 = vadd.f32 %v1752_v60, %v1751_v22 }
 0x211   : > { %v1755_v29 = vmul.f32 0.0078125, %v3065_v5 }
 0x213   : > { %v1756_v11 = vsub.f32 %v2981_v0, %v1755_v29  ;;  %v1757_v31 = vsub.f32 %v2991_v36, %v1755_v29  ;;  %v1758_v59 = vsub.f32 %v2977_v24, %v1755_v29  ;;  %v1759_v28 = vsub.f32 %v2985_v35, %v1755_v29 }
 0x214   : > { %v1760_v34 = vsub.f32 %v3013_v43, %v1755_v29  ;;  %v1761_v40 = vsub.f32 %v3025_v50, %v1755_v29  ;;  %v1762_v38 = vsub.f32 %v3009_v6, %v1755_v29  ;;  %v1763_v16 = vsub.f32 %v3019_v53, %v1755_v29 }
 0x215   : > { %v1764_v46 = vsub.f32 %v1604_v19, %v1755_v29  ;;  %v1765_v57 = vsub.f32 %v1607_v51, %v1755_v29  ;;  %v1766_v56 = vsub.f32 %v2106_v27, %v1755_v29  ;;  %v1767_v12 = vsub.f32 %v2107_v44, %v1755_v29 }
 0x216   : > { %v1768_v32 = vsub.f32 %v1620_v3, %v1755_v29  ;;  %v1769_v0 = vsub.f32 %v1623_v21, %v1755_v29  ;;  %v1770_v8 = vsub.f32 %v2110_v41, %v1755_v29  ;;  %v1771_v36 = vsub.f32 %v2111_v15, %v1755_v29 }
 0x217   : > { %v1772_v33 = vmul.f32 %v1756_v11, %v1756_v11  ;;  %v1773_v24 = vmul.f32 %v1757_v31, %v1757_v31  ;;  %v1774_v39 = vmul.f32 %v1758_v59, %v1758_v59  ;;  %v1775_v35 = vmul.f32 %v1759_v28, %v1759_v28 }
 0x218   : > { %v1776_v6 = vmul.f32 %v1760_v34, %v1760_v34  ;;  %v1777_v19 = vmul.f32 %v1761_v40, %v1761_v40  ;;  %v1778_v58 = vmul.f32 %v1762_v38, %v1762_v38  ;;  %v1779_v25 = vmul.f32 %v1763_v16, %v1763_v16 }
 0x219   : > { %v1788_v43 = vsel %vm1716_vm9, %v1772_v33, 0.0  ;;  %v1789_v50 = vsel %vm1716_vm9, %v1773_v24, 0.0  ;;  %v1791_v53 = vsel %vm1716_vm9, %v1774_v39, 0.0  ;;  %v1793_v27 = vsel %vm1716_vm9, %v1775_v35, 0.0 }
 0x21a   : > { %v1790_v10 = vadd.f32 %v1789_v50, %v1788_v43  ;;  %v1795_v44 = vsel %vm1716_vm9, %v1776_v6, 0.0  ;;  %v1797_v51 = vsel %vm1716_vm9, %v1777_v19, 0.0  ;;  %v1780_v61 = vmul.f32 %v1764_v46, %v1764_v46 }
 0x21b   : > { %v1799_v18 = vsel %vm1716_vm9, %v1778_v58, 0.0  ;;  %v1781_v37 = vmul.f32 %v1765_v57, %v1765_v57  ;;  %v1801_v45 = vsel %vm1716_vm9, %v1779_v25, 0.0  ;;  %v1782_v41 = vmul.f32 %v1766_v56, %v1766_v56 }
 0x21c   : > { %v1792_v4 = vadd.f32 %v1791_v53, %v1790_v10  ;;  %v1803_v52 = vsel %vm1716_vm9, %v1780_v61, 0.0  ;;  %v1783_v13 = vmul.f32 %v1767_v12, %v1767_v12  ;;  %v1784_v17 = vmul.f32 %v1768_v32, %v1768_v32 }
 0x21d   : > { %v1805_v55 = vsel %vm1716_vm9, %v1781_v37, 0.0  ;;  %v1807_v63 = vsel %vm1716_vm9, %v1782_v41, 0.0  ;;  %v1785_v9 = vmul.f32 %v1769_v0, %v1769_v0  ;;  %v1786_v20 = vmul.f32 %v1770_v8, %v1770_v8 }
 0x21e   : > { %v1794_v2 = vadd.f32 %v1793_v27, %v1792_v4  ;;  %v1809_v49 = vsel %vm1716_vm9, %v1783_v13, 0.0  ;;  %v1811_v62 = vsel %vm1716_vm9, %v1784_v17, 0.0  ;;  %v1787_v26 = vmul.f32 %v1771_v36, %v1771_v36 }
 0x21f   : > { %v1813_v23 = vsel %vm1716_vm9, %v1785_v9, 0.0  ;;  %v1815_v48 = vsel %vm1716_vm9, %v1786_v20, 0.0 }
 0x220   : > { %v1796_v14 = vadd.f32 %v1795_v44, %v1794_v2  ;;  %v1817_v60 = vsel %vm1716_vm9, %v1787_v26, 0.0 }
 0x222   : > { %v1798_v47 = vadd.f32 %v1797_v51, %v1796_v14 }
 0x224   : > { %v1800_v1 = vadd.f32 %v1799_v18, %v1798_v47 }
 0x226   : > { %v1802_v42 = vadd.f32 %v1801_v45, %v1800_v1 }
 0x228   : > { %v1804_v3 = vadd.f32 %v1803_v52, %v1802_v42 }
 0x22a   : > { %v1806_v15 = vadd.f32 %v1805_v55, %v1804_v3 }
 0x22c   : > { %v1808_v21 = vadd.f32 %v1807_v63, %v1806_v15 }
 0x22e   : > { %v1810_v54 = vadd.f32 %v1809_v49, %v1808_v21 }
 0x230   : > { %v1812_v30 = vadd.f32 %v1811_v62, %v1810_v54 }
 0x232   : > { %v1814_v7 = vadd.f32 %v1813_v23, %v1812_v30 }
 0x234   : > { %v1816_v22 = vadd.f32 %v1815_v48, %v1814_v7 }
 0x236   : > { %v1818_v29 = vadd.f32 %v1817_v60, %v1816_v22 }
 0x238   : > { %v1819_v11 = vrot.slane %v1818_v29, 4 }
 0x23a   : > { %v1820_v31 = vadd.f32 %v1819_v11, %v1818_v29 }
 0x23c   : > { %v1821_v59 = vrot.slane %v1820_v31, 2 }
 0x23e   : > { %v1822_v28 = vadd.f32 %v1821_v59, %v1820_v31 }
 0x240   : > { %v1823_v34 = vrot.slane %v1822_v28, 1 }
 0x242   : > { %v1824_v40 = vadd.f32 %v1823_v34, %v1822_v28 }
 0x244   : > { %v1826_v38 = vsel %vm1825_vm10, %v3065_v5, %v1824_v40 }
 0x245   : > { %1828 = vst.msk [vmem:[%s187_s16] sm:$0x3] %vm1827_vm11, %v1826_v38 }
 0x246 PF: > { %s14_s12 = sadd.s32 1, %s2151_s12  }
 0x247   : > { %p11_p6 = scmp.ge.s32.totalorder %s14_s12, 10  }
 0x249   :  { %13 = sbr.rel (!%p11_p6) target bundleno = 1 (0x1), region = 72 }

// kernel: basic_block_forward.7
= control target key start
LH: loop header
LB: loop body
LE: loop exit
PB: predicated region body
PF: predicated region fallthrough
CT: control target
= control target key end

     0   :  { %s2369_s18 = smov 0   ;;  %s3347_s0 = inlined_call_operand.vmem [shape: bf16[16,8,8,4], index: 0, kind: input, shape index: {}]   ;;  %s3348_s1 = inlined_call_operand.vmem [shape: f32[1,1,1,4], index: 1, kind: input, shape index: {}]   ;;  %s3349_s2 = inlined_call_operand.vmem [shape: f32[1,1,1,4], index: 2, kind: input, shape index: {}]   ;;  %s3350_s3 = inlined_call_operand.vmem [shape: bf16[36,9], index: 3, kind: input, shape index: {}]   ;;  %s3351_s4 = inlined_call_operand.vmem [shape: bf16[1024,9], index: 4, kind: output, shape index: {0}]   ;;  %s3352_s5 = inlined_call_operand.vmem [shape: f32[8,2,9], index: 5, kind: output, shape index: {1}]  }
   0x1 LB: > { %s2375_s19 = sadd.s32 4294967295, %s2328_s18   ;;  %p2052_p0 = scmp.ge.s32.totalorder %s2328_s18, 1  ;;  %s2328_s18 = sphi %s2369_s18, %s16_s18  }
   0x2   : > { %p192_p1 = scmp.lt.s32.totalorder %s2328_s18, 9 }
   0x4   : > { %p193_p2 = pnand %p2052_p0, %p192_p1 }
   0x5   : > { %s2053_s20 = sshll.u32 (!%p193_p2), %s2375_s19, 1  ;;  %vm355_vm0 = vcmask (!%p193_p2), 24576   ;;  %vm366_vm1 = vsmask.f32 (!%p193_p2), 256  ;;  %v374_v0 = vld [vmem:[#allocation2 + $0x18] sm:$0x1] (!%p193_p2) }
   0x6   : > { %196 = sbr.rel (%p193_p2) target bundleno = 590 (0x24e), region = 36  ;;  %p226_p3 = scmp.lt.s32.totalorder (!%p193_p2), %s2053_s20, 15  ;;  %vm2381_vm2 = vmand (!%p193_p2), %vm355_vm0, %vm366_vm1  ;;  %v377_v2 = vld [vmem:[#allocation2 + $0x20] sm:$0x1] (!%p193_p2)  ;;  %v368_v5 = vld [vmem:[#allocation2 + $0x8] sm:$0x1] (!%p193_p2) }
   0x7   : > { %v375_v3 = vsel (!%p193_p2), %vm2381_vm2, 0, %v374_v0  ;;  %v378_v4 = vsel (!%p193_p2), %vm2381_vm2, 0, %v377_v2  ;;  %v369_v6 = vsel (!%p193_p2), %vm2381_vm2, 0, %v368_v5  ;;  %v371_v7 = vld [vmem:[#allocation2 + $0x10] sm:$0x1] (!%p193_p2)  ;;  %vm353_vm3 = vcmask (!%p193_p2), 27648  }
   0x8   : > { %376 = vst [vmem:[#allocation2 + $0x18] sm:$0x1] (!%p193_p2), %v375_v3  ;;  %379 = vst [vmem:[#allocation2 + $0x20] sm:$0x1] (!%p193_p2), %v378_v4  ;;  %v380_v8 = vld [vmem:[#allocation2 + $0x28] sm:$0x1] (!%p193_p2) }
   0x9   : > { %v2394_v9 = vld [vmem:[%s3348_s1] ss:$0 sm:$0xff] (!%p193_p2)  ;;  %370 = vst [vmem:[#allocation2 + $0x8] sm:$0x1] (!%p193_p2), %v369_v6  ;;  %v372_v10 = vsel (!%p193_p2), %vm2381_vm2, 0, %v371_v7  ;;  %v381_v11 = vsel (!%p193_p2), %vm2381_vm2, 0, %v380_v8 }
   0xa   : > { %v386_v12 = vld [vmem:[#allocation2 + $0x38] sm:$0x1] (!%p193_p2)  ;;  %373 = vst [vmem:[#allocation2 + $0x10] sm:$0x1] (!%p193_p2), %v372_v10  ;;  %382 = vst [vmem:[#allocation2 + $0x28] sm:$0x1] (!%p193_p2), %v381_v11 }
   0xb   : > { %v387_v13 = vsel (!%p193_p2), %vm2381_vm2, 0, %v386_v12  ;;  %v389_v14 = vld [vmem:[#allocation2 + $0x40] sm:$0x1] (!%p193_p2)  ;;  %v383_v15 = vld [vmem:[#allocation2 + $0x30] sm:$0x1] (!%p193_p2)  ;;  %v2330_v21 = vmov (!%p193_p2), 0  }
   0xc   : > { %388 = vst [vmem:[#allocation2 + $0x38] sm:$0x1] (!%p193_p2), %v387_v13  ;;  %v390_v19 = vsel (!%p193_p2), %vm2381_vm2, 0, %v389_v14  ;;  %v384_v20 = vsel (!%p193_p2), %vm2381_vm2, 0, %v383_v15  ;;  %354 = vst.msk [vmem:[#allocation2] sm:$0xf] (!%p193_p2), %vm353_vm3, %v2330_v21 }
   0xd   : > { %s3364_s20 = smov (!%p226_p3, %s2053_s20), 15  ;;  %356 = vst.msk [vmem:[#allocation2 + $0x4] sm:$0x1] %vm355_vm0, %v2330_v21  ;;  %358 = vst.msk [vmem:[#allocation2 + $0x54] sm:$0x1] %vm355_vm0, %v2330_v21  ;;  %vm1169_vm5 = vcmask 1042432  }
   0xe   : > { %s2180_s21 = sshll.u32 %s3364_s20, 5  ;;  %357 = vst.msk [vmem:[#allocation2 + $0x50] sm:$0xf] %vm353_vm3, %v2330_v21  ;;  %360 = vst.msk [vmem:[#allocation2 + $0x48] sm:$0xf] %vm353_vm3, %v2330_v21  ;;  %vm1170_vm8 = vcmask 1046532  }
   0xf   : > { %s2403_s26 = scalar_lea.vmem %s3347_s0, %s2180_s21  ;;  %361 = vst.msk [vmem:[#allocation2 + $0x4c] sm:$0x1] %vm355_vm0, %v2330_v21  ;;  %363 = vst.msk [vmem:[#allocation2 + $0x9c] sm:$0x1] %vm355_vm0, %v2330_v21  ;;  %v2426_v27 = vld [vmem:[%s3349_s2] ss:$0 sm:$0xff] }
  0x10   : > { %v2245_v16 = vld [vmem:[%s2403_s26 + $0x8] sm:$0xff]   ;;  %v2214_v17 = vld [vmem:[%s2403_s26] sm:$0xff]   ;;  %v2246_v18 = vld [vmem:[%s2403_s26 + $0x10] sm:$0xff]   ;;  %362 = vst.msk [vmem:[#allocation2 + $0x98] sm:$0xf] %vm353_vm3, %v2330_v21  ;;  %s2331_s29 = smov 12  }
  0x11   : > { %v2219_v22 = vunpack.c.l.bf16 %v2245_v16  ;;  %v2220_v23 = vunpack.c.h.bf16 %v2245_v16  ;;  %v2215_v24 = vunpack.c.l.bf16 %v2214_v17  ;;  %v2216_v25 = vunpack.c.h.bf16 %v2214_v17  ;;  %v2247_v26 = vld [vmem:[%s2403_s26 + $0x18] sm:$0xff]   ;;  %391 = vst [vmem:[#allocation2 + $0x40] sm:$0x1] %v390_v19  ;;  %385 = vst [vmem:[#allocation2 + $0x30] sm:$0x1] %v384_v20  ;;  %s2332_s30 = smov 24  }
  0x12   : > { %v2223_v28 = vunpack.c.l.bf16 %v2246_v18  ;;  %v2227_v29 = vunpack.c.l.bf16 %v2247_v26  ;;  %v2228_v30 = vunpack.c.h.bf16 %v2247_v26  ;;  %v2224_v31 = vunpack.c.h.bf16 %v2246_v18  ;;  %v688_v12 = vld [vmem:[#allocation2 + $0x18] sm:$0xf]  ;;  %v694_v16 = vld [vmem:[#allocation2 + $0x20] sm:$0xf]  ;;  %v418_v21 = vld [vmem:[#allocation2 + $0xc] sm:$0x1] }
  0x13   : > { %v284_v32 = vmul.f32 %v2219_v22, %v2394_v9  ;;  %v285_v33 = vmul.f32 %v2220_v23, %v2394_v9  ;;  %vm416_vm4 = vsmask.f32 7938  ;;  %v282_v34 = vmul.f32 %v2215_v24, %v2394_v9  ;;  %v676_v24 = vld [vmem:[#allocation2 + $0x8] sm:$0xf]  ;;  %vm2524_vm9 = vmor %vm1169_vm5, %vm1170_vm8  ;;  %s2333_s6 = smov 8   ;;  %s2334_s7 = smov 20  }
  0x14   : > { %v283_v35 = vmul.f32 %v2216_v25, %v2394_v9  ;;  %v286_v36 = vmul.f32 %v2223_v28, %v2394_v9  ;;  %v288_v37 = vmul.f32 %v2227_v29, %v2394_v9  ;;  %v289_v38 = vmul.f32 %v2228_v30, %v2394_v9  ;;  %vm2452_vm6 = vmand %vm353_vm3, %vm416_vm4  ;;  %v682_v25 = vld [vmem:[#allocation2 + $0x10] sm:$0xf]  ;;  %s2335_s8 = smov 32   ;;  %s2336_s11 = smov 16  }
  0x15   : > { %v287_v39 = vmul.f32 %v2224_v31, %v2394_v9  ;;  %v307_v40 = vadd.f32 %v2426_v27, %v284_v32  ;;  %v308_v41 = vadd.f32 %v2426_v27, %v285_v33  ;;  %v305_v42 = vadd.f32 %v2426_v27, %v282_v34  ;;  %vm2466_vm7 = vmand %vm355_vm0, %vm416_vm4  ;;  %v700_v32 = vld [vmem:[#allocation2 + $0x28] sm:$0xf]  ;;  %s2337_s12 = smov 4   ;;  %s2338_s15 = smov 28  }
  0x16   : > { %v306_v43 = vadd.f32 %v2426_v27, %v283_v35  ;;  %v309_v44 = vadd.f32 %v2426_v27, %v286_v36  ;;  %v311_v45 = vadd.f32 %v2426_v27, %v288_v37  ;;  %v312_v46 = vadd.f32 %v2426_v27, %v289_v38  ;;  %v421_v35 = vld [vmem:[#allocation2 + $0x14] sm:$0x1]  ;;  %s2056_s24 = sshll.u32 %s2375_s19, 4  ;;  %p238_p5 = scmp.lt.s32.totalorder %s2375_s19, 7 }
  0x17   : > { %v310_v47 = vadd.f32 %v2426_v27, %v287_v39  ;;  %v323_v48 = vmax.f32 %v307_v40, 0.0  ;;  %v324_v49 = vmax.f32 %v308_v41, 0.0  ;;  %v321_v50 = vmax.f32 %v305_v42, 0.0  ;;  %v712_v40 = vld [vmem:[#allocation2 + $0x38] sm:$0xf]  ;;  %p233_p4 = scmp.lt.s32.totalorder %s2056_s24, 127 }
  0x18   : > { %v322_v51 = vmax.f32 %v306_v43, 0.0  ;;  %v325_v52 = vmax.f32 %v309_v44, 0.0  ;;  %v327_v53 = vmax.f32 %v311_v45, 0.0  ;;  %v328_v54 = vmax.f32 %v312_v46, 0.0  ;;  %v424_v41 = vld [vmem:[#allocation2 + $0x1c] sm:$0x1] }
  0x19   : > { %v326_v55 = vmax.f32 %v310_v47, 0.0  ;;  %v2183_v56 = vpack.c.bf16 %v323_v48, %v323_v48  ;;  %v2184_v57 = vpack.c.bf16 %v324_v49, %v324_v49  ;;  %v2181_v58 = vpack.c.bf16 %v321_v50, %v321_v50  ;;  %v718_v45 = vld [vmem:[#allocation2 + $0x40] sm:$0xf]  ;;  %v427_v47 = vld [vmem:[#allocation2 + $0x24] sm:$0x1]  ;;  %s3366_s24 = smov (!%p233_p4, %s2056_s24), 127 }
  0x1a   : > { %v2182_v59 = vpack.c.bf16 %v322_v51, %v322_v51  ;;  %v2185_v60 = vpack.c.bf16 %v325_v52, %v325_v52  ;;  %v2187_v61 = vpack.c.bf16 %v327_v53, %v327_v53  ;;  %v2188_v62 = vpack.c.bf16 %v328_v54, %v328_v54  ;;  %v430_v52 = vld [vmem:[#allocation2 + $0x2c] sm:$0x1]  ;;  %v433_v53 = vld [vmem:[#allocation2 + $0x34] sm:$0x1]  ;;  %s2057_s25 = sshll.u32 %s3366_s24, 2  ;;  %s3368_s19 = smov (!%p238_p5, %s2375_s19), 7 }
  0x1b   : > { %v2444_v63 = vpack.c.bf16 %v326_v55, %v326_v55  ;;  %v531_v0 = vshrl.u32 %v2183_v56, 16  ;;  %v534_v2 = vshll.u32 %v2183_v56, 16  ;;  %v539_v3 = vshrl.u32 %v2184_v57, 16  ;;  %s3221_s28 = scalar_lea.vmem %s3351_s4, %s2057_s25 }
  0x1c   : > { %v542_v4 = vshll.u32 %v2184_v57, 16  ;;  %v515_v5 = vshrl.u32 %v2181_v58, 16  ;;  %v518_v6 = vshll.u32 %v2181_v58, 16  ;;  %v523_v7 = vshrl.u32 %v2182_v59, 16  ;;  %v2499_v57 = vld [vmem:[#allocation2] sm:$0xf] }
  0x1d   : > { %v526_v8 = vshll.u32 %v2182_v59, 16  ;;  %v2446_v10 = vrot.slane %v531_v0, 7  ;;  %v2448_v11 = vrot.slane %v539_v3, 7  ;;  %v547_v13 = vshrl.u32 %v2185_v60, 16  ;;  %v2501_v58 = vld [vmem:[#allocation2 + $0x4] sm:$0x1] }
  0x1e   : > { %v550_v14 = vshll.u32 %v2185_v60, 16  ;;  %v2456_v17 = vrot.slane %v515_v5, 7  ;;  %v2458_v18 = vrot.slane %v523_v7, 7  ;;  %v563_v19 = vshrl.u32 %v2187_v61, 16  ;;  %v706_v60 = vld [vmem:[#allocation2 + $0x30] sm:$0xf] }
  0x1f   : > { %v566_v20 = vshll.u32 %v2187_v61, 16  ;;  %v536_v22 = vor.u32 %v534_v2, %v2446_v10  ;;  %v544_v23 = vor.u32 %v542_v4, %v2448_v11  ;;  %v2462_v26 = vrot.slane %v547_v13, 7 }
  0x20   : > { %v571_v28 = vshrl.u32 %v2188_v62, 16  ;;  %v520_v30 = vor.u32 %v518_v6, %v2456_v17  ;;  %v528_v31 = vor.u32 %v526_v8, %v2458_v18  ;;  %v2472_v33 = vrot.slane %v563_v19, 7  ;;  %v2518_v8 = vld [vmem:[%s2403_s26 + $0x20] sm:$0xff]  }
  0x21   : > { %v574_v34 = vshll.u32 %v2188_v62, 16  ;;  %v689_v36 = vsel %vm2452_vm6, %v536_v22, %v688_v12  ;;  %v695_v37 = vsel %vm2452_vm6, %v544_v23, %v694_v16  ;;  %v552_v38 = vor.u32 %v550_v14, %v2462_v26  ;;  %v436_v62 = vld [vmem:[#allocation2 + $0x3c] sm:$0x1] }
  0x22   : > { %v2479_v39 = vrot.slane %v571_v28, 7  ;;  %690 = vst [vmem:[#allocation2 + $0x18] sm:$0xf] %v689_v36  ;;  %696 = vst [vmem:[#allocation2 + $0x20] sm:$0xf] %v695_v37  ;;  %v677_v42 = vsel %vm2452_vm6, %v520_v30, %v676_v24  ;;  %v683_v43 = vsel %vm2452_vm6, %v528_v31, %v682_v25  ;;  %v568_v44 = vor.u32 %v566_v20, %v2472_v33 }
  0x23   : > { %v555_v46 = vshrl.u32 %v2444_v63, 16  ;;  %678 = vst [vmem:[#allocation2 + $0x8] sm:$0xf] %v677_v42  ;;  %684 = vst [vmem:[#allocation2 + $0x10] sm:$0xf] %v683_v43  ;;  %v701_v48 = vsel %vm2452_vm6, %v552_v38, %v700_v32  ;;  %v558_v50 = vshll.u32 %v2444_v63, 16  ;;  %v2231_v25 = vunpack.c.l.bf16 %v2518_v8 }
  0x24   : > { %v576_v49 = vor.u32 %v574_v34, %v2479_v39  ;;  %v419_v51 = vsel %vm2466_vm7, 0, %v418_v21  ;;  %702 = vst [vmem:[#allocation2 + $0x28] sm:$0xf] %v701_v48  ;;  %v713_v54 = vsel %vm2452_vm6, %v568_v44, %v712_v40  ;;  %v422_v56 = vsel %vm2466_vm7, 0, %v421_v35  ;;  %v2568_v40 = vld [vmem:[%s2403_s26 + $0x28] sm:$0xff]  }
  0x25   : > { %v2495_v55 = vrot.slane %v555_v46, 7  ;;  %420 = vst [vmem:[#allocation2 + $0xc] sm:$0x1] %v419_v51  ;;  %714 = vst [vmem:[#allocation2 + $0x38] sm:$0xf] %v713_v54  ;;  %v521_v61 = vrot.slane %v2456_v17, 4 }
  0x26   : > { %v719_v59 = vsel %vm2452_vm6, %v576_v49, %v718_v45  ;;  %423 = vst [vmem:[#allocation2 + $0x14] sm:$0x1] %v422_v56  ;;  %v529_v0 = vrot.slane %v2458_v18, 4  ;;  %v425_v2 = vsel %vm2466_vm7, 0, %v424_v41  ;;  %v428_v3 = vsel %vm2466_vm7, 0, %v427_v47 }
  0x27   : > { %720 = vst [vmem:[#allocation2 + $0x40] sm:$0xf] %v719_v59  ;;  %v560_v63 = vor.u32 %v558_v50, %v2495_v55  ;;  %v2093_v4 = vrot.slane %v2499_v57, 9  ;;  %v1174_v5 = vrot.slane %v2501_v58, 5  ;;  %426 = vst [vmem:[#allocation2 + $0x1c] sm:$0x1] %v425_v2 }
  0x28   : > { %v537_v6 = vrot.slane %v2446_v10, 4  ;;  %429 = vst [vmem:[#allocation2 + $0x24] sm:$0x1] %v428_v3  ;;  %v431_v7 = vsel %vm2466_vm7, 0, %v430_v52  ;;  %v545_v14 = vrot.slane %v2448_v11, 4  ;;  %v434_v10 = vsel %vm2466_vm7, 0, %v433_v53 }
  0x29   : > { %v707_v12 = vsel %vm2452_vm6, %v560_v63, %v706_v60  ;;  %432 = vst [vmem:[#allocation2 + $0x2c] sm:$0x1] %v431_v7  ;;  %v437_v16 = vsel %vm2466_vm7, 0, %v436_v62  ;;  %v2533_v17 = vld [vmem:[#allocation2 + $0x18] sm:$0xf]  ;;  %v553_v19 = vrot.slane %v2462_v26, 4  ;;  %v2554_v31 = vsel %vm2524_vm9, %v2093_v4, %v1174_v5 }
  0x2a   : > { %v2535_v18 = vld [vmem:[#allocation2 + $0x20] sm:$0xf]  ;;  %708 = vst [vmem:[#allocation2 + $0x30] sm:$0xf] %v707_v12  ;;  %435 = vst [vmem:[#allocation2 + $0x34] sm:$0x1] %v434_v10  ;;  %v290_v52 = vmul.f32 %v2231_v25, %v2394_v9  ;;  %v2232_v53 = vunpack.c.h.bf16 %v2518_v8  ;;  %v2235_v4 = vunpack.c.l.bf16 %v2568_v40 }
  0x2b   : > { %438 = vst [vmem:[#allocation2 + $0x3c] sm:$0x1] %v437_v16  ;;  %v561_v20 = vrot.slane %v2495_v55, 4  ;;  %v2118_v11 = vcombine.low %v2533_v17, %v2535_v18  ;;  %v2541_v21 = vld [vmem:[#allocation2 + $0x8] sm:$0xf]  ;;  %v569_v23 = vrot.slane %v2472_v33, 4 }
  0x2c   : > { %v2543_v22 = vld [vmem:[#allocation2 + $0x10] sm:$0xf]  ;;  %v873_v24 = vshrl.u32 %v2499_v57, 16  ;;  %v2550_v28 = vld [vmem:[#allocation2 + $0x28] sm:$0xf]  ;;  %v2096_v32 = vrot.slane %v2533_v17, 9  ;;  %v2613_v8 = vadd.f32 %v2426_v27, %v290_v52  ;;  %v2618_v16 = vmul.f32 %v2232_v53, %v2394_v9 }
  0x2d   : > { %v2117_v26 = vcombine.low %v2541_v21, %v2543_v22  ;;  %v679_v30 = vld [vmem:[#allocation2 + $0xc] sm:$0x1]  ;;  %v2097_v34 = vrot.slane %v2535_v18, 9  ;;  %1307 = vrot.lane.b32.xlu1 %v2118_v11, %s2331_s29  ;;  %v2561_v33 = vcombine.low %v2535_v18, %v2550_v28  ;;  %v685_v36 = vld [vmem:[#allocation2 + $0x14] sm:$0x1]  ;;  %v2094_v37 = vrot.slane %v2541_v21, 9 }
  0x2e   : > { %v680_v35 = vsel %vm2381_vm2, %v521_v61, %v679_v30  ;;  %v915_v38 = vshrl.u32 %v2533_v17, 16  ;;  %v2573_v41 = vcombine.low %v2543_v22, %v2533_v17  ;;  %v2575_v42 = vld [vmem:[#allocation2 + $0x38] sm:$0xf]  ;;  %v2577_v43 = vld [vmem:[#allocation2 + $0x40] sm:$0xf]  ;;  %v686_v44 = vsel %vm2381_vm2, %v529_v0, %v685_v36 }
  0x2f   : > { %1305 = vrot.lane.b32.xlu0 %v2117_v26, %s2331_s29  ;;  %681 = vst [vmem:[#allocation2 + $0xc] sm:$0x1] %v680_v35  ;;  %v2095_v45 = vrot.slane %v2543_v22, 9  ;;  %v918_v46 = vshll.u32 %v2533_v17, 16  ;;  %v2583_v47 = vld [vmem:[#allocation2 + $0x48] sm:$0xf]  ;;  %v2120_v61 = vcombine.low %v2575_v42, %v2577_v43 }
  0x30   : > { %687 = vst [vmem:[#allocation2 + $0x14] sm:$0x1] %v686_v44  ;;  %v691_v48 = vld [vmem:[#allocation2 + $0x1c] sm:$0x1]  ;;  %v697_v49 = vld [vmem:[#allocation2 + $0x24] sm:$0x1]  ;;  %v2143_v3 = vcombine.low %v2577_v43, %v2583_v47 }
  0x31   : > { %v2098_v50 = vrot.slane %v2550_v28, 9  ;;  %v2100_v51 = vrot.slane %v2575_v42, 9  ;;  %v692_v54 = vsel %vm2381_vm2, %v537_v6, %v691_v48  ;;  %v698_v55 = vsel %vm2381_vm2, %v545_v14, %v697_v49  ;;  %v703_v56 = vld [vmem:[#allocation2 + $0x2c] sm:$0x1]  ;;  %1470 = vrot.lane.b32.xlu1 %v2561_v33, %s2332_s30  ;;  %v2597_v62 = vld [vmem:[#allocation2 + $0x30] sm:$0xf] }
  0x32   : > { %v917_v59 = vrot.slane %v915_v38, 4  ;;  %v920_v60 = vrot.slane %v918_v46, 5  ;;  %693 = vst [vmem:[#allocation2 + $0x1c] sm:$0x1] %v692_v54  ;;  %699 = vst [vmem:[#allocation2 + $0x24] sm:$0x1] %v698_v55  ;;  %v704_v63 = vsel %vm2381_vm2, %v553_v19, %v703_v56  ;;  %v2119_v5 = vcombine.low %v2550_v28, %v2597_v62 }
  0x33   : > { %v709_v0 = vld [vmem:[#allocation2 + $0x34] sm:$0x1]  ;;  %v715_v2 = vld [vmem:[#allocation2 + $0x3c] sm:$0x1]  ;;  %1468 = vrot.lane.b32.xlu0 %v2573_v41, %s2332_s30  ;;  %705 = vst [vmem:[#allocation2 + $0x2c] sm:$0x1] %v704_v63 }
  0x34   : > { %v710_v6 = vsel %vm2381_vm2, %v561_v20, %v709_v0  ;;  %v716_v7 = vsel %vm2381_vm2, %v569_v23, %v715_v2  ;;  %vm869_vm10 = vsmask.f32 3328  ;;  %vm870_vm11 = vsmask.f32 7440 }
  0x35   : > { %711 = vst [vmem:[#allocation2 + $0x34] sm:$0x1] %v710_v6  ;;  %717 = vst [vmem:[#allocation2 + $0x3c] sm:$0x1] %v716_v7  ;;  %v921_v12 = vor.u32 %v920_v60, %v917_v59  ;;  %v929_v14 = vshrl.u32 %v2535_v18, 16  ;;  %v932_v10 = vshll.u32 %v2535_v18, 16  ;;  %1311 = vrot.lane.b32.xlu1 %v2120_v61, %s2331_s29 }
  0x36   : > { %v875_v19 = vrot.slane %v873_v24, 4  ;;  %v876_v20 = vshll.u32 %v2499_v57, 16  ;;  %v887_v11 = vshrl.u32 %v2541_v21, 16  ;;  %v890_v23 = vshll.u32 %v2541_v21, 16  ;;  %v775_v25 = vld [vmem:[#allocation2 + $0xc] sm:$0x1]  ;;  %vm2676_vm12 = vmor %vm869_vm10, %vm870_vm11 }
  0x37   : > { %v2099_v26 = vrot.slane %v2597_v62, 9  ;;  %v931_v30 = vrot.slane %v929_v14, 4  ;;  %v934_v35 = vrot.slane %v932_v10, 5  ;;  %v882_v36 = vshll.u32 %v2501_v58, 16  ;;  %1309 = vrot.lane.b32.xlu0 %v2119_v5, %s2331_s29  ;;  %v2627_v38 = vld [vmem:[#allocation2 + $0x14] sm:$0x1] }
  0x38   : > { %v1178_v24 = vrot.slane %v775_v25, 5  ;;  %v922_v44 = vrot.slane %v921_v12, 4  ;;  %v878_v57 = vrot.slane %v876_v20, 5  ;;  %v889_v46 = vrot.slane %v887_v11, 4 }
  0x39   : > { %v1182_v48 = vrot.slane %v2627_v38, 5  ;;  %v935_v49 = vor.u32 %v934_v35, %v931_v30  ;;  %v892_v52 = vrot.slane %v890_v23, 5  ;;  %v943_v53 = vshrl.u32 %v2550_v28, 16  ;;  %v779_v58 = vld [vmem:[#allocation2 + $0x1c] sm:$0x1] }
  0x3a   : > { %v1179_v54 = vsel %vm2524_vm9, %v2094_v37, %v1178_v24  ;;  %v781_v55 = vld [vmem:[#allocation2 + $0x24] sm:$0x1]  ;;  %v879_v56 = vor.u32 %v878_v57, %v875_v19  ;;  %v896_v59 = vshll.u32 %v775_v25, 16  ;;  %v946_v60 = vshll.u32 %v2550_v28, 16  ;;  %v783_v2 = vld [vmem:[#allocation2 + $0x2c] sm:$0x1] }
  0x3b   : > { %v1183_v61 = vsel %vm2524_vm9, %v2095_v45, %v1182_v48  ;;  %v2109_v63 = vcombine.low %v2554_v31, %v1179_v54  ;;  %v1186_v0 = vrot.slane %v779_v58, 5  ;;  %v1190_v5 = vrot.slane %v781_v55, 5 }
  0x3c   : > { %v2135_v21 = vcombine.low %v1179_v54, %v1183_v61  ;;  %v1194_v6 = vrot.slane %v783_v2, 5  ;;  %v2641_v7 = vld [vmem:[#allocation2 + $0x34] sm:$0x1]  ;;  %v2643_v37 = vld [vmem:[#allocation2 + $0x3c] sm:$0x1]  ;;  %v924_v12 = vshll.u32 %v779_v58, 16  ;;  %v893_v14 = vor.u32 %v892_v52, %v889_v46 }
  0x3d   : > { %1260 = vrot.lane.b32.xlu1 %v2109_v63, %s2333_s6  ;;  %v1187_v45 = vsel %vm2524_vm9, %v2096_v32, %v1186_v0  ;;  %v1191_v31 = vsel %vm2524_vm9, %v2097_v34, %v1190_v5  ;;  %v1198_v10 = vrot.slane %v2641_v7, 5  ;;  %v1202_v19 = vrot.slane %v2643_v37, 5 }
  0x3e   : > { %1429 = vrot.lane.b32.xlu0 %v2135_v21, %s2334_s7  ;;  %v2110_v20 = vcombine.low %v1183_v61, %v1187_v45  ;;  %v2661_v17 = vsel %vm2524_vm9, %v2098_v50, %v1194_v6  ;;  %v884_v32 = vrot.slane %v882_v36, 5  ;;  %v945_v11 = vrot.slane %v943_v53, 4  ;;  %v439_v6 = vld [vmem:[#allocation2 + $0x44] sm:$0x1] }
  0x3f   : > { %v2136_v18 = vcombine.low %v1187_v45, %v1191_v31  ;;  %v2665_v34 = vsel %vm2524_vm9, %v2099_v26, %v1198_v10  ;;  %v2671_v23 = vsel %vm2524_vm9, %v2100_v51, %v1202_v19  ;;  %v926_v25 = vrot.slane %v924_v12, 5 }
  0x40   : > { %v2111_v28 = vcombine.low %v1191_v31, %v2661_v17  ;;  %v936_v30 = vrot.slane %v935_v49, 4  ;;  %v938_v35 = vshll.u32 %v781_v55, 16  ;;  %v880_v36 = vrot.slane %v879_v56, 4 }
  0x41   : > { %1262 = vrot.lane.b32.xlu1 %v2110_v20, %s2333_s6  ;;  %v894_v26 = vrot.slane %v893_v14, 4  ;;  %v898_v24 = vrot.slane %v896_v59, 5  ;;  %v948_v57 = vrot.slane %v946_v60, 5  ;;  %v952_v46 = vshll.u32 %v783_v2, 16 }
  0x42   : > { %1580 = vrot.lane.b32.xlu0 %v2110_v20, %s2335_s8  ;;  %v2684_v51 = vcombine.low %v2665_v34, %v2671_v23  ;;  %v940_v48 = vrot.slane %v938_v35, 5  ;;  %v901_v52 = vshrl.u32 %v2543_v22, 16  ;;  %v904_v49 = vshll.u32 %v2543_v22, 16 }
  0x43   : > { %v927_v53 = vsel %vm2676_vm12, %v922_v44, %v926_v25  ;;  %v885_v54 = vsel %vm2676_vm12, %v880_v36, %v884_v32  ;;  %v949_v58 = vor.u32 %v948_v57, %v945_v11  ;;  %v910_v55 = vshll.u32 %v2627_v38, 16 }
  0x44   : > { %v2695_v56 = vsel %vm2676_vm12, %v894_v26, %v898_v24  ;;  %v954_v59 = vrot.slane %v952_v46, 5  ;;  %v903_v60 = vrot.slane %v901_v52, 4  ;;  %v906_v61 = vrot.slane %v904_v49, 5  ;;  %v2731_v46 = vld [vmem:[#allocation2 + $0x4c] sm:$0x1] }
  0x45   : > { %1431 = vrot.lane.b32.xlu1 %v2136_v18, %s2334_s7  ;;  %v941_v22 = vsel %vm2676_vm12, %v936_v30, %v940_v48  ;;  %v950_v63 = vrot.slane %v949_v58, 4  ;;  %v912_v44 = vrot.slane %v910_v55, 5  ;;  %v957_v0 = vshrl.u32 %v2597_v62, 16  ;;  %v2315_v58 = vld [vmem:[%s3350_s3] sm:$0xff]  }
  0x46   : > { %1582 = vrot.lane.b32.xlu0 %v2111_v28, %s2335_s8  ;;  %v907_v2 = vor.u32 %v906_v61, %v903_v60  ;;  %v960_v38 = vshll.u32 %v2597_v62, 16  ;;  %v966_v5 = vshll.u32 %v2641_v7, 16  ;;  %v971_v21 = vshrl.u32 %v2575_v42, 16  ;;  %v442_v61 = vld [vmem:[#allocation2 + $0x5c] sm:$0x1]  ;;  %2263 = vmatprep.subr.bf16.mxu0 %v2315_v58 }
  0x47   : > { %v959_v12 = vrot.slane %v957_v0, 4  ;;  %v974_v14 = vshll.u32 %v2575_v42, 16  ;;  %v980_v45 = vshll.u32 %v2643_v37, 16  ;;  %v2710_v31 = vmul.f32 %v2235_v4, %v2394_v9  ;;  %v2754_v0 = vld [vmem:[#allocation2 + $0x50] sm:$0xf]  ;;  %2264 = vmatpush3.bf16.msra.mxu0 %v2315_v58  ;;  %2285 = vmatprep.subr.bf16.mxu1 %v2315_v58 }
  0x48   : > { %v2085_v10 = vcombine.low %v885_v54, %v2695_v56  ;;  %v2715_v19 = vsel %vm2676_vm12, %v950_v63, %v954_v59  ;;  %v908_v7 = vrot.slane %v907_v2, 4  ;;  %v962_v20 = vrot.slane %v960_v38, 5  ;;  %v392_v54 = vld [vmem:[#allocation2 + $0x58] sm:$0x1]  ;;  %2288 = vmatpush3.bf16.msra.mxu1 %v2315_v58 }
  0x49   : > { %1266 = vrot.lane.b32.xlu1 %v2684_v51, %s2333_s6  ;;  %v2126_v32 = vcombine.low %v927_v53, %v941_v22  ;;  %v973_v11 = vrot.slane %v971_v21, 4  ;;  %v976_v18 = vrot.slane %v974_v14, 5  ;;  %v440_v37 = vsel %vm2466_vm7, 0, %v439_v6 }
  0x4a   : > { %1264 = vrot.lane.b32.xlu0 %v2111_v28, %s2333_s6  ;;  %v2724_v4 = vsel %vm2676_vm12, %v908_v7, %v912_v44  ;;  %v963_v25 = vor.u32 %v962_v20, %v959_v12  ;;  %v968_v30 = vrot.slane %v966_v5, 5  ;;  %441 = vst [vmem:[#allocation2 + $0x44] sm:$0x1] %v440_v37  ;;  %v1339_v35 = vshrl.u32 %v2577_v43, 16 }
  0x4b   : > { %v2728_v36 = vcombine.low %v941_v22, %v2715_v19  ;;  %v977_v26 = vor.u32 %v976_v18, %v973_v11  ;;  %v982_v24 = vrot.slane %v980_v45, 5  ;;  %v1342_v57 = vshll.u32 %v2577_v43, 16  ;;  %v2773_v45 = vld [vmem:[#allocation2 + $0x54] sm:$0x1] }
  0x4c   : > { %v2734_v28 = vcombine.low %v2724_v4, %v927_v53  ;;  %v964_v48 = vrot.slane %v963_v25, 4  ;;  %v577_v52 = vrot.slane %v2479_v39, 4  ;;  %v2737_v49 = vrot.slane %v1339_v35, 4 }
  0x4d   : > { %1378 = vrot.lane.b32.xlu1 %v2126_v32, %s2336_s11  ;;  %v2125_v55 = vcombine.low %v2695_v56, %v2724_v4  ;;  %v978_v59 = vrot.slane %v977_v26, 4  ;;  %v1344_v60 = vrot.slane %v1342_v57, 5  ;;  %v1502_v53 = vshrl.u32 %v2583_v47, 16  ;;  %v2316_v56 = vld [vmem:[%s3350_s3 + $0x8] sm:$0xff]   ;;  %v395_v4 = vld [vmem:[#allocation2 + $0x60] sm:$0x1] }
  0x4e   : > { %1120 = vrot.lane.b32.xlu0 %v2085_v10, %s2337_s12  ;;  %v2749_v39 = vsel %vm2676_vm12, %v964_v48, %v968_v30  ;;  %v1505_v22 = vshll.u32 %v2583_v47, 16  ;;  %v1511_v63 = vshll.u32 %v2731_v46, 16  ;;  %v329_v44 = vmax.f32 %v2613_v8, 0.0  ;;  %2265 = vmatprep.subr.bf16.mxu0 %v2316_v56 }
  0x4f   : > { %v2761_v2 = vsel %vm2676_vm12, %v978_v59, %v982_v24  ;;  %v2137_v38 = vcombine.low %v2661_v17, %v2665_v34  ;;  %v2133_v5 = vrot.slane %v2577_v43, 9  ;;  %v1504_v21 = vrot.slane %v1502_v53, 4  ;;  %2286 = vmatprep.subr.bf16.mxu1 %v2316_v56  ;;  %v398_v24 = vld [vmem:[#allocation2 + $0x68] sm:$0x1]  ;;  %2266 = vmatpush3.bf16.msra.mxu0 %v2316_v56  ;;  %v445_v53 = vld [vmem:[#allocation2 + $0x64] sm:$0x1] }
  0x50   : > { %v1345_v8 = vor.u32 %v1344_v60, %v2737_v49  ;;  %v2769_v6 = vcombine.low %v2597_v62, %v2575_v42  ;;  %v1507_v12 = vrot.slane %v1505_v22, 5  ;;  %v393_v14 = vsel %vm2381_vm2, 0, %v392_v54  ;;  %2289 = vmatpush3.bf16.msra.mxu1 %v2316_v56 }
  0x51   : > { %1535 = vrot.lane.b32.xlu1 %v2728_v36, %s2338_s15  ;;  %v2779_v10 = vcombine.low %v2749_v39, %v2761_v2  ;;  %v721_v7 = vld [vmem:[#allocation2 + $0x44] sm:$0x1]  ;;  %394 = vst [vmem:[#allocation2 + $0x58] sm:$0x1] %v393_v14  ;;  %v443_v42 = vsel %vm2466_vm7, 0, %v442_v61  ;;  %v2189_v62 = vpack.c.bf16 %v329_v44, %v329_v44  ;;  %v985_v20 = vshrl.u32 %v2754_v0, 16 }
  0x52   : > { %1122 = vrot.lane.b32.xlu0 %v2734_v28, %s2337_s12  ;;  %v722_v32 = vsel %vm2381_vm2, %v577_v52, %v721_v7  ;;  %v1508_v11 = vor.u32 %v1507_v12, %v1504_v21  ;;  %v2788_v18 = vrot.slane %v1511_v63, 5  ;;  %444 = vst [vmem:[#allocation2 + $0x5c] sm:$0x1] %v443_v42  ;;  %v988_v37 = vshll.u32 %v2754_v0, 16  ;;  %v448_v61 = vld [vmem:[#allocation2 + $0x6c] sm:$0x1] }
  0x53   : > { %723 = vst [vmem:[#allocation2 + $0x44] sm:$0x1] %v722_v32  ;;  %v579_v25 = vshrl.u32 %v2189_v62, 16  ;;  %v582_v30 = vshll.u32 %v2189_v62, 16  ;;  %v987_v35 = vrot.slane %v985_v20, 4  ;;  %v994_v26 = vshll.u32 %v2773_v45, 16 }
  0x54   : > { %v2792_v57 = vrot.slane %v1508_v11, 4  ;;  %v990_v48 = vrot.slane %v988_v37, 5  ;;  %v2147_v52 = vrot.slane %v2583_v47, 9  ;;  %v1570_v49 = vrot.slane %v2731_v46, 5  ;;  %v401_v21 = vld [vmem:[#allocation2 + $0x70] sm:$0x1] }
  0x55   : > { %1124 = vrot.lane.b32.xlu1 %v2728_v36, %s2337_s12  ;;  %v581_v54 = vrot.slane %v579_v25, 7  ;;  %v314_v58 = vadd.f32 %v2426_v27, %v2618_v16  ;;  %v315_v59 = vadd.f32 %v2426_v27, %v2710_v31  ;;  %v396_v60 = vsel %vm2381_vm2, 0, %v395_v4 }
  0x56   : > { %1376 = vrot.lane.b32.xlu0 %v2125_v55, %s2336_s11  ;;  %v2127_v46 = vcombine.low %v2715_v19, %v2749_v39  ;;  %v1346_v22 = vrot.slane %v1345_v8, 4  ;;  %v991_v63 = vor.u32 %v990_v48, %v987_v35  ;;  %397 = vst [vmem:[#allocation2 + $0x60] sm:$0x1] %v396_v60  ;;  %v399_v36 = vsel %vm2381_vm2, 0, %v398_v24 }
  0x57   : > { %v584_v16 = vor.u32 %v582_v30, %v581_v54  ;;  %v585_v44 = vrot.slane %v581_v54, 4  ;;  %v330_v56 = vmax.f32 %v314_v58, 0.0  ;;  %v331_v31 = vmax.f32 %v315_v59, 0.0  ;;  %400 = vst [vmem:[#allocation2 + $0x68] sm:$0x1] %v399_v36  ;;  %v2839_v58 = vld [vmem:[%s2403_s26 + $0x30] sm:$0xff]  }
  0x58   : > { %v1514_v55 = vsel %vm2676_vm12, %v2792_v57, %v2788_v18  ;;  %v724_v12 = vld [vmem:[#allocation2 + $0x58] sm:$0xf]  ;;  %v2813_v14 = vrot.slane %v994_v26, 5  ;;  %v446_v19 = vsel %vm2466_vm7, 0, %v445_v53  ;;  %v449_v39 = vsel %vm2466_vm7, 0, %v448_v61 }
  0x59   : > { %1126 = vrot.lane.b32.xlu1 %v2779_v10, %s2337_s12  ;;  %v725_v8 = vsel %vm2452_vm6, %v584_v16, %v724_v12  ;;  %v727_v7 = vld [vmem:[#allocation2 + $0x5c] sm:$0x1]  ;;  %v2825_v42 = vsel %vm2524_vm9, %v2147_v52, %v1570_v49  ;;  %447 = vst [vmem:[#allocation2 + $0x64] sm:$0x1] %v446_v19  ;;  %450 = vst [vmem:[#allocation2 + $0x6c] sm:$0x1] %v449_v39  ;;  %v2190_v62 = vpack.c.bf16 %v330_v56, %v330_v56 }
  0x5a   : > { %v2191_v20 = vpack.c.bf16 %v331_v31, %v331_v31  ;;  %1533 = vrot.lane.b32.xlu0 %v2734_v28, %s2338_s15  ;;  %v789_v32 = vld [vmem:[#allocation2 + $0x44] sm:$0x1]  ;;  %726 = vst [vmem:[#allocation2 + $0x58] sm:$0xf] %v725_v8  ;;  %v728_v11 = vsel %vm2381_vm2, %v585_v44, %v727_v7  ;;  %v2831_v37 = vrot.slane %v991_v63, 4  ;;  %v2236_v4 = vunpack.c.h.bf16 %v2568_v40 }
  0x5b   : > { %v402_v25 = vsel %vm2381_vm2, 0, %v401_v21  ;;  %v451_v30 = vld [vmem:[#allocation2 + $0x74] sm:$0x1]  ;;  %v1348_v35 = vshll.u32 %v789_v32, 16  ;;  %v1413_v26 = vrot.slane %v789_v32, 5  ;;  %v587_v24 = vshrl.u32 %v2190_v62, 16 }
  0x5c   : > { %729 = vst [vmem:[#allocation2 + $0x5c] sm:$0x1] %v728_v11  ;;  %v590_v48 = vshll.u32 %v2190_v62, 16  ;;  %403 = vst [vmem:[#allocation2 + $0x70] sm:$0x1] %v402_v25  ;;  %v595_v28 = vshrl.u32 %v2191_v20, 16  ;;  %v293_v54 = vmul.f32 %v2236_v4, %v2394_v9  ;;  %v997_v61 = vsel %vm2676_vm12, %v2831_v37, %v2813_v14 }
  0x5d   : > { %v598_v52 = vshll.u32 %v2191_v20, 16  ;;  %v2101_v49 = vrot.slane %v2754_v0, 9  ;;  %v1350_v59 = vrot.slane %v1348_v35, 5  ;;  %v2845_v40 = vsel %vm2524_vm9, %v2133_v5, %v1413_v26  ;;  %v730_v36 = vld [vmem:[#allocation2 + $0x60] sm:$0xf] }
  0x5e   : > { %v589_v60 = vrot.slane %v587_v24, 7  ;;  %v452_v53 = vsel %vm2466_vm7, 0, %v451_v30  ;;  %1380 = vrot.lane.b32.xlu0 %v2127_v46, %s2336_s11  ;;  %v597_v63 = vrot.slane %v595_v28, 7  ;;  %v1206_v16 = vrot.slane %v2773_v45, 5  ;;  %v736_v21 = vld [vmem:[#allocation2 + $0x68] sm:$0xf] }
  0x5f   : > { %v316_v44 = vadd.f32 %v2426_v27, %v293_v54  ;;  %453 = vst [vmem:[#allocation2 + $0x74] sm:$0x1] %v452_v53  ;;  %v1351_v5 = vsel %vm2676_vm12, %v1346_v22, %v1350_v59  ;;  %v2239_v46 = vunpack.c.l.bf16 %v2839_v58  ;;  %v2138_v19 = vcombine.low %v2671_v23, %v2845_v40  ;;  %v404_v4 = vld [vmem:[#allocation2 + $0x78] sm:$0x1]  ;;  %v407_v24 = vld [vmem:[#allocation2 + $0x80] sm:$0x1] }
  0x60   : > { %v592_v56 = vor.u32 %v590_v48, %v589_v60  ;;  %v593_v31 = vrot.slane %v589_v60, 4  ;;  %v2128_v12 = vcombine.low %v2761_v2, %v1351_v5  ;;  %v600_v39 = vor.u32 %v598_v52, %v597_v63  ;;  %v733_v7 = vld [vmem:[#allocation2 + $0x64] sm:$0x1]  ;;  %v739_v45 = vld [vmem:[#allocation2 + $0x6c] sm:$0x1]  ;;  %v2890_v59 = vld [vmem:[%s2403_s26 + $0x38] sm:$0xff]  }
  0x61   : > { %v601_v8 = vrot.slane %v597_v63, 4  ;;  %v2862_v62 = vld [vmem:[#allocation2 + $0x58] sm:$0xf]  ;;  %v332_v32 = vmax.f32 %v316_v44, 0.0  ;;  %v294_v11 = vmul.f32 %v2239_v46, %v2394_v9  ;;  %v2149_v26 = vcombine.low %v2845_v40, %v2825_v42  ;;  %v410_v60 = vld [vmem:[#allocation2 + $0x88] sm:$0x1] }
  0x62   : > { %v731_v20 = vsel %vm2452_vm6, %v592_v56, %v730_v36  ;;  %v734_v22 = vsel %vm2381_vm2, %v593_v31, %v733_v7  ;;  %1382 = vrot.lane.b32.xlu1 %v2128_v12, %s2336_s11  ;;  %1433 = vrot.lane.b32.xlu0 %v2137_v38, %s2334_s7  ;;  %v999_v2 = vshrl.u32 %v2862_v62, 16  ;;  %v1002_v25 = vshll.u32 %v2862_v62, 16  ;;  %v454_v38 = vld [vmem:[#allocation2 + $0x7c] sm:$0x1] }
  0x63   : > { %v795_v23 = vld [vmem:[#allocation2 + $0x5c] sm:$0x1]  ;;  %732 = vst [vmem:[#allocation2 + $0x60] sm:$0xf] %v731_v20  ;;  %735 = vst [vmem:[#allocation2 + $0x64] sm:$0x1] %v734_v22  ;;  %v737_v30 = vsel %vm2452_vm6, %v600_v39, %v736_v21  ;;  %v740_v9 = vsel %vm2381_vm2, %v601_v8, %v739_v45  ;;  %v2884_v17 = vsel %vm2524_vm9, %v2101_v49, %v1206_v16  ;;  %v2240_v46 = vunpack.c.h.bf16 %v2839_v58 }
  0x64   : > { %v1008_v35 = vshll.u32 %v795_v23, 16  ;;  %738 = vst [vmem:[#allocation2 + $0x68] sm:$0xf] %v737_v30  ;;  %741 = vst [vmem:[#allocation2 + $0x6c] sm:$0x1] %v740_v9  ;;  %v2192_v34 = vpack.c.bf16 %v332_v32, %v332_v32  ;;  %v1001_v48 = vrot.slane %v999_v2, 4  ;;  %v317_v52 = vadd.f32 %v2426_v27, %v294_v11 }
  0x65   : > { %v1004_v28 = vrot.slane %v1002_v25, 5  ;;  %v405_v54 = vsel %vm2381_vm2, 0, %v404_v4  ;;  %v2102_v53 = vrot.slane %v2862_v62, 9  ;;  %v1210_v63 = vrot.slane %v795_v23, 5  ;;  %v457_v49 = vld [vmem:[#allocation2 + $0x84] sm:$0x1] }
  0x66   : > { %v603_v36 = vshrl.u32 %v2192_v34, 16  ;;  %v606_v44 = vshll.u32 %v2192_v34, 16  ;;  %406 = vst [vmem:[#allocation2 + $0x78] sm:$0x1] %v405_v54  ;;  %1435 = vrot.lane.b32.xlu1 %v2138_v19, %s2334_s7  ;;  %1472 = vrot.lane.b32.xlu0 %v2769_v6, %s2332_s30  ;;  %v1010_v27 = vrot.slane %v1008_v35, 5  ;;  %v333_v56 = vmax.f32 %v317_v52, 0.0 }
  0x67   : > { %v1005_v16 = vor.u32 %v1004_v28, %v1001_v48  ;;  %v455_v31 = vsel %vm2466_vm7, 0, %v454_v38  ;;  %v2243_v12 = vunpack.c.l.bf16 %v2890_v59  ;;  %v408_v39 = vsel %vm2381_vm2, 0, %v407_v24  ;;  %v2318_v2 = vld [vmem:[%s3348_s1] ss:$0 sm:$0xff]  ;;  %v742_v25 = vld [vmem:[#allocation2 + $0x70] sm:$0xf] }
  0x68   : > { %v605_v21 = vrot.slane %v603_v36, 7  ;;  %456 = vst [vmem:[#allocation2 + $0x7c] sm:$0x1] %v455_v31  ;;  %v2145_v19 = vcombine.low %v1351_v5, %v1514_v55  ;;  %409 = vst [vmem:[#allocation2 + $0x80] sm:$0x1] %v408_v39  ;;  %v411_v7 = vsel %vm2381_vm2, 0, %v410_v60  ;;  %v2915_v22 = vsel %vm2524_vm9, %v2102_v53, %v1210_v63 }
  0x69   : > { %v1006_v8 = vrot.slane %v1005_v16, 4  ;;  %v458_v45 = vsel %vm2466_vm7, 0, %v457_v49  ;;  %v2917_v4 = vpack.c.bf16 %v333_v56, %v333_v56  ;;  %412 = vst [vmem:[#allocation2 + $0x88] sm:$0x1] %v411_v7  ;;  %v295_v43 = vmul.f32 %v2318_v2, %v2240_v46  ;;  %v745_v24 = vld [vmem:[#allocation2 + $0x74] sm:$0x1] }
  0x6a   : > { %v2911_v58 = vld [vmem:[#allocation2 + $0x60] sm:$0xf]  ;;  %v797_v20 = vld [vmem:[#allocation2 + $0x64] sm:$0x1]  ;;  %v608_v32 = vor.u32 %v606_v44, %v605_v21  ;;  %v609_v11 = vrot.slane %v605_v21, 4  ;;  %1474 = vrot.lane.b32.xlu1 %v2143_v3, %s2332_s30  ;;  %1537 = vrot.lane.b32.xlu0 %v2779_v10, %s2338_s15  ;;  %v296_v30 = vmul.f32 %v2318_v2, %v2243_v12  ;;  %vm860_vm13 = vcmask 31744  }
  0x6b   : > { %459 = vst [vmem:[#allocation2 + $0x84] sm:$0x1] %v458_v45  ;;  %v2927_v18 = vsel %vm2676_vm12, %v1006_v8, %v1010_v27  ;;  %v2929_v57 = vld [vmem:[#allocation2 + $0x68] sm:$0xf]  ;;  %v799_v55 = vld [vmem:[#allocation2 + $0x6c] sm:$0x1]  ;;  %v2113_v27 = vcombine.low %v2884_v17, %v2915_v22 }
  0x6c   : > { %v1013_v5 = vshrl.u32 %v2911_v58, 16  ;;  %v1016_v23 = vshll.u32 %v2911_v58, 16  ;;  %v1022_v47 = vshll.u32 %v797_v20, 16  ;;  %v1027_v3 = vshrl.u32 %v2929_v57, 16  ;;  %v460_v49 = vld [vmem:[#allocation2 + $0x8c] sm:$0x1] }
  0x6d   : > { %v1030_v10 = vshll.u32 %v2929_v57, 16  ;;  %v2089_v9 = vcombine.low %v997_v61, %v2927_v18  ;;  %v1036_v38 = vshll.u32 %v799_v55, 16  ;;  %v2103_v52 = vrot.slane %v2911_v58, 9  ;;  %v413_v12 = vld [vmem:[#allocation2 + $0x90] sm:$0x1]  ;;  %862 = vst.msk [vmem:[#allocation3 + $0x8] sm:$0xff] %vm860_vm13, %v2573_v41 }
  0x6e   : > { %v1015_v35 = vrot.slane %v1013_v5, 4  ;;  %v1018_v34 = vrot.slane %v1016_v23, 5  ;;  %v1029_v48 = vrot.slane %v1027_v3, 4  ;;  %v1214_v54 = vrot.slane %v797_v20, 5  ;;  %1539 = vrot.lane.b32.xlu1 %v2145_v19, %s2338_s15  ;;  %1584 = vrot.lane.b32.xlu0 %v2684_v51, %s2335_s8  ;;  %v2319_v39 = vld [vmem:[%s3349_s2] ss:$0 sm:$0xff] }
  0x6f   : > { %v1032_v28 = vrot.slane %v1030_v10, 5  ;;  %v1024_v53 = vrot.slane %v1022_v47, 5  ;;  %v1038_v63 = vrot.slane %v1036_v38, 5  ;;  %v2104_v14 = vrot.slane %v2929_v57, 9  ;;  %v463_v45 = vld [vmem:[#allocation2 + $0x94] sm:$0x1] }
  0x70   : > { %v1019_v60 = vor.u32 %v1018_v34, %v1015_v35  ;;  %v1218_v61 = vrot.slane %v799_v55, 5  ;;  %v743_v36 = vsel %vm2452_vm6, %v608_v32, %v742_v25  ;;  %v746_v44 = vsel %vm2381_vm2, %v609_v11, %v745_v24  ;;  %863 = vst.msk [vmem:[#allocation3 + $0x10] sm:$0xff] %vm860_vm13, %v2561_v33  ;;  %864 = vst.msk [vmem:[#allocation3 + $0x18] sm:$0xff] %vm860_vm13, %v2769_v6  ;;  %v2321_v33 = vld [vmem:[#allocation2 + $0x8] sm:$0xf] }
  0x71   : > { %v1033_v37 = vor.u32 %v1032_v28, %v1029_v48  ;;  %v2121_v51 = vcombine.low %v2862_v62, %v2911_v58  ;;  %744 = vst [vmem:[#allocation2 + $0x70] sm:$0xf] %v743_v36  ;;  %747 = vst [vmem:[#allocation2 + $0x74] sm:$0x1] %v746_v44  ;;  %v2959_v31 = vsel %vm2524_vm9, %v2103_v52, %v1214_v54  ;;  %v611_v21 = vshrl.u32 %v2917_v4, 16 }
  0x72   : > { %v1020_v16 = vrot.slane %v1019_v60, 4  ;;  %v614_v46 = vshll.u32 %v2917_v4, 16  ;;  %1128 = vrot.lane.b32.xlu1 %v2089_v9, %s2337_s12  ;;  %1586 = vrot.lane.b32.xlu0 %v2149_v26, %s2335_s8  ;;  %v318_v19 = vadd.f32 %v2319_v39, %v295_v43  ;;  %v319_v8 = vadd.f32 %v2319_v39, %v296_v30  ;;  %v748_v26 = vld [vmem:[#allocation2 + $0x78] sm:$0xf]  ;;  %v751_v4 = vld [vmem:[#allocation2 + $0x7c] sm:$0x1] }
  0x73   : > { %v1034_v56 = vrot.slane %v1033_v37, 4  ;;  %v461_v7 = vsel %vm2466_vm7, 0, %v460_v49  ;;  %v2981_v42 = vsel %vm2524_vm9, %v2104_v14, %v1218_v61  ;;  %v613_v40 = vrot.slane %v611_v21, 7  ;;  %v754_v44 = vld [vmem:[#allocation2 + $0x80] sm:$0xf] }
  0x74   : > { %v1025_v17 = vsel %vm2676_vm12, %v1020_v16, %v1024_v53  ;;  %462 = vst [vmem:[#allocation2 + $0x8c] sm:$0x1] %v461_v7  ;;  %v2244_v32 = vunpack.c.h.bf16 %v2890_v59  ;;  %v334_v55 = vmax.f32 %v318_v19, 0.0  ;;  %v335_v5 = vmax.f32 %v319_v8, 0.0  ;;  %v757_v21 = vld [vmem:[#allocation2 + $0x84] sm:$0x1] }
  0x75   : > { %v2977_v20 = vsel %vm2676_vm12, %v1034_v56, %v1038_v63  ;;  %v414_v23 = vsel %vm2381_vm2, 0, %v413_v12  ;;  %v616_v43 = vor.u32 %v614_v46, %v613_v40  ;;  %v617_v47 = vrot.slane %v613_v40, 4  ;;  %v760_v7 = vld [vmem:[#allocation2 + $0x88] sm:$0xf] }
  0x76   : > { %v2985_v11 = vcombine.low %v1025_v17, %v2977_v20  ;;  %v297_v3 = vmul.f32 %v2318_v2, %v2244_v32  ;;  %415 = vst [vmem:[#allocation2 + $0x90] sm:$0x1] %v414_v23  ;;  %v464_v10 = vsel %vm2466_vm7, 0, %v463_v45  ;;  %1268 = vrot.lane.b32.xlu0 %v2113_v27, %s2333_s6  ;;  %v2996_v59 = vcombine.low %v2959_v31, %v2981_v42 }
  0x77   : > { %v2194_v25 = vpack.c.bf16 %v334_v55, %v334_v55  ;;  %v2195_v30 = vpack.c.bf16 %v335_v5, %v335_v5  ;;  %465 = vst [vmem:[#allocation2 + $0x94] sm:$0x1] %v464_v10  ;;  %v749_v2 = vsel %vm2452_vm6, %v616_v43, %v748_v26  ;;  %v752_v29 = vsel %vm2381_vm2, %v617_v47, %v751_v4 }
  0x78   : > { %1130 = vrot.lane.b32.xlu1 %v2985_v11, %s2337_s12  ;;  %v2998_v9 = vld [vmem:[#allocation2 + $0x70] sm:$0xf]  ;;  %v801_v35 = vld [vmem:[#allocation2 + $0x74] sm:$0x1]  ;;  %v320_v34 = vadd.f32 %v2319_v39, %v297_v3  ;;  %750 = vst [vmem:[#allocation2 + $0x78] sm:$0xf] %v749_v2  ;;  %v2129_v28 = vcombine.low %v2927_v18, %v1025_v17  ;;  %v2139_v39 = vcombine.low %v2915_v22, %v2959_v31 }
  0x79   : > { %v1041_v38 = vshrl.u32 %v2998_v9, 16  ;;  %v1044_v24 = vshll.u32 %v2998_v9, 16  ;;  %v1050_v48 = vshll.u32 %v801_v35, 16  ;;  %753 = vst [vmem:[#allocation2 + $0x7c] sm:$0x1] %v752_v29  ;;  %v619_v52 = vshrl.u32 %v2194_v25, 16 }
  0x7a   : > { %v622_v54 = vshll.u32 %v2194_v25, 16  ;;  %1313 = vrot.lane.b32.xlu0 %v2121_v51, %s2331_s29  ;;  %v2122_v60 = vcombine.low %v2929_v57, %v2998_v9  ;;  %v627_v14 = vshrl.u32 %v2195_v30, 16  ;;  %v2105_v37 = vrot.slane %v2998_v9, 9 }
  0x7b   : > { %v1043_v53 = vrot.slane %v1041_v38, 4  ;;  %v1046_v63 = vrot.slane %v1044_v24, 5  ;;  %v621_v61 = vrot.slane %v619_v52, 7  ;;  %v630_v36 = vshll.u32 %v2195_v30, 16  ;;  %v763_v45 = vld [vmem:[#allocation2 + $0x8c] sm:$0x1] }
  0x7c   : > { %1270 = vrot.lane.b32.xlu1 %v2996_v59, %s2333_s6  ;;  %v336_v49 = vmax.f32 %v320_v34, 0.0  ;;  %v1052_v16 = vrot.slane %v1050_v48, 5  ;;  %v1222_v27 = vrot.slane %v801_v35, 5  ;;  %v629_v56 = vrot.slane %v627_v14, 7 }
  0x7d   : > { %v1047_v18 = vor.u32 %v1046_v63, %v1043_v53  ;;  %v624_v46 = vor.u32 %v622_v54, %v621_v61  ;;  %v625_v12 = vrot.slane %v621_v61, 4  ;;  %v2082_v47 = vcombine.low %v2911_v58, %v2929_v57  ;;  %v766_v38 = vld [vmem:[#allocation2 + $0x90] sm:$0xf]  ;;  %v2320_v63 = vld [vmem:[#allocation2] sm:$0xf] }
  0x7e   : > { %v2196_v51 = vpack.c.bf16 %v336_v49, %v336_v49  ;;  %1384 = vrot.lane.b32.xlu0 %v2129_v28, %s2336_s11  ;;  %v632_v19 = vor.u32 %v630_v36, %v629_v56  ;;  %v633_v8 = vrot.slane %v629_v56, 4  ;;  %v3027_v22 = vsel %vm2524_vm9, %v2105_v37, %v1222_v27  ;;  %v769_v24 = vld [vmem:[#allocation2 + $0x94] sm:$0x1] }
  0x7f   : > { %v1048_v17 = vrot.slane %v1047_v18, 4  ;;  %v3017_v40 = vld [vmem:[#allocation2 + $0x78] sm:$0xf]  ;;  %v755_v32 = vsel %vm2452_vm6, %v624_v46, %v754_v44  ;;  %v758_v4 = vsel %vm2381_vm2, %v625_v12, %v757_v21  ;;  %866 = vst.msk [vmem:[#allocation3 + $0x28] sm:$0xff] %vm860_vm13, %v2082_v47  ;;  %v2077_v14 = vcombine.low %v2320_v63, %v2321_v33 }
  0x80   : > { %1315 = vrot.lane.b32.xlu1 %v2122_v60, %s2331_s29  ;;  %v803_v26 = vld [vmem:[#allocation2 + $0x7c] sm:$0x1]  ;;  %v635_v55 = vshrl.u32 %v2196_v51, 16  ;;  %v1055_v31 = vshrl.u32 %v3017_v40, 16  ;;  %v1058_v23 = vshll.u32 %v3017_v40, 16  ;;  %v638_v10 = vshll.u32 %v2196_v51, 16 }
  0x81   : > { %v1053_v5 = vsel %vm2676_vm12, %v1048_v17, %v1052_v16  ;;  %756 = vst [vmem:[#allocation2 + $0x80] sm:$0xf] %v755_v32  ;;  %759 = vst [vmem:[#allocation2 + $0x84] sm:$0x1] %v758_v4  ;;  %v1064_v3 = vshll.u32 %v803_v26, 16  ;;  %v761_v35 = vsel %vm2452_vm6, %v632_v19, %v760_v7  ;;  %v764_v2 = vsel %vm2381_vm2, %v633_v8, %v763_v45 }
  0x82   : > { %v2130_v43 = vcombine.low %v2977_v20, %v1053_v5  ;;  %1437 = vrot.lane.b32.xlu0 %v2139_v39, %s2334_s7  ;;  %v1057_v25 = vrot.slane %v1055_v31, 4  ;;  %v1060_v30 = vrot.slane %v1058_v23, 5  ;;  %v2140_v20 = vcombine.low %v2981_v42, %v3027_v22  ;;  %762 = vst [vmem:[#allocation2 + $0x88] sm:$0xf] %v761_v35  ;;  %765 = vst [vmem:[#allocation2 + $0x8c] sm:$0x1] %v764_v2 }
  0x83   : > { %v637_v58 = vrot.slane %v635_v55, 7  ;;  %v2083_v57 = vcombine.low %v2998_v9, %v3017_v40  ;;  %v1066_v34 = vrot.slane %v1064_v3, 5  ;;  %v2106_v54 = vrot.slane %v3017_v40, 9  ;;  %861 = vst.msk [vmem:[#allocation3] sm:$0xff] %vm860_vm13, %v2077_v14 }
  0x84   : > { %1386 = vrot.lane.b32.xlu1 %v2130_v43, %s2336_s11  ;;  %v1061_v29 = vor.u32 %v1060_v30, %v1057_v25  ;;  %v1226_v60 = vrot.slane %v803_v26, 5  ;;  %v2081_v16 = vcombine.low %v2754_v0, %v2862_v62  ;;  %vm1666_vm14 = vcmask 1041408  }
  0x85   : > { %v640_v48 = vor.u32 %v638_v10, %v637_v58  ;;  %v641_v28 = vrot.slane %v637_v58, 4  ;;  %867 = vst.msk [vmem:[#allocation3 + $0x30] sm:$0xff] %vm860_vm13, %v2083_v57  ;;  %vm1144_vm15 = vcmask 64544   ;;  %vm1284_vm0 = vcmask 97344  }
  0x86   : > { %1476 = vrot.lane.b32.xlu0 %v2082_v47, %s2332_s30  ;;  %v1062_v52 = vrot.slane %v1061_v29, 4  ;;  %v3072_v1 = vsel %vm2524_vm9, %v2106_v54, %v1226_v60  ;;  %865 = vst.msk [vmem:[#allocation3 + $0x20] sm:$0xff] %vm860_vm13, %v2081_v16  ;;  %v2317_v47 = vld [vmem:[%s3350_s3 + $0x10] ss:$0 sps:$4 sm:$0x33]   ;;  %vm1329_vm1 = vcmask 130144  }
  0x87   : > { %v767_v53 = vsel %vm2452_vm6, %v640_v48, %v766_v38  ;;  %v770_v41 = vsel %vm2381_vm2, %v641_v28, %v769_v24  ;;  %v2115_v0 = vcombine.low %v3027_v22, %v3072_v1  ;;  %2291 = vmatprep.subr.msk.bf16.mxu0 %vm1666_vm14, %v2317_v47  ;;  %2292 = vmatprep.subr.msk.bf16.mxu1 %vm1666_vm14, %v2317_v47  ;;  %vm1400_vm2 = vcmask 162944  }
  0x88   : > { %1439 = vrot.lane.b32.xlu1 %v2140_v20, %s2334_s7  ;;  %v3055_v42 = vld [vmem:[#allocation2 + $0x80] sm:$0xf]  ;;  %v805_v9 = vld [vmem:[#allocation2 + $0x84] sm:$0x1]  ;;  %v3063_v6 = vsel %vm2676_vm12, %v1062_v52, %v1066_v34  ;;  %768 = vst [vmem:[#allocation2 + $0x90] sm:$0xf] %v767_v53 }
  0x89   : > { %v1069_v37 = vshrl.u32 %v3055_v42, 16  ;;  %v1072_v61 = vshll.u32 %v3055_v42, 16  ;;  %771 = vst [vmem:[#allocation2 + $0x94] sm:$0x1] %v770_v41  ;;  %v1078_v36 = vshll.u32 %v805_v9, 16  ;;  %v2091_v27 = vcombine.low %v1053_v5, %v3063_v6 }
  0x8a   : > { %1541 = vrot.lane.b32.xlu0 %v2985_v11, %s2338_s15  ;;  %v3074_v15 = vld [vmem:[#allocation2 + $0x88] sm:$0xf]  ;;  %v807_v44 = vld [vmem:[#allocation2 + $0x8c] sm:$0x1]  ;;  %v2107_v7 = vrot.slane %v3055_v42, 9  ;;  %v1230_v45 = vrot.slane %v805_v9, 5  ;;  %v2123_v58 = vcombine.low %v3017_v40, %v3055_v42 }
  0x8b   : > { %v1071_v49 = vrot.slane %v1069_v37, 4  ;;  %v1074_v18 = vrot.slane %v1072_v61, 5  ;;  %v1083_v56 = vshrl.u32 %v3074_v15, 16  ;;  %v1086_v11 = vshll.u32 %v3074_v15, 16  ;;  %v810_v20 = vld [vmem:[#allocation2 + $0x98] sm:$0xf] }
  0x8c   : > { %1478 = vrot.lane.b32.xlu1 %v2083_v57, %s2332_s30  ;;  %v1092_v21 = vshll.u32 %v807_v44, 16  ;;  %v1080_v12 = vrot.slane %v1078_v36, 5  ;;  %v3089_v39 = vcombine.low %v3055_v42, %v3074_v15  ;;  %v2108_v32 = vrot.slane %v3074_v15, 9  ;;  %v811_v53 = vld [vmem:[#allocation2 + $0x9c] sm:$0x1] }
  0x8d   : > { %v1075_v46 = vor.u32 %v1074_v18, %v1071_v49  ;;  %v1085_v51 = vrot.slane %v1083_v56, 4  ;;  %v1088_v17 = vrot.slane %v1086_v11, 5  ;;  %v1231_v10 = vsel %vm2524_vm9, %v2107_v7, %v1230_v45 }
  0x8e   : > { %1588 = vrot.lane.b32.xlu0 %v2996_v59, %s2335_s8  ;;  %v1094_v8 = vrot.slane %v1092_v21, 5  ;;  %v1234_v59 = vrot.slane %v807_v44, 5  ;;  %868 = vst.msk [vmem:[#allocation3 + $0x38] sm:$0xff] %vm860_vm13, %v3089_v39  ;;  %v1668_v57 = vsel %vm1666_vm14, %v2317_v47, 0  ;;  %v1516_v34 = vshrl.u32 %v810_v20, 16 }
  0x8f   : > { %v1076_v62 = vrot.slane %v1075_v46, 4  ;;  %v1089_v19 = vor.u32 %v1088_v17, %v1085_v51  ;;  %v3093_v26 = vld [vmem:[#allocation2 + $0x90] sm:$0xf]  ;;  %2268 = vmatpush3.bf16.msra.mxu0 %v1668_v57  ;;  %v1519_v48 = vshll.u32 %v810_v20, 16  ;;  %2290 = vmatpush3.bf16.msra.mxu1 %v1668_v57  ;;  %v2141_v41 = vcombine.low %v3072_v1, %v1231_v10 }
  0x90   : > { %1543 = vrot.lane.b32.xlu1 %v2091_v27, %s2338_s15  ;;  %v1353_v4 = vshrl.u32 %v3093_v26, 16  ;;  %v1356_v55 = vshll.u32 %v3093_v26, 16  ;;  %v809_v31 = vld [vmem:[#allocation2 + $0x94] sm:$0x1]  ;;  %v1235_v30 = vsel %vm2524_vm9, %v2108_v32, %v1234_v59  ;;  %v2124_v40 = vcombine.low %v3074_v15, %v3093_v26 }
  0x91   : > { %v1081_v5 = vsel %vm2676_vm12, %v1076_v62, %v1080_v12  ;;  %v1090_v22 = vrot.slane %v1089_v19, 4  ;;  %v1362_v2 = vshll.u32 %v809_v31, 16  ;;  %v2116_v29 = vcombine.low %v1231_v10, %v1235_v30 }
  0x92   : > { %1590 = vrot.lane.b32.xlu0 %v2115_v0, %s2335_s8  ;;  %v1355_v23 = vrot.slane %v1353_v4, 4  ;;  %v1358_v43 = vrot.slane %v1356_v55, 5  ;;  %v2131_v28 = vcombine.low %v3063_v6, %v1081_v5  ;;  %v1518_v52 = vrot.slane %v1516_v34, 4 }
  0x93   : > { %v1095_v3 = vsel %vm2676_vm12, %v1090_v22, %v1094_v8  ;;  %v1364_v24 = vrot.slane %v1362_v2, 5  ;;  %v2134_v60 = vrot.slane %v3093_v26, 9  ;;  %v1417_v42 = vrot.slane %v809_v31, 5 }
  0x94   : > { %1132 = vrot.lane.b32.xlu1 %v2091_v27, %s2337_s12  ;;  %v2092_v25 = vcombine.low %v1081_v5, %v1095_v3  ;;  %v1359_v35 = vor.u32 %v1358_v43, %v1355_v23  ;;  %v1521_v9 = vrot.slane %v1519_v48, 5  ;;  %v1525_v6 = vshll.u32 %v811_v53, 16 }
  0x95   : > { %v1418_v33 = vsel %vm2524_vm9, %v2134_v60, %v1417_v42  ;;  %v2144_v18 = vcombine.low %v3093_v26, %v810_v20  ;;  %v2148_v27 = vrot.slane %v810_v20, 9  ;;  %v1574_v56 = vrot.slane %v811_v53, 5 }
  0x96   : > { %1272 = vrot.lane.b32.xlu0 %v2115_v0, %s2333_s6  ;;  %v1360_v38 = vrot.slane %v1359_v35, 4  ;;  %v1522_v14 = vor.u32 %v1521_v9, %v1518_v52  ;;  %v2142_v36 = vcombine.low %v1235_v30, %v1418_v33  ;;  %v1527_v44 = vrot.slane %v1525_v6, 5 }
  0x97   : > { %v1575_v12 = vsel %vm2524_vm9, %v2148_v27, %v1574_v56  ;;  %vm1453_vm3 = vcmask 195744   ;;  %vm1492_vm4 = vcmask 228544   ;;  %vm1557_vm5 = vcmask 261344  }
  0x98   : > { %1134 = vrot.lane.b32.xlu1 %v2092_v25, %s2337_s12  ;;  %v1365_v54 = vsel %vm2676_vm12, %v1360_v38, %v1364_v24  ;;  %v1523_v15 = vrot.slane %v1522_v14, 4  ;;  %v2150_v51 = vcombine.low %v1418_v33, %v1575_v12  ;;  %vm1604_vm6 = vcmask 294144  }
  0x99   : > { %v2132_v63 = vcombine.low %v1095_v3, %v1365_v54  ;;  %vm1641_vm7 = vcmask 293888   ;;  %vm1831_vm8 = vcmask 68608   ;;  %vm1848_vm9 = vcmask 72704  }
  0x9a   : > { %1317 = vrot.lane.b32.xlu0 %v2123_v58, %s2331_s29  ;;  %v1528_v16 = vsel %vm2676_vm12, %v1523_v15, %v1527_v44  ;;  %vm1957_vm10 = vcmask 1040384   ;;  %vm1959_vm11 = vcmask 66560  }
  0x9b   : > { %v2146_v46 = vcombine.low %v1365_v54, %v1528_v16 }
  0x9c   : > { %1274 = vrot.lane.b32.xlu1 %v2116_v29, %s2333_s6 }
  0x9e   : > { %1388 = vrot.lane.b32.xlu0 %v2131_v28, %s2336_s11 }
  0x9f   : > { %v1308_v37 = vpop.permute.xlu1 %1307 }
  0xa0   : > { %1319 = vrot.lane.b32.xlu1 %v2124_v40, %s2331_s29  ;;  %s2058_s29 = sshll.u32 %s3368_s19, 1 }
  0xa1   : > { %v1306_v61 = vpop.permute.xlu0 %1305 }
  0xa2   : > { %1441 = vrot.lane.b32.xlu0 %v2141_v41, %s2334_s7 }
  0xa3   : > { %v1471_v49 = vpop.permute.xlu1 %1470 }
  0xa4   : > { %1390 = vrot.lane.b32.xlu1 %v2132_v63, %s2336_s11 }
  0xa5   : > { %v1469_v1 = vpop.permute.xlu0 %1468 }
  0xa6   : > { %1480 = vrot.lane.b32.xlu0 %v3089_v39, %s2332_s30 }
  0xa7   : > { %v1312_v11 = vpop.permute.xlu1 %1311 }
  0xa8   : > { %1443 = vrot.lane.b32.xlu1 %v2142_v36, %s2334_s7  ;;  %s241_s7 = scalar_lea.vmem %s3352_s5, %s2058_s29 }
  0xa9   : > { %v1310_v21 = vpop.permute.xlu0 %1309 }
  0xaa   : > { %1545 = vrot.lane.b32.xlu0 %v2092_v25, %s2338_s15 }
  0xac   : > { %1482 = vrot.lane.b32.xlu1 %v2144_v18, %s2332_s30 }
  0xae   : > { %1592 = vrot.lane.b32.xlu0 %v2116_v29, %s2335_s8 }
  0xaf   : > { %v1261_v17 = vpop.permute.xlu1 %1260 }
  0xb0   : > { %1547 = vrot.lane.b32.xlu1 %v2146_v46, %s2338_s15  ;;  %v1430_v50 = vpop.permute.xlu0 %1429 }
  0xb3   : > { %v1263_v0 = vpop.permute.xlu1 %1262 }
  0xb4   : > { %1594 = vrot.lane.b32.xlu1 %v2150_v51, %s2335_s8  ;;  %v1581_v62 = vpop.permute.xlu0 %1580 }
  0xb7   : > { %v1432_v39 = vpop.permute.xlu1 %1431 }
  0xb8   : > { %v1583_v19 = vpop.permute.xlu0 %1582 }
  0xbb   : > { %v1267_v8 = vpop.permute.xlu1 %1266 }
  0xbc   : > { %v1265_v7 = vpop.permute.xlu0 %1264 }
  0xbf   : > { %v1379_v45 = vpop.permute.xlu1 %1378 }
  0xc0   : > { %v1121_v13 = vpop.permute.xlu0 %1120 }
  0xc1   : > { %1145 = vst.msk [vmem:[#allocation3] sm:$0xff] %vm1144_vm15, %v1121_v13 }
  0xc2   : > { %1285 = vst.msk [vmem:[#allocation3] sm:$0xff] %vm1284_vm0, %v1261_v17 }
  0xc3   : > { %v1536_v26 = vpop.permute.xlu1 %1535  ;;  %1330 = vst.msk [vmem:[#allocation3] sm:$0xff] %vm1329_vm1, %v1306_v61 }
  0xc4   : > { %v1123_v32 = vpop.permute.xlu0 %1122 }
  0xc5   : > { %1146 = vst.msk [vmem:[#allocation3 + $0x8] sm:$0xff] %vm1144_vm15, %v1123_v32 }
  0xc6   : > { %1286 = vst.msk [vmem:[#allocation3 + $0x8] sm:$0xff] %vm1284_vm0, %v1263_v0 }
  0xc7   : > { %1331 = vst.msk [vmem:[#allocation3 + $0x8] sm:$0xff] %vm1329_vm1, %v1308_v37  ;;  %v1125_v59 = vpop.permute.xlu1 %1124 }
  0xc8   : > { %1402 = vst.msk [vmem:[#allocation3 + $0x8] sm:$0xff] %vm1400_vm2, %v1379_v45  ;;  %v1377_v4 = vpop.permute.xlu0 %1376 }
  0xc9   : > { %1147 = vst.msk [vmem:[#allocation3 + $0x10] sm:$0xff] %vm1144_vm15, %v1125_v59 }
  0xca   : > { %1455 = vst.msk [vmem:[#allocation3 + $0x8] sm:$0xff] %vm1453_vm3, %v1432_v39 }
  0xcb   : > { %1287 = vst.msk [vmem:[#allocation3 + $0x10] sm:$0xff] %vm1284_vm0, %v1265_v7  ;;  %v1127_v55 = vpop.permute.xlu1 %1126 }
  0xcc   : > { %1401 = vst.msk [vmem:[#allocation3] sm:$0xff] %vm1400_vm2, %v1377_v4  ;;  %v1534_v5 = vpop.permute.xlu0 %1533 }
  0xcd   : > { %1494 = vst.msk [vmem:[#allocation3 + $0x8] sm:$0xff] %vm1492_vm4, %v1471_v49 }
  0xce   : > { %1332 = vst.msk [vmem:[#allocation3 + $0x10] sm:$0xff] %vm1329_vm1, %v1310_v21 }
  0xcf   : > { %1454 = vst.msk [vmem:[#allocation3] sm:$0xff] %vm1453_vm3, %v1430_v50 }
  0xd0   : > { %1559 = vst.msk [vmem:[#allocation3 + $0x8] sm:$0xff] %vm1557_vm5, %v1536_v26  ;;  %v1381_v22 = vpop.permute.xlu0 %1380 }
  0xd1   : > { %1493 = vst.msk [vmem:[#allocation3] sm:$0xff] %vm1492_vm4, %v1469_v1 }
  0xd2   : > { %1606 = vst.msk [vmem:[#allocation3 + $0x8] sm:$0xff] %vm1604_vm6, %v1583_v19 }
  0xd3   : > { %1148 = vst.msk [vmem:[#allocation3 + $0x18] sm:$0xff] %vm1144_vm15, %v1127_v55 }
  0xd4   : > { %1288 = vst.msk [vmem:[#allocation3 + $0x18] sm:$0xff] %vm1284_vm0, %v1267_v8  ;;  %v1383_v31 = vpop.permute.xlu1 %1382  ;;  %v1434_v23 = vpop.permute.xlu0 %1433 }
  0xd5   : > { %1558 = vst.msk [vmem:[#allocation3] sm:$0xff] %vm1557_vm5, %v1534_v5 }
  0xd6   : > { %1333 = vst.msk [vmem:[#allocation3 + $0x18] sm:$0xff] %vm1329_vm1, %v1312_v11 }
  0xd7   : > { %1605 = vst.msk [vmem:[#allocation3] sm:$0xff] %vm1604_vm6, %v1581_v62 }
  0xd8   : > { %1403 = vst.msk [vmem:[#allocation3 + $0x10] sm:$0xff] %vm1400_vm2, %v1381_v22  ;;  %1404 = vst.msk [vmem:[#allocation3 + $0x18] sm:$0xff] %vm1400_vm2, %v1383_v31  ;;  %v1436_v3 = vpop.permute.xlu1 %1435  ;;  %v1473_v10 = vpop.permute.xlu0 %1472 }
  0xd9   : > { %1456 = vst.msk [vmem:[#allocation3 + $0x10] sm:$0xff] %vm1453_vm3, %v1434_v23  ;;  %v1614_v47 = vld [vmem:[#allocation3 + $0x8] sm:$0xff]  ;;  %1457 = vst.msk [vmem:[#allocation3 + $0x18] sm:$0xff] %vm1453_vm3, %v1436_v3 }
  0xda   : > { %1495 = vst.msk [vmem:[#allocation3 + $0x10] sm:$0xff] %vm1492_vm4, %v1473_v10 }
  0xdc   : > { %v1475_v25 = vpop.permute.xlu1 %1474  ;;  %v1538_v30 = vpop.permute.xlu0 %1537 }
  0xdd   : > { %1496 = vst.msk [vmem:[#allocation3 + $0x18] sm:$0xff] %vm1492_vm4, %v1475_v25 }
  0xde   : > { %v1613_v43 = vld [vmem:[#allocation3] sm:$0xff]  ;;  %1560 = vst.msk [vmem:[#allocation3 + $0x10] sm:$0xff] %vm1557_vm5, %v1538_v30 }
  0xdf   : > { %2269 = vmatprep.mubr.msk.bf16.mxu0 %vm1641_vm7, %v1613_v43 }
  0xe0   : > { %2270 = vmatmul.mubr.msk.bf16.vlgmr.msra.gmra.mrb[0].mxu0 %vm1641_vm7, %v1614_v47  ;;  %v1540_v35 = vpop.permute.xlu1 %1539  ;;  %v1585_v2 = vpop.permute.xlu0 %1584 }
  0xe1   : > { %1561 = vst.msk [vmem:[#allocation3 + $0x18] sm:$0xff] %vm1557_vm5, %v1540_v35 }
  0xe2   : > { %1607 = vst.msk [vmem:[#allocation3 + $0x10] sm:$0xff] %vm1604_vm6, %v1585_v2 }
  0xe4   : > { %v1129_v20 = vpop.permute.xlu1 %1128  ;;  %v1587_v58 = vpop.permute.xlu0 %1586 }
  0xe5   : > { %1149 = vst.msk [vmem:[#allocation3 + $0x20] sm:$0xff] %vm1144_vm15, %v1129_v20 }
  0xe6   : > { %1608 = vst.msk [vmem:[#allocation3 + $0x18] sm:$0xff] %vm1604_vm6, %v1587_v58 }
  0xe8   : > { %v1269_v29 = vpop.permute.xlu0 %1268 }
  0xe9   : > { %v1615_v34 = vld [vmem:[#allocation3 + $0x10] sm:$0xff]  ;;  %1289 = vst.msk [vmem:[#allocation3 + $0x20] sm:$0xff] %vm1284_vm0, %v1269_v29 }
  0xea   : > { %v1131_v57 = vpop.permute.xlu1 %1130  ;;  %2273 = vmatprep.mubr.msk.bf16.mxu0 %vm1641_vm7, %v1615_v34 }
  0xeb   : > { %1150 = vst.msk [vmem:[#allocation3 + $0x28] sm:$0xff] %vm1144_vm15, %v1131_v57 }
  0xec   : > { %v1314_v24 = vpop.permute.xlu0 %1313 }
  0xed   : > { %v1616_v48 = vld [vmem:[#allocation3 + $0x18] sm:$0xff]  ;;  %1334 = vst.msk [vmem:[#allocation3 + $0x20] sm:$0xff] %vm1329_vm1, %v1314_v24 }
  0xee   : > { %v1271_v38 = vpop.permute.xlu1 %1270  ;;  %2274 = vmatmul.mubr.msk.bf16.gmra.mrb[4].mxu0 %vm1641_vm7, %v1616_v48 }
  0xef   : > { %1290 = vst.msk [vmem:[#allocation3 + $0x28] sm:$0xff] %vm1284_vm0, %v1271_v38 }
  0xf0   : > { %v1385_v40 = vpop.permute.xlu0 %1384 }
  0xf1   : > { %1405 = vst.msk [vmem:[#allocation3 + $0x20] sm:$0xff] %vm1400_vm2, %v1385_v40 }
  0xf2   : > { %v1316_v28 = vpop.permute.xlu1 %1315 }
  0xf3   : > { %1335 = vst.msk [vmem:[#allocation3 + $0x28] sm:$0xff] %vm1329_vm1, %v1316_v28 }
  0xf4   : > { %v1438_v52 = vpop.permute.xlu0 %1437 }
  0xf5   : > { %1458 = vst.msk [vmem:[#allocation3 + $0x20] sm:$0xff] %vm1453_vm3, %v1438_v52 }
  0xf6   : > { %v1387_v54 = vpop.permute.xlu1 %1386 }
  0xf7   : > { %1406 = vst.msk [vmem:[#allocation3 + $0x28] sm:$0xff] %vm1400_vm2, %v1387_v54 }
  0xf8   : > { %v1477_v60 = vpop.permute.xlu0 %1476 }
  0xf9   : > { %1497 = vst.msk [vmem:[#allocation3 + $0x20] sm:$0xff] %vm1492_vm4, %v1477_v60 }
  0xfa   : > { %v1440_v42 = vpop.permute.xlu1 %1439 }
  0xfb   : > { %1459 = vst.msk [vmem:[#allocation3 + $0x28] sm:$0xff] %vm1453_vm3, %v1440_v42 }
  0xfc   : > { %v1542_v9 = vpop.permute.xlu0 %1541 }
  0xfd   : > { %1562 = vst.msk [vmem:[#allocation3 + $0x20] sm:$0xff] %vm1557_vm5, %v1542_v9 }
  0xfe   : > { %v1479_v53 = vpop.permute.xlu1 %1478 }
  0xff   : > { %1498 = vst.msk [vmem:[#allocation3 + $0x28] sm:$0xff] %vm1492_vm4, %v1479_v53 }
 0x100   : > { %v1589_v41 = vpop.permute.xlu0 %1588 }
 0x101   : > { %1609 = vst.msk [vmem:[#allocation3 + $0x20] sm:$0xff] %vm1604_vm6, %v1589_v41 }
 0x102   : > { %v1544_v63 = vpop.permute.xlu1 %1543 }
 0x103   : > { %1563 = vst.msk [vmem:[#allocation3 + $0x28] sm:$0xff] %vm1557_vm5, %v1544_v63 }
 0x104   : > { %v1591_v33 = vpop.permute.xlu0 %1590 }
 0x105   : > { %1610 = vst.msk [vmem:[#allocation3 + $0x28] sm:$0xff] %vm1604_vm6, %v1591_v33 }
 0x106   : > { %v1133_v14 = vpop.permute.xlu1 %1132 }
 0x107   : > { %1151 = vst.msk [vmem:[#allocation3 + $0x30] sm:$0xff] %vm1144_vm15, %v1133_v14 }
 0x108   : > { %v1273_v6 = vpop.permute.xlu0 %1272  ;;  %v1617_v37 = vld [vmem:[#allocation3 + $0x20] sm:$0xff] }
 0x109   : > { %1291 = vst.msk [vmem:[#allocation3 + $0x30] sm:$0xff] %vm1284_vm0, %v1273_v6  ;;  %2277 = vmatprep.mubr.msk.bf16.mxu1 %vm1641_vm7, %v1617_v37 }
 0x10a   : > { %v1135_v61 = vpop.permute.xlu1 %1134 }
 0x10b   : > { %1152 = vst.msk [vmem:[#allocation3 + $0x38] sm:$0xff] %vm1144_vm15, %v1135_v61 }
 0x10c   : > { %v1318_v36 = vpop.permute.xlu0 %1317  ;;  %v1618_v15 = vld [vmem:[#allocation3 + $0x28] sm:$0xff] }
 0x10d   : > { %1336 = vst.msk [vmem:[#allocation3 + $0x30] sm:$0xff] %vm1329_vm1, %v1318_v36  ;;  %2278 = vmatmul.mubr.msk.bf16.vlgmr.msra.gmra.mrb[0].mxu1 %vm1641_vm7, %v1618_v15 }
 0x10e   : > { %v1275_v44 = vpop.permute.xlu1 %1274 }
 0x10f   : > { %1292 = vst.msk [vmem:[#allocation3 + $0x38] sm:$0xff] %vm1284_vm0, %v1275_v44 }
 0x110   : > { %v1389_v49 = vpop.permute.xlu0 %1388 }
 0x111   : > { %1407 = vst.msk [vmem:[#allocation3 + $0x30] sm:$0xff] %vm1400_vm2, %v1389_v49 }
 0x112   : > { %v1320_v1 = vpop.permute.xlu1 %1319 }
 0x113   : > { %1337 = vst.msk [vmem:[#allocation3 + $0x38] sm:$0xff] %vm1329_vm1, %v1320_v1 }
 0x114   : > { %v1442_v18 = vpop.permute.xlu0 %1441 }
 0x115   : > { %1460 = vst.msk [vmem:[#allocation3 + $0x30] sm:$0xff] %vm1453_vm3, %v1442_v18 }
 0x116   : > { %v1391_v16 = vpop.permute.xlu1 %1390 }
 0x117   : > { %1408 = vst.msk [vmem:[#allocation3 + $0x38] sm:$0xff] %vm1400_vm2, %v1391_v16 }
 0x118   : > { %v1481_v27 = vpop.permute.xlu0 %1480 }
 0x119   : > { %1499 = vst.msk [vmem:[#allocation3 + $0x30] sm:$0xff] %vm1492_vm4, %v1481_v27 }
 0x11a   : > { %v1444_v56 = vpop.permute.xlu1 %1443 }
 0x11b   : > { %1461 = vst.msk [vmem:[#allocation3 + $0x38] sm:$0xff] %vm1453_vm3, %v1444_v56 }
 0x11c   : > { %v1546_v11 = vpop.permute.xlu0 %1545 }
 0x11d   : > { %1564 = vst.msk [vmem:[#allocation3 + $0x30] sm:$0xff] %vm1557_vm5, %v1546_v11 }
 0x11e   : > { %v1483_v21 = vpop.permute.xlu1 %1482 }
 0x11f   : > { %1500 = vst.msk [vmem:[#allocation3 + $0x38] sm:$0xff] %vm1492_vm4, %v1483_v21 }
 0x120   : > { %v1593_v46 = vpop.permute.xlu0 %1592 }
 0x121   : > { %1611 = vst.msk [vmem:[#allocation3 + $0x30] sm:$0xff] %vm1604_vm6, %v1593_v46 }
 0x122   : > { %v1548_v12 = vpop.permute.xlu1 %1547 }
 0x123   : > { %1565 = vst.msk [vmem:[#allocation3 + $0x38] sm:$0xff] %vm1557_vm5, %v1548_v12 }
 0x126   : > { %v1595_v51 = vpop.permute.xlu1 %1594 }
 0x127   : > { %1612 = vst.msk [vmem:[#allocation3 + $0x38] sm:$0xff] %vm1604_vm6, %v1595_v51 }
 0x128   : > { %v1619_v17 = vld [vmem:[#allocation3 + $0x30] sm:$0xff] }
 0x129   : > { %2281 = vmatprep.mubr.msk.bf16.mxu1 %vm1641_vm7, %v1619_v17 }
 0x12e   : > { %v1620_v50 = vld [vmem:[#allocation3 + $0x38] sm:$0xff] }
 0x12f   : > { %2282 = vmatmul.mubr.msk.bf16.gmra.mrb[4].mxu1 %vm1641_vm7, %v1620_v50 }
 0x1b3   : > { %v3223_v0 = vpop.f32.mrb[0].mxu0 }
 0x1b4   : > { %v2199_v62 = vpack.c.bf16 %v3223_v0, %v3223_v0  ;;  %v3227_v39 = vpop.f32.mrb[1].mxu0  ;;  %v1852_v4 = vsel %vm1848_vm9, %v3223_v0, 0.0 }
 0x1b5   : > { %v2197_v19 = vpack.c.bf16 %v3227_v39, %v3227_v39  ;;  %v3231_v8 = vpop.f32.mrb[2].mxu0  ;;  %v1849_v13 = vsel %vm1848_vm9, %v3227_v39, 0.0 }
 0x1b6   : > { %1834 = vst.msk [vmem:[%s3221_s28 + $0x8] sm:$0xf] %vm1831_vm8, %v2199_v62  ;;  %v2200_v7 = vpack.c.bf16 %v3231_v8, %v3231_v8  ;;  %v3237_v45 = vpop.f32.mrb[3].mxu0  ;;  %v1854_v5 = vsel %vm1848_vm9, %v3231_v8, 0.0 }
 0x1b7   : > { %1832 = vst.msk [vmem:[%s3221_s28] sm:$0xf] %vm1831_vm8, %v2197_v19  ;;  %v2198_v26 = vpack.c.bf16 %v3237_v45, %v3237_v45  ;;  %v1850_v32 = vsel %vm1848_vm9, %v3237_v45, 0.0 }
 0x1b8   : > { %1835 = vst.msk [vmem:[%s3221_s28 + $0xc] sm:$0xf] %vm1831_vm8, %v2200_v7  ;;  %v1851_v59 = vadd.f32 %v1850_v32, %v1849_v13 }
 0x1b9   : > { %1833 = vst.msk [vmem:[%s3221_s28 + $0x4] sm:$0xf] %vm1831_vm8, %v2198_v26 }
 0x1ba   : > { %v1853_v55 = vadd.f32 %v1852_v4, %v1851_v59 }
 0x1bc   : > { %v1855_v22 = vadd.f32 %v1854_v5, %v1853_v55 }
 0x1c1   : > { %v3255_v31 = vpop.f32.mrb[4].mxu0 }
 0x1c2   : > { %v2203_v23 = vpack.c.bf16 %v3255_v31, %v3255_v31  ;;  %v3259_v43 = vpop.f32.mrb[5].mxu0  ;;  %v1860_v57 = vsel %vm1848_vm9, %v3255_v31, 0.0 }
 0x1c3   : > { %v2201_v47 = vpack.c.bf16 %v3259_v43, %v3259_v43  ;;  %v1856_v3 = vsel %vm1848_vm9, %v3259_v43, 0.0  ;;  %v3265_v10 = vpop.f32.mrb[6].mxu0 }
 0x1c4   : > { %1838 = vst.msk [vmem:[%s3221_s28 + $0x18] sm:$0xf] %vm1831_vm8, %v2203_v23  ;;  %v1857_v25 = vadd.f32 %v1856_v3, %v1855_v22  ;;  %v2204_v30 = vpack.c.bf16 %v3265_v10, %v3265_v10  ;;  %v3271_v35 = vpop.f32.mrb[7].mxu0  ;;  %v1862_v34 = vsel %vm1848_vm9, %v3265_v10, 0.0 }
 0x1c5   : > { %1836 = vst.msk [vmem:[%s3221_s28 + $0x10] sm:$0xf] %vm1831_vm8, %v2201_v47  ;;  %v2202_v2 = vpack.c.bf16 %v3271_v35, %v3271_v35  ;;  %v1858_v20 = vsel %vm1848_vm9, %v3271_v35, 0.0 }
 0x1c6   : > { %1839 = vst.msk [vmem:[%s3221_s28 + $0x1c] sm:$0xf] %vm1831_vm8, %v2204_v30  ;;  %v1859_v58 = vadd.f32 %v1858_v20, %v1857_v25 }
 0x1c7   : > { %1837 = vst.msk [vmem:[%s3221_s28 + $0x14] sm:$0xf] %vm1831_vm8, %v2202_v2 }
 0x1c8   : > { %v1861_v29 = vadd.f32 %v1860_v57, %v1859_v58 }
 0x1ca   : > { %v1863_v38 = vadd.f32 %v1862_v34, %v1861_v29 }
 0x1e0   : > { %v2279_v24 = vpop.f32.mrb[0].mxu1 }
 0x1e1   : > { %v2207_v48 = vpack.c.bf16 %v2279_v24, %v2279_v24  ;;  %v1736_v28 = vpop.f32.mrb[1].mxu1  ;;  %v1868_v33 = vsel %vm1848_vm9, %v2279_v24, 0.0 }
 0x1e2   : > { %v2205_v40 = vpack.c.bf16 %v1736_v28, %v1736_v28  ;;  %v1864_v52 = vsel %vm1848_vm9, %v1736_v28, 0.0  ;;  %v2280_v54 = vpop.f32.mrb[2].mxu1 }
 0x1e3   : > { %1842 = vst.msk [vmem:[%s3221_s28 + $0x28] sm:$0xf] %vm1831_vm8, %v2207_v48  ;;  %v1865_v60 = vadd.f32 %v1864_v52, %v1863_v38  ;;  %v2208_v42 = vpack.c.bf16 %v2280_v54, %v2280_v54  ;;  %v1739_v9 = vpop.f32.mrb[3].mxu1  ;;  %v1870_v6 = vsel %vm1848_vm9, %v2280_v54, 0.0 }
 0x1e4   : > { %1840 = vst.msk [vmem:[%s3221_s28 + $0x20] sm:$0xf] %vm1831_vm8, %v2205_v40  ;;  %v2206_v53 = vpack.c.bf16 %v1739_v9, %v1739_v9  ;;  %v1866_v41 = vsel %vm1848_vm9, %v1739_v9, 0.0 }
 0x1e5   : > { %1843 = vst.msk [vmem:[%s3221_s28 + $0x2c] sm:$0xf] %vm1831_vm8, %v2208_v42  ;;  %v1867_v63 = vadd.f32 %v1866_v41, %v1865_v60 }
 0x1e6   : > { %1841 = vst.msk [vmem:[%s3221_s28 + $0x24] sm:$0xf] %vm1831_vm8, %v2206_v53 }
 0x1e7   : > { %v1869_v14 = vadd.f32 %v1868_v33, %v1867_v63 }
 0x1e9   : > { %v1871_v37 = vadd.f32 %v1870_v6, %v1869_v14 }
 0x202   : > { %v2283_v61 = vpop.f32.mrb[4].mxu1 }
 0x203   : > { %v2211_v36 = vpack.c.bf16 %v2283_v61, %v2283_v61  ;;  %v1752_v15 = vpop.f32.mrb[5].mxu1  ;;  %v1876_v46 = vsel %vm1848_vm9, %v2283_v61, 0.0 }
 0x204   : > { %v2209_v44 = vpack.c.bf16 %v1752_v15, %v1752_v15  ;;  %v1872_v49 = vsel %vm1848_vm9, %v1752_v15, 0.0  ;;  %v2284_v1 = vpop.f32.mrb[6].mxu1 }
 0x205   : > { %1846 = vst.msk [vmem:[%s3221_s28 + $0x38] sm:$0xf] %vm1831_vm8, %v2211_v36  ;;  %v1873_v18 = vadd.f32 %v1872_v49, %v1871_v37  ;;  %v2212_v16 = vpack.c.bf16 %v2284_v1, %v2284_v1  ;;  %v1755_v27 = vpop.f32.mrb[7].mxu1  ;;  %v1878_v51 = vsel %vm1848_vm9, %v2284_v1, 0.0 }
 0x206   : > { %1844 = vst.msk [vmem:[%s3221_s28 + $0x30] sm:$0xf] %vm1831_vm8, %v2209_v44  ;;  %v2210_v56 = vpack.c.bf16 %v1755_v27, %v1755_v27  ;;  %v1874_v11 = vsel %vm1848_vm9, %v1755_v27, 0.0 }
 0x207   : > { %1847 = vst.msk [vmem:[%s3221_s28 + $0x3c] sm:$0xf] %vm1831_vm8, %v2212_v16  ;;  %v1875_v21 = vadd.f32 %v1874_v11, %v1873_v18 }
 0x208   : > { %1845 = vst.msk [vmem:[%s3221_s28 + $0x34] sm:$0xf] %vm1831_vm8, %v2210_v56 }
 0x209   : > { %v1877_v12 = vadd.f32 %v1876_v46, %v1875_v21 }
 0x20b   : > { %v1879_v17 = vadd.f32 %v1878_v51, %v1877_v12 }
 0x20d   : > { %v1880_v50 = vrot.slane %v1879_v17, 4 }
 0x20f   : > { %v1881_v62 = vadd.f32 %v1880_v50, %v1879_v17 }
 0x211   : > { %v1882_v19 = vrot.slane %v1881_v62, 2 }
 0x213   : > { %v1883_v7 = vadd.f32 %v1882_v19, %v1881_v62 }
 0x215   : > { %v1884_v13 = vrot.slane %v1883_v7, 1 }
 0x217   : > { %v3311_v26 = vadd.f32 %v1884_v13, %v1883_v7 }
 0x219   : > { %v1887_v32 = vmul.f32 0.0078125, %v3311_v26 }
 0x21b   : > { %v1888_v59 = vsub.f32 %v3227_v39, %v1887_v32  ;;  %v1889_v4 = vsub.f32 %v3237_v45, %v1887_v32  ;;  %v1890_v55 = vsub.f32 %v3223_v0, %v1887_v32  ;;  %v1891_v5 = vsub.f32 %v3231_v8, %v1887_v32 }
 0x21c   : > { %v1892_v22 = vsub.f32 %v3259_v43, %v1887_v32  ;;  %v1893_v23 = vsub.f32 %v3271_v35, %v1887_v32  ;;  %v1894_v47 = vsub.f32 %v3255_v31, %v1887_v32  ;;  %v1895_v3 = vsub.f32 %v3265_v10, %v1887_v32 }
 0x21d   : > { %v1896_v25 = vsub.f32 %v1736_v28, %v1887_v32  ;;  %v1897_v30 = vsub.f32 %v1739_v9, %v1887_v32  ;;  %v1898_v2 = vsub.f32 %v2279_v24, %v1887_v32  ;;  %v1899_v20 = vsub.f32 %v2280_v54, %v1887_v32 }
 0x21e   : > { %v1900_v58 = vsub.f32 %v1752_v15, %v1887_v32  ;;  %v1901_v39 = vsub.f32 %v1755_v27, %v1887_v32  ;;  %v1902_v57 = vsub.f32 %v2283_v61, %v1887_v32  ;;  %v1903_v45 = vsub.f32 %v2284_v1, %v1887_v32 }
 0x21f   : > { %v1904_v29 = vmul.f32 %v1888_v59, %v1888_v59  ;;  %v1905_v0 = vmul.f32 %v1889_v4, %v1889_v4  ;;  %v1906_v34 = vmul.f32 %v1890_v55, %v1890_v55  ;;  %v1907_v8 = vmul.f32 %v1891_v5, %v1891_v5 }
 0x220   : > { %v1908_v31 = vmul.f32 %v1892_v22, %v1892_v22  ;;  %v1909_v28 = vmul.f32 %v1893_v23, %v1893_v23  ;;  %v1910_v52 = vmul.f32 %v1894_v47, %v1894_v47  ;;  %v1911_v42 = vmul.f32 %v1895_v3, %v1895_v3 }
 0x221   : > { %v1920_v43 = vsel %vm1848_vm9, %v1904_v29, 0.0  ;;  %v1921_v35 = vsel %vm1848_vm9, %v1905_v0, 0.0  ;;  %v1923_v10 = vsel %vm1848_vm9, %v1906_v34, 0.0  ;;  %v1925_v24 = vsel %vm1848_vm9, %v1907_v8, 0.0 }
 0x222   : > { %v1922_v38 = vadd.f32 %v1921_v35, %v1920_v43  ;;  %v1927_v54 = vsel %vm1848_vm9, %v1908_v31, 0.0  ;;  %v1929_v9 = vsel %vm1848_vm9, %v1909_v28, 0.0  ;;  %v1912_v41 = vmul.f32 %v1896_v25, %v1896_v25 }
 0x223   : > { %v1931_v63 = vsel %vm1848_vm9, %v1910_v52, 0.0  ;;  %v1913_v14 = vmul.f32 %v1897_v30, %v1897_v30  ;;  %v1933_v6 = vsel %vm1848_vm9, %v1911_v42, 0.0  ;;  %v1914_v61 = vmul.f32 %v1898_v2, %v1898_v2 }
 0x224   : > { %v1924_v48 = vadd.f32 %v1923_v10, %v1922_v38  ;;  %v1935_v36 = vsel %vm1848_vm9, %v1912_v41, 0.0  ;;  %v1915_v44 = vmul.f32 %v1899_v20, %v1899_v20  ;;  %v1916_v18 = vmul.f32 %v1900_v58, %v1900_v58 }
 0x225   : > { %v1937_v49 = vsel %vm1848_vm9, %v1913_v14, 0.0  ;;  %v1939_v16 = vsel %vm1848_vm9, %v1914_v61, 0.0  ;;  %v1917_v56 = vmul.f32 %v1901_v39, %v1901_v39  ;;  %v1918_v46 = vmul.f32 %v1902_v57, %v1902_v57 }
 0x226   : > { %v1926_v40 = vadd.f32 %v1925_v24, %v1924_v48  ;;  %v1941_v11 = vsel %vm1848_vm9, %v1915_v44, 0.0  ;;  %v1943_v12 = vsel %vm1848_vm9, %v1916_v18, 0.0  ;;  %v1919_v17 = vmul.f32 %v1903_v45, %v1903_v45 }
 0x227   : > { %v1945_v50 = vsel %vm1848_vm9, %v1917_v56, 0.0  ;;  %v1947_v19 = vsel %vm1848_vm9, %v1918_v46, 0.0 }
 0x228   : > { %v1928_v60 = vadd.f32 %v1927_v54, %v1926_v40  ;;  %v1949_v13 = vsel %vm1848_vm9, %v1919_v17, 0.0 }
 0x22a   : > { %v1930_v53 = vadd.f32 %v1929_v9, %v1928_v60 }
 0x22c   : > { %v1932_v33 = vadd.f32 %v1931_v63, %v1930_v53 }
 0x22e   : > { %v1934_v37 = vadd.f32 %v1933_v6, %v1932_v33 }
 0x230   : > { %v1936_v15 = vadd.f32 %v1935_v36, %v1934_v37 }
 0x232   : > { %v1938_v1 = vadd.f32 %v1937_v49, %v1936_v15 }
 0x234   : > { %v1940_v27 = vadd.f32 %v1939_v16, %v1938_v1 }
 0x236   : > { %v1942_v21 = vadd.f32 %v1941_v11, %v1940_v27 }
 0x238   : > { %v1944_v51 = vadd.f32 %v1943_v12, %v1942_v21 }
 0x23a   : > { %v1946_v62 = vadd.f32 %v1945_v50, %v1944_v51 }
 0x23c   : > { %v1948_v7 = vadd.f32 %v1947_v19, %v1946_v62 }
 0x23e   : > { %v1950_v32 = vadd.f32 %v1949_v13, %v1948_v7 }
 0x240   : > { %v1951_v59 = vrot.slane %v1950_v32, 4 }
 0x242   : > { %v1952_v4 = vadd.f32 %v1951_v59, %v1950_v32 }
 0x244   : > { %v1953_v55 = vrot.slane %v1952_v4, 2 }
 0x246   : > { %v1954_v5 = vadd.f32 %v1953_v55, %v1952_v4 }
 0x248   : > { %v1955_v22 = vrot.slane %v1954_v5, 1 }
 0x24a   : > { %v1956_v23 = vadd.f32 %v1955_v22, %v1954_v5 }
 0x24c   : > { %v1958_v47 = vsel %vm1957_vm10, %v3311_v26, %v1956_v23 }
 0x24d   : > { %1960 = vst.msk [vmem:[%s241_s7] sm:$0x3] %vm1959_vm11, %v1958_v47 }
 0x24e PF: > { %s16_s18 = sadd.s32 1, %s2328_s18  }
 0x24f   : > { %p13_p6 = scmp.ge.s32.totalorder %s16_s18, 10  }
 0x251   :  { %15 = sbr.rel (!%p13_p6) target bundleno = 1 (0x1), region = 80 }

// kernel: basic_block_forward.9
= control target key start
LH: loop header
LB: loop body
LE: loop exit
PB: predicated region body
PF: predicated region fallthrough
CT: control target
= control target key end

     0   :  { %v25_v0 = vlaneseq  ;;  %s136_s0 = inlined_call_operand.vmem [shape: bf16[16,256], index: 0, kind: input, shape index: {}]   ;;  %s137_s2 = inlined_call_operand.vmem [shape: f32[1,256], index: 2, kind: input, shape index: {}]   ;;  %s138_s3 = inlined_call_operand.vmem [shape: f32[1,256], index: 3, kind: input, shape index: {}]   ;;  %s139_s1 = inlined_call_operand.vmem [shape: f32[16,256], index: 1, kind: input, shape index: {}]   ;;  %s140_s4 = inlined_call_operand.vmem [shape: f32[16,256], index: 4, kind: output, shape index: {}]  }
   0x1   :  { %v17_v1 = vld [vmem:[%s136_s0] sm:$0xff]  ;;  %v18_v3 = vld [vmem:[%s136_s0 + $0x8] sm:$0xff]  ;;  %v57_v22 = vld [vmem:[%s139_s1 + $0x10] sm:$0xff] }
   0x2   :  { %v26_v2 = vshrl.u32 %v25_v0, 7  ;;  %v19_v4 = vunpack.c.l.bf16 %v17_v1  ;;  %v23_v5 = vld [vmem:[%s137_s2] sm:$0x3]  ;;  %v20_v7 = vunpack.c.h.bf16 %v17_v1  ;;  %v21_v10 = vunpack.c.l.bf16 %v18_v3  ;;  %v56_v21 = vld [vmem:[%s139_s1 + $0x8] sm:$0xff]  ;;  %v58_v23 = vld [vmem:[%s139_s1 + $0x18] sm:$0xff] }
   0x3   :  { %v39_v6 = vld [vmem:[%s138_s3] sm:$0x3]  ;;  %v22_v11 = vunpack.c.h.bf16 %v18_v3 }
   0x4   :  { %v27_v8 = vsub.s32 0, %v26_v2  ;;  %v31_v9 = vsub.s32 1, %v26_v2  ;;  %v55_v17 = vld [vmem:[%s139_s1] sm:$0xff] }
   0x6   :  { %v28_v12 = vrot.slane %v23_v5, %v27_v8  ;;  %v44_v13 = vrot.slane %v39_v6, %v27_v8  ;;  %v32_v14 = vrot.slane %v23_v5, %v31_v9  ;;  %v48_v15 = vrot.slane %v39_v6, %v31_v9 }
   0x8   :  { %v35_v16 = vmul.f32 %v28_v12, %v19_v4  ;;  %v36_v18 = vmul.f32 %v32_v14, %v20_v7  ;;  %v37_v19 = vmul.f32 %v28_v12, %v21_v10  ;;  %v38_v20 = vmul.f32 %v32_v14, %v22_v11 }
   0xa   :  { %v51_v24 = vadd.f32 %v44_v13, %v35_v16  ;;  %v52_v25 = vadd.f32 %v48_v15, %v36_v18  ;;  %v53_v26 = vadd.f32 %v44_v13, %v37_v19  ;;  %v54_v27 = vadd.f32 %v48_v15, %v38_v20 }
   0xc   :  { %v59_v28 = vadd.f32 %v55_v17, %v51_v24  ;;  %v60_v29 = vadd.f32 %v56_v21, %v52_v25  ;;  %v61_v30 = vadd.f32 %v57_v22, %v53_v26  ;;  %v62_v31 = vadd.f32 %v58_v23, %v54_v27 }
   0xe   :  { %v63_v32 = vmax.f32 %v59_v28, 0.0  ;;  %v64_v33 = vmax.f32 %v60_v29, 0.0  ;;  %v65_v34 = vmax.f32 %v61_v30, 0.0  ;;  %v66_v35 = vmax.f32 %v62_v31, 0.0 }
  0x10   :  { %67 = vst [vmem:[%s140_s4] sm:$0xff] %v63_v32  ;;  %68 = vst [vmem:[%s140_s4 + $0x8] sm:$0xff] %v64_v33 }
  0x11   :  { %69 = vst [vmem:[%s140_s4 + $0x10] sm:$0xff] %v65_v34  ;;  %70 = vst [vmem:[%s140_s4 + $0x18] sm:$0xff] %v66_v35 }

</bundles_post_ra>
